<compile_context>
chip_gen: v6e
topology: v6e:2x2x1
jax: 0.10.0
libtpu: 0.0.40
codegen_flags: <defaults>
</compile_context>

<pallas_src>
import math

import jax
import jax.numpy as jnp
from jax import lax
from jax.experimental import pallas as pl
from jax.experimental.pallas import tpu as pltpu


# ----------------------------------------------------------------------------
# Helpers
# ----------------------------------------------------------------------------
def _round_up(x, m):
    return (x + m - 1) // m * m


_VMEM_LIMIT_CACHE = []


def _vmem_limit_bytes():
    """Generation-aware scoped-VMEM limit: half of physical VMEM.

    v5e/v6e (128 MiB physical) -> 64 MiB (raised from the 16/32 MiB defaults),
    v7x   (64 MiB physical)    -> 32 MiB (== its default; never over-asks).
    Falls back to a safe 32 MiB if the hardware query is unavailable.
    """
    if not _VMEM_LIMIT_CACHE:
        try:
            cap = int(pltpu.get_tpu_info().vmem_capacity_bytes)
        except Exception:
            cap = 64 * 1024 * 1024
        _VMEM_LIMIT_CACHE.append(min(cap // 2, 96 * 1024 * 1024))
    return _VMEM_LIMIT_CACHE[0]


# ----------------------------------------------------------------------------
# Fused FPN-level kernel:
#     p  = conv3x3( conv1x1(x) + b1 [+ nearest2x(residual)] ) + b3
# One grid step == one image.  The 1x1-conv result stays resident in VMEM.
# ----------------------------------------------------------------------------
def _make_level_kernel(w_true, has_res, emit_p1):
    """Builds the kernel body.

    Block layout per grid step (one image):
      x_ref    : (1, H, Wc, Cin)   bf16  (W zero-padded to Wc, multiple of 8)
      w1_ref   : (Cin, F)          bf16
      b1_ref   : (1, F)            f32
      wcat_ref : (3, 3F, F)        bf16  taps grouped kj-major, ki stacked in K
      b2_ref   : (1, F)            f32
      res_ref  : (1, H//2, Wc, F)  bf16  (optional; W already 2x-expanded)
      p_ref    : (1, H, Wc, F)     f32   3x3-conv output
      p1_ref   : (1, H, Wc, F)     bf16  (optional) 1x1-conv output
      pad_ref  : (H+2, Wc+16, F)   bf16  VMEM scratch with zero halo
    """

    def kernel(*refs):
        x_ref, w1_ref, b1_ref, wcat_ref, b2_ref = refs[:5]
        i = 5
        res_ref = None
        if has_res:
            res_ref = refs[i]
            i += 1
        p_ref = refs[i]
        i += 1
        p1_ref = None
        if emit_p1:
            p1_ref = refs[i]
            i += 1
        pad_ref = refs[i]

        _, H, Wc, F = p_ref.shape
        Cin = x_ref.shape[-1]

        # ---- 1x1 lateral conv (MXU, f32 accumulate) + bias (+ residual) ----
        x2d = x_ref[0].reshape(H * Wc, Cin)
        z = jnp.dot(x2d, w1_ref[...], preferred_element_type=jnp.float32)
        z = z + b1_ref[...]
        if has_res:
            # Nearest-2x upsample along H fused into the add: view output rows
            # as (H//2, 2, Wc) pairs (tile-preserving reshape, Wc % 8 == 0) and
            # broadcast the half-height residual across the pair axis.
            z = z.reshape(H // 2, 2, Wc, F)
            z = z + res_ref[0][:, None, :, :].astype(jnp.float32)
        z = z.reshape(H, Wc, F)

        # Zero junk columns (>= true W) so the 3x3 "same" padding stays
        # correct at the right image edge.
        if w_true < Wc:
            col = lax.broadcasted_iota(jnp.int32, (1, Wc, 1), 1)
            z = jnp.where(col < w_true, z, 0.0)
        p1 = z.astype(jnp.bfloat16)
        if emit_p1:
            p1_ref[0] = p1

        # ---- 3x3 conv on the resident p1: zero-halo scratch + 3 matmuls ----
        pad_ref[...] = jnp.zeros_like(pad_ref)
        pad_ref[1:H + 1, 8:8 + Wc, :] = p1       # sublane-aligned interior store

        acc = jnp.zeros((H * Wc, F), jnp.float32)
        for kj in range(3):                       # statically unrolled column taps
            xs = pad_ref[:, 7 + kj:7 + kj + Wc, :]             # (H+2, Wc, F)
            xcat = jnp.concatenate(
                [xs[0:H], xs[1:H + 1], xs[2:H + 2]], axis=-1)  # (H, Wc, 3F)
            acc = acc + jnp.dot(xcat.reshape(H * Wc, 3 * F), wcat_ref[kj],
                                preferred_element_type=jnp.float32)
        acc = acc + b2_ref[...]
        p_ref[0] = acc.reshape(H, Wc, F).astype(p_ref.dtype)

    return kernel


def fpn_level(x_nhwc, w1, b1, w3_hwio, b3, res_half=None, emit_p1=True):
    """One fused FPN level.

    x_nhwc  : (N, H, W, Cin) bf16 backbone feature.
    w1, b1  : 1x1 conv, (Cin, F) bf16 / (F,) f32.
    w3_hwio : 3x3 conv, (3, 3, F, F) bf16; b3 (F,) f32.
    res_half: optional (N, H//2, W, F) bf16 — the coarser P*_1 with its W axis
              already nearest-2x expanded (the H expansion happens in-kernel).
    Returns p (N, H, W, F) f32 and, if emit_p1, p1 (N, H, Wc, F) bf16 at padded
    width Wc (callers crop with [..., :W, :] before reuse).
    """
    N, H, W, Cin = x_nhwc.shape
    F = w1.shape[1]
    Wc = _round_up(W, 8)
    if Wc != W:
        x_nhwc = jnp.pad(x_nhwc, ((0, 0), (0, 0), (0, Wc - W), (0, 0)))

    # Tap-grouped 3x3 weights: wcat[kj][ki*F + c, f] = w3[ki, kj, c, f].
    wcat = jnp.transpose(w3_hwio, (1, 0, 2, 3)).reshape(3, 3 * F, F)
    b1_2d = b1.reshape(1, F).astype(jnp.float32)
    b3_2d = b3.reshape(1, F).astype(jnp.float32)

    args = [x_nhwc, w1, b1_2d, wcat, b3_2d]
    in_specs = [
        pl.BlockSpec((1, H, Wc, Cin), lambda n: (n, 0, 0, 0)),   # image
        pl.BlockSpec((Cin, F), lambda n: (0, 0)),                # 1x1 weight
        pl.BlockSpec((1, F), lambda n: (0, 0)),                  # bias 1
        pl.BlockSpec((3, 3 * F, F), lambda n: (0, 0, 0)),        # 3x3 weights
        pl.BlockSpec((1, F), lambda n: (0, 0)),                  # bias 3
    ]
    if res_half is not None:
        assert res_half.shape == (N, H // 2, W, F), res_half.shape
        if Wc != W:
            res_half = jnp.pad(res_half, ((0, 0), (0, 0), (0, Wc - W), (0, 0)))
        args.append(res_half)
        in_specs.append(pl.BlockSpec((1, H // 2, Wc, F), lambda n: (n, 0, 0, 0)))

    if emit_p1:
        out_shape = (jax.ShapeDtypeStruct((N, H, Wc, F), jnp.float32),
                     jax.ShapeDtypeStruct((N, H, Wc, F), jnp.bfloat16))
        out_specs = (pl.BlockSpec((1, H, Wc, F), lambda n: (n, 0, 0, 0)),
                     pl.BlockSpec((1, H, Wc, F), lambda n: (n, 0, 0, 0)))
        out_list = list(out_shape)
    else:
        out_shape = jax.ShapeDtypeStruct((N, H, Wc, F), jnp.float32)
        out_specs = pl.BlockSpec((1, H, Wc, F), lambda n: (n, 0, 0, 0))
        out_list = [out_shape]

    flops = N * (2 * H * Wc * Cin * F + 3 * 2 * H * Wc * (3 * F) * F)
    bytes_accessed = sum(int(a.size) * a.dtype.itemsize for a in args)
    bytes_accessed += sum(math.prod(s.shape) * jnp.dtype(s.dtype).itemsize
                          for s in out_list)

    kernel = _make_level_kernel(W, res_half is not None, emit_p1)
    out = pl.pallas_call(
        kernel,
        out_shape=out_shape,
        grid=(N,),
        in_specs=in_specs,
        out_specs=out_specs,
        scratch_shapes=[pltpu.VMEM((H + 2, Wc + 16, F), jnp.bfloat16)],
        compiler_params=pltpu.CompilerParams(
            dimension_semantics=("parallel",),
            vmem_limit_bytes=_vmem_limit_bytes()),
        cost_estimate=pl.CostEstimate(flops=flops, transcendentals=0,
                                      bytes_accessed=bytes_accessed),
    )(*args)
    # TODO(synk): for large feature maps (whole padded image + 3F-wide taps no
    # longer fitting the per-step VMEM budget, esp. on v7x's 64 MiB part), add
    # a second grid axis over H row-blocks using memory_space=pl.ANY +
    # pltpu.make_async_copy for the 1-row halo and recompute the halo rows of
    # the 1x1 conv per block; this also guarantees >=2 parallel steps when N==1.
    # TODO(synk): fuse the W half of the 2x-nearest residual expansion in-kernel
    # (quarter-res read); kept as XLA glue because the sublane interleave is
    # risky to lower in Mosaic.
    if emit_p1:
        p, p1 = out
        return p[:, :, :W, :], p1
    return out[:, :, :W, :]


# ----------------------------------------------------------------------------
# Parameters (stored f32, cast to bf16 once in the forward)
# ----------------------------------------------------------------------------
def make_params(C3_size, C4_size, C5_size, feature_size, key):
    ks = jax.random.split(key, 16)
    i = iter(range(16))

    def w(k, shape):
        return jax.random.normal(k, shape, jnp.float32) * 0.05

    p = {}
    p["P5_1_w"] = w(ks[next(i)], (C5_size, feature_size))
    p["P5_1_b"] = w(ks[next(i)], (feature_size,))
    p["P5_2_w"] = w(ks[next(i)], (3, 3, feature_size, feature_size))
    p["P5_2_b"] = w(ks[next(i)], (feature_size,))
    p["P4_1_w"] = w(ks[next(i)], (C4_size, feature_size))
    p["P4_1_b"] = w(ks[next(i)], (feature_size,))
    p["P4_2_w"] = w(ks[next(i)], (3, 3, feature_size, feature_size))
    p["P4_2_b"] = w(ks[next(i)], (feature_size,))
    p["P3_1_w"] = w(ks[next(i)], (C3_size, feature_size))
    p["P3_1_b"] = w(ks[next(i)], (feature_size,))
    p["P3_2_w"] = w(ks[next(i)], (3, 3, feature_size, feature_size))
    p["P3_2_b"] = w(ks[next(i)], (feature_size,))
    # P6 / P7_2 parameters exist in the module but their outputs are never
    # returned by forward() — kept for parameter-set fidelity only.
    p["P6_w"] = w(ks[next(i)], (3, 3, C5_size, feature_size))
    p["P6_b"] = w(ks[next(i)], (feature_size,))
    p["P7_2_w"] = w(ks[next(i)], (3, 3, feature_size, feature_size))
    p["P7_2_b"] = w(ks[next(i)], (feature_size,))
    return p


# ----------------------------------------------------------------------------
# PyramidFeatures2 forward
# ----------------------------------------------------------------------------
@jax.jit
def pyramid_features2_forward(C3_nchw, C4_nchw, C5_nchw, params):
    bf16 = jnp.bfloat16
    # NCHW -> NHWC fused with the f32->bf16 cast (one XLA copy per input).
    c3 = jnp.transpose(C3_nchw, (0, 2, 3, 1)).astype(bf16)
    c4 = jnp.transpose(C4_nchw, (0, 2, 3, 1)).astype(bf16)
    c5 = jnp.transpose(C5_nchw, (0, 2, 3, 1)).astype(bf16)
    _, H5, W5, _ = c5.shape
    _, H4, W4, _ = c4.shape

    # ---- P5 level (no lateral residual); fused 1x1 -> 3x3, emits P5_1. ----
    p5, p5_1 = fpn_level(c5, params["P5_1_w"].astype(bf16), params["P5_1_b"],
                         params["P5_2_w"].astype(bf16), params["P5_2_b"],
                         res_half=None, emit_p1=True)

    # ---- P4 level: residual = nearest-2x(P5_1).  W expanded here (XLA),
    #      H expanded inside the fused kernel -> half-resolution HBM read. ----
    res4 = jnp.repeat(p5_1[:, :, :W5, :], 2, axis=2)           # (N, H5, W4, F)
    p4, p4_1 = fpn_level(c4, params["P4_1_w"].astype(bf16), params["P4_1_b"],
                         params["P4_2_w"].astype(bf16), params["P4_2_b"],
                         res_half=res4, emit_p1=True)

    # ---- P3 level (no P3_1 output needed downstream). ----
    res3 = jnp.repeat(p4_1[:, :, :W4, :], 2, axis=2)           # (N, H4, W3, F)
    p3 = fpn_level(c3, params["P3_1_w"].astype(bf16), params["P3_1_b"],
                   params["P3_2_w"].astype(bf16), params["P3_2_b"],
                   res_half=res3, emit_p1=False)

    # P6 / P7 are computed by the reference forward but never returned; under
    # jit they are dead code, so they are intentionally skipped here.  (Note:
    # in the reference, ReLU only feeds the P7 path — P6 itself is pre-ReLU.)

    # NHWC -> NCHW (f32) for the returned maps.
    return [jnp.transpose(p3, (0, 3, 1, 2)),
            jnp.transpose(p4, (0, 3, 1, 2)),
            jnp.transpose(p5, (0, 3, 1, 2))]


if __name__ == "__main__":
    # Small shapes consistent with an FPN: C3 /8, C4 /16, C5 /32.
    N = 2
    C3_size, C4_size, C5_size = 32, 64, 128
    feature_size = 128

    key = jax.random.PRNGKey(0)
    k_c3, k_c4, k_c5, k_params = jax.random.split(key, 4)

    C3 = jax.random.normal(k_c3, (N, C3_size, 16, 16), jnp.float32)
    C4 = jax.random.normal(k_c4, (N, C4_size, 8, 8), jnp.float32)
    C5 = jax.random.normal(k_c5, (N, C5_size, 4, 4), jnp.float32)

    params = make_params(C3_size, C4_size, C5_size, feature_size, k_params)

    P3, P4, P5 = pyramid_features2_forward(C3, C4, C5, params)
    jax.block_until_ready((P3, P4, P5))

    assert P3.shape == (N, feature_size, 16, 16)
    assert P4.shape == (N, feature_size, 8, 8)
    assert P5.shape == (N, feature_size, 4, 4)
    assert P3.dtype == jnp.float32
    assert bool(jnp.all(jnp.isfinite(P3)))
    assert bool(jnp.all(jnp.isfinite(P4)))
    assert bool(jnp.all(jnp.isfinite(P5)))
    print("KERNEL_OK")
</pallas_src>

<mosaic_0001>
module attributes {stable_mosaic.version = 11 : i64} {
  func.func @kernel(%arg0: i32, %arg1: memref<1x4x8x128xbf16, #tpu.memory_space<vmem>>, %arg2: memref<128x128xbf16, #tpu.memory_space<vmem>>, %arg3: memref<1x128xf32, #tpu.memory_space<vmem>>, %arg4: memref<3x384x128xbf16, #tpu.memory_space<vmem>>, %arg5: memref<1x128xf32, #tpu.memory_space<vmem>>, %arg6: memref<1x4x8x128xf32, #tpu.memory_space<vmem>>, %arg7: memref<1x4x8x128xbf16, #tpu.memory_space<vmem>>, %arg8: memref<6x24x128xbf16, #tpu.memory_space<vmem>>) attributes {dimension_semantics = [#tpu.dimension_semantics<parallel>], iteration_bounds = array<i64: 2>, scalar_prefetch = 0 : i64, scratch_operands = 1 : i64, tpu.core_type = #tpu.core_type<tc>, window_params = [{transform_indices = @transform_0, window_bounds = array<i64: 1, 4, 8, 128>}, {pipeline_mode = #tpu.pipeline_mode<synchronous>, transform_indices = @transform_1, window_bounds = array<i64: 128, 128>}, {pipeline_mode = #tpu.pipeline_mode<synchronous>, transform_indices = @transform_2, window_bounds = array<i64: 1, 128>}, {pipeline_mode = #tpu.pipeline_mode<synchronous>, transform_indices = @transform_3, window_bounds = array<i64: 3, 384, 128>}, {pipeline_mode = #tpu.pipeline_mode<synchronous>, transform_indices = @transform_4, window_bounds = array<i64: 1, 128>}, {transform_indices = @transform_5, window_bounds = array<i64: 1, 4, 8, 128>}, {transform_indices = @transform_6, window_bounds = array<i64: 1, 4, 8, 128>}]} {
    %c0 = arith.constant 0 : index
    %c0_0 = arith.constant 0 : index
    %c0_1 = arith.constant 0 : index
    %c0_2 = arith.constant 0 : index
    %0 = vector.load %arg1[%c0, %c0_0, %c0_1, %c0_2] : memref<1x4x8x128xbf16, #tpu.memory_space<vmem>>, vector<1x4x8x128xbf16>
    %1 = vector.shape_cast %0 : vector<1x4x8x128xbf16> to vector<4x8x128xbf16>
    %2 = vector.shape_cast %1 : vector<4x8x128xbf16> to vector<32x128xbf16>
    %c0_3 = arith.constant 0 : index
    %c0_4 = arith.constant 0 : index
    %3 = vector.load %arg2[%c0_3, %c0_4] : memref<128x128xbf16, #tpu.memory_space<vmem>>, vector<128x128xbf16>
    %cst = arith.constant dense<0.000000e+00> : vector<32x128xf32>
    %4 = tpu.matmul %2, %3, %cst {dimension_numbers = #tpu.dot_dimension_numbers<[1], [0], [0], [1], [0, 0, 1, 1], [], []>} : vector<32x128xbf16>, vector<128x128xbf16>, vector<32x128xf32> -> vector<32x128xf32>
    %c0_5 = arith.constant 0 : index
    %c0_6 = arith.constant 0 : index
    %5 = vector.load %arg3[%c0_5, %c0_6] : memref<1x128xf32, #tpu.memory_space<vmem>>, vector<1x128xf32>
    %6 = vector.broadcast %5 : vector<1x128xf32> to vector<32x128xf32>
    %7 = arith.addf %4, %6 : vector<32x128xf32>
    %8 = vector.shape_cast %7 : vector<32x128xf32> to vector<4x8x128xf32>
    %9 = tpu.iota {dimensions = array<i32: 1>} : vector<1x8x1xi32>
    %c4_i32 = arith.constant 4 : i32
    %10 = vector.broadcast %c4_i32 : i32 to vector<1x8x1xi32>
    %11 = arith.cmpi slt, %9, %10 : vector<1x8x1xi32>
    %cst_7 = arith.constant 0.000000e+00 : f32
    %12 = vector.shape_cast %11 : vector<1x8x1xi1> to vector<1x8x1xi1>
    %13 = vector.broadcast %12 : vector<1x8x1xi1> to vector<4x8x128xi1>
    %14 = vector.broadcast %cst_7 : f32 to vector<4x8x128xf32>
    %15 = arith.select %13, %8, %14 : vector<4x8x128xi1>, vector<4x8x128xf32>
    %16 = arith.truncf %15 : vector<4x8x128xf32> to vector<4x8x128xbf16>
    %c0_8 = arith.constant 0 : index
    %c0_9 = arith.constant 0 : index
    %c0_10 = arith.constant 0 : index
    %c0_11 = arith.constant 0 : index
    %17 = vector.load %arg7[%c0_8, %c0_9, %c0_10, %c0_11] : memref<1x4x8x128xbf16, #tpu.memory_space<vmem>>, vector<1x4x8x128xbf16>
    %18 = vector.shape_cast %17 : vector<1x4x8x128xbf16> to vector<4x8x128xbf16>
    %19 = vector.shape_cast %16 : vector<4x8x128xbf16> to vector<1x4x8x128xbf16>
    tpu.vector_store %arg7[%c0_8, %c0_9, %c0_10, %c0_11], %19 {strides = array<i32>} : memref<1x4x8x128xbf16, #tpu.memory_space<vmem>>, vector<1x4x8x128xbf16>,
    %cst_12 = arith.constant 0.000000e+00 : bf16
    %20 = vector.broadcast %cst_12 : bf16 to vector<6x24x128xbf16>
    %c0_13 = arith.constant 0 : index
    %c0_14 = arith.constant 0 : index
    %c0_15 = arith.constant 0 : index
    %21 = vector.load %arg8[%c0_13, %c0_14, %c0_15] : memref<6x24x128xbf16, #tpu.memory_space<vmem>>, vector<6x24x128xbf16>
    tpu.vector_store %arg8[%c0_13, %c0_14, %c0_15], %20 {strides = array<i32>} : memref<6x24x128xbf16, #tpu.memory_space<vmem>>, vector<6x24x128xbf16>,
    %c1 = arith.constant 1 : index
    %c8 = arith.constant 8 : index
    %c0_16 = arith.constant 0 : index
    %22 = vector.load %arg8[%c1, %c8, %c0_16] : memref<6x24x128xbf16, #tpu.memory_space<vmem>>, vector<4x8x128xbf16>
    tpu.vector_store %arg8[%c1, %c8, %c0_16], %16 {strides = array<i32>} : memref<6x24x128xbf16, #tpu.memory_space<vmem>>, vector<4x8x128xbf16>,
    %cst_17 = arith.constant 0.000000e+00 : f32
    %23 = vector.broadcast %cst_17 : f32 to vector<32x128xf32>
    %c0_18 = arith.constant 0 : index
    %c7 = arith.constant 7 : index
    %c0_19 = arith.constant 0 : index
    %24 = vector.load %arg8[%c0_18, %c7, %c0_19] : memref<6x24x128xbf16, #tpu.memory_space<vmem>>, vector<6x8x128xbf16>
    %25 = vector.extract_strided_slice %24 {offsets = [0, 0, 0], sizes = [4, 8, 128], strides = [1, 1, 1]} : vector<6x8x128xbf16> to vector<4x8x128xbf16>
    %26 = vector.extract_strided_slice %24 {offsets = [1, 0, 0], sizes = [4, 8, 128], strides = [1, 1, 1]} : vector<6x8x128xbf16> to vector<4x8x128xbf16>
    %27 = vector.extract_strided_slice %24 {offsets = [2, 0, 0], sizes = [4, 8, 128], strides = [1, 1, 1]} : vector<6x8x128xbf16> to vector<4x8x128xbf16>
    %28 = tpu.concatenate %25, %26, %27 in 2 : vector<4x8x128xbf16>, vector<4x8x128xbf16>, vector<4x8x128xbf16> -> vector<4x8x384xbf16>
    %29 = vector.shape_cast %28 : vector<4x8x384xbf16> to vector<32x384xbf16>
    %c0_20 = arith.constant 0 : index
    %c0_21 = arith.constant 0 : index
    %c0_22 = arith.constant 0 : index
    %30 = vector.load %arg4[%c0_20, %c0_21, %c0_22] : memref<3x384x128xbf16, #tpu.memory_space<vmem>>, vector<1x384x128xbf16>
    %31 = vector.shape_cast %30 : vector<1x384x128xbf16> to vector<384x128xbf16>
    %cst_23 = arith.constant dense<0.000000e+00> : vector<32x128xf32>
    %32 = tpu.matmul %29, %31, %cst_23 {dimension_numbers = #tpu.dot_dimension_numbers<[1], [0], [0], [1], [0, 0, 1, 1], [], []>} : vector<32x384xbf16>, vector<384x128xbf16>, vector<32x128xf32> -> vector<32x128xf32>
    %33 = arith.addf %23, %32 : vector<32x128xf32>
    %c0_24 = arith.constant 0 : index
    %c8_25 = arith.constant 8 : index
    %c0_26 = arith.constant 0 : index
    %34 = vector.load %arg8[%c0_24, %c8_25, %c0_26] : memref<6x24x128xbf16, #tpu.memory_space<vmem>>, vector<6x8x128xbf16>
    %35 = vector.extract_strided_slice %34 {offsets = [0, 0, 0], sizes = [4, 8, 128], strides = [1, 1, 1]} : vector<6x8x128xbf16> to vector<4x8x128xbf16>
    %36 = vector.extract_strided_slice %34 {offsets = [1, 0, 0], sizes = [4, 8, 128], strides = [1, 1, 1]} : vector<6x8x128xbf16> to vector<4x8x128xbf16>
    %37 = vector.extract_strided_slice %34 {offsets = [2, 0, 0], sizes = [4, 8, 128], strides = [1, 1, 1]} : vector<6x8x128xbf16> to vector<4x8x128xbf16>
    %38 = tpu.concatenate %35, %36, %37 in 2 : vector<4x8x128xbf16>, vector<4x8x128xbf16>, vector<4x8x128xbf16> -> vector<4x8x384xbf16>
    %39 = vector.shape_cast %38 : vector<4x8x384xbf16> to vector<32x384xbf16>
    %c1_27 = arith.constant 1 : index
    %c0_28 = arith.constant 0 : index
    %c0_29 = arith.constant 0 : index
    %40 = vector.load %arg4[%c1_27, %c0_28, %c0_29] : memref<3x384x128xbf16, #tpu.memory_space<vmem>>, vector<1x384x128xbf16>
    %41 = vector.shape_cast %40 : vector<1x384x128xbf16> to vector<384x128xbf16>
    %cst_30 = arith.constant dense<0.000000e+00> : vector<32x128xf32>
    %42 = tpu.matmul %39, %41, %cst_30 {dimension_numbers = #tpu.dot_dimension_numbers<[1], [0], [0], [1], [0, 0, 1, 1], [], []>} : vector<32x384xbf16>, vector<384x128xbf16>, vector<32x128xf32> -> vector<32x128xf32>
    %43 = arith.addf %33, %42 : vector<32x128xf32>
    %c0_31 = arith.constant 0 : index
    %c9 = arith.constant 9 : index
    %c0_32 = arith.constant 0 : index
    %44 = vector.load %arg8[%c0_31, %c9, %c0_32] : memref<6x24x128xbf16, #tpu.memory_space<vmem>>, vector<6x8x128xbf16>
    %45 = vector.extract_strided_slice %44 {offsets = [0, 0, 0], sizes = [4, 8, 128], strides = [1, 1, 1]} : vector<6x8x128xbf16> to vector<4x8x128xbf16>
    %46 = vector.extract_strided_slice %44 {offsets = [1, 0, 0], sizes = [4, 8, 128], strides = [1, 1, 1]} : vector<6x8x128xbf16> to vector<4x8x128xbf16>
    %47 = vector.extract_strided_slice %44 {offsets = [2, 0, 0], sizes = [4, 8, 128], strides = [1, 1, 1]} : vector<6x8x128xbf16> to vector<4x8x128xbf16>
    %48 = tpu.concatenate %45, %46, %47 in 2 : vector<4x8x128xbf16>, vector<4x8x128xbf16>, vector<4x8x128xbf16> -> vector<4x8x384xbf16>
    %49 = vector.shape_cast %48 : vector<4x8x384xbf16> to vector<32x384xbf16>
    %c2 = arith.constant 2 : index
    %c0_33 = arith.constant 0 : index
    %c0_34 = arith.constant 0 : index
    %50 = vector.load %arg4[%c2, %c0_33, %c0_34] : memref<3x384x128xbf16, #tpu.memory_space<vmem>>, vector<1x384x128xbf16>
    %51 = vector.shape_cast %50 : vector<1x384x128xbf16> to vector<384x128xbf16>
    %cst_35 = arith.constant dense<0.000000e+00> : vector<32x128xf32>
    %52 = tpu.matmul %49, %51, %cst_35 {dimension_numbers = #tpu.dot_dimension_numbers<[1], [0], [0], [1], [0, 0, 1, 1], [], []>} : vector<32x384xbf16>, vector<384x128xbf16>, vector<32x128xf32> -> vector<32x128xf32>
    %53 = arith.addf %43, %52 : vector<32x128xf32>
    %c0_36 = arith.constant 0 : index
    %c0_37 = arith.constant 0 : index
    %54 = vector.load %arg5[%c0_36, %c0_37] : memref<1x128xf32, #tpu.memory_space<vmem>>, vector<1x128xf32>
    %55 = vector.broadcast %54 : vector<1x128xf32> to vector<32x128xf32>
    %56 = arith.addf %53, %55 : vector<32x128xf32>
    %57 = vector.shape_cast %56 : vector<32x128xf32> to vector<4x8x128xf32>
    %c0_38 = arith.constant 0 : index
    %c0_39 = arith.constant 0 : index
    %c0_40 = arith.constant 0 : index
    %c0_41 = arith.constant 0 : index
    %58 = vector.load %arg6[%c0_38, %c0_39, %c0_40, %c0_41] : memref<1x4x8x128xf32, #tpu.memory_space<vmem>>, vector<1x4x8x128xf32>
    %59 = vector.shape_cast %58 : vector<1x4x8x128xf32> to vector<4x8x128xf32>
    %60 = vector.shape_cast %57 : vector<4x8x128xf32> to vector<1x4x8x128xf32>
    tpu.vector_store %arg6[%c0_38, %c0_39, %c0_40, %c0_41], %60 {strides = array<i32>} : memref<1x4x8x128xf32, #tpu.memory_space<vmem>>, vector<1x4x8x128xf32>,
    return
  }
  func.func @transform_0(%arg0: i32) -> (i32, i32, i32, i32) {
    %c0_i32 = arith.constant 0 : i32
    %c0_i32_0 = arith.constant 0 : i32
    %c0_i32_1 = arith.constant 0 : i32
    %c0_i32_2 = arith.constant 0 : i32
    return %arg0, %c0_i32, %c0_i32_0, %c0_i32_1 : i32, i32, i32, i32
  }
  func.func @transform_1(%arg0: i32) -> (i32, i32) {
    %c0_i32 = arith.constant 0 : i32
    %c0_i32_0 = arith.constant 0 : i32
    %c0_i32_1 = arith.constant 0 : i32
    return %c0_i32, %c0_i32_0 : i32, i32
  }
  func.func @transform_2(%arg0: i32) -> (i32, i32) {
    %c0_i32 = arith.constant 0 : i32
    %c0_i32_0 = arith.constant 0 : i32
    %c0_i32_1 = arith.constant 0 : i32
    return %c0_i32, %c0_i32_0 : i32, i32
  }
  func.func @transform_3(%arg0: i32) -> (i32, i32, i32) {
    %c0_i32 = arith.constant 0 : i32
    %c0_i32_0 = arith.constant 0 : i32
    %c0_i32_1 = arith.constant 0 : i32
    %c0_i32_2 = arith.constant 0 : i32
    return %c0_i32, %c0_i32_0, %c0_i32_1 : i32, i32, i32
  }
  func.func @transform_4(%arg0: i32) -> (i32, i32) {
    %c0_i32 = arith.constant 0 : i32
    %c0_i32_0 = arith.constant 0 : i32
    %c0_i32_1 = arith.constant 0 : i32
    return %c0_i32, %c0_i32_0 : i32, i32
  }
  func.func @transform_5(%arg0: i32) -> (i32, i32, i32, i32) {
    %c0_i32 = arith.constant 0 : i32
    %c0_i32_0 = arith.constant 0 : i32
    %c0_i32_1 = arith.constant 0 : i32
    %c0_i32_2 = arith.constant 0 : i32
    return %arg0, %c0_i32, %c0_i32_0, %c0_i32_1 : i32, i32, i32, i32
  }
  func.func @transform_6(%arg0: i32) -> (i32, i32, i32, i32) {
    %c0_i32 = arith.constant 0 : i32
    %c0_i32_0 = arith.constant 0 : i32
    %c0_i32_1 = arith.constant 0 : i32
    %c0_i32_2 = arith.constant 0 : i32
    return %arg0, %c0_i32, %c0_i32_0, %c0_i32_1 : i32, i32, i32, i32
  }
}

module attributes {stable_mosaic.version = 11 : i64} {
  func.func @kernel(%arg0: i32, %arg1: memref<1x8x8x64xbf16, #tpu.memory_space<vmem>>, %arg2: memref<64x128xbf16, #tpu.memory_space<vmem>>, %arg3: memref<1x128xf32, #tpu.memory_space<vmem>>, %arg4: memref<3x384x128xbf16, #tpu.memory_space<vmem>>, %arg5: memref<1x128xf32, #tpu.memory_space<vmem>>, %arg6: memref<1x4x8x128xbf16, #tpu.memory_space<vmem>>, %arg7: memref<1x8x8x128xf32, #tpu.memory_space<vmem>>, %arg8: memref<1x8x8x128xbf16, #tpu.memory_space<vmem>>, %arg9: memref<10x24x128xbf16, #tpu.memory_space<vmem>>) attributes {dimension_semantics = [#tpu.dimension_semantics<parallel>], iteration_bounds = array<i64: 2>, scalar_prefetch = 0 : i64, scratch_operands = 1 : i64, tpu.core_type = #tpu.core_type<tc>, window_params = [{transform_indices = @transform_0, window_bounds = array<i64: 1, 8, 8, 64>}, {pipeline_mode = #tpu.pipeline_mode<synchronous>, transform_indices = @transform_1, window_bounds = array<i64: 64, 128>}, {pipeline_mode = #tpu.pipeline_mode<synchronous>, transform_indices = @transform_2, window_bounds = array<i64: 1, 128>}, {pipeline_mode = #tpu.pipeline_mode<synchronous>, transform_indices = @transform_3, window_bounds = array<i64: 3, 384, 128>}, {pipeline_mode = #tpu.pipeline_mode<synchronous>, transform_indices = @transform_4, window_bounds = array<i64: 1, 128>}, {transform_indices = @transform_5, window_bounds = array<i64: 1, 4, 8, 128>}, {transform_indices = @transform_6, window_bounds = array<i64: 1, 8, 8, 128>}, {transform_indices = @transform_7, window_bounds = array<i64: 1, 8, 8, 128>}]} {
    %c0 = arith.constant 0 : index
    %c0_0 = arith.constant 0 : index
    %c0_1 = arith.constant 0 : index
    %c0_2 = arith.constant 0 : index
    %0 = vector.load %arg1[%c0, %c0_0, %c0_1, %c0_2] : memref<1x8x8x64xbf16, #tpu.memory_space<vmem>>, vector<1x8x8x64xbf16>
    %1 = vector.shape_cast %0 : vector<1x8x8x64xbf16> to vector<8x8x64xbf16>
    %2 = vector.shape_cast %1 : vector<8x8x64xbf16> to vector<64x64xbf16>
    %c0_3 = arith.constant 0 : index
    %c0_4 = arith.constant 0 : index
    %3 = vector.load %arg2[%c0_3, %c0_4] : memref<64x128xbf16, #tpu.memory_space<vmem>>, vector<64x128xbf16>
    %cst = arith.constant dense<0.000000e+00> : vector<64x128xf32>
    %4 = tpu.matmul %2, %3, %cst {dimension_numbers = #tpu.dot_dimension_numbers<[1], [0], [0], [1], [0, 0, 1, 1], [], []>} : vector<64x64xbf16>, vector<64x128xbf16>, vector<64x128xf32> -> vector<64x128xf32>
    %c0_5 = arith.constant 0 : index
    %c0_6 = arith.constant 0 : index
    %5 = vector.load %arg3[%c0_5, %c0_6] : memref<1x128xf32, #tpu.memory_space<vmem>>, vector<1x128xf32>
    %6 = vector.broadcast %5 : vector<1x128xf32> to vector<64x128xf32>
    %7 = arith.addf %4, %6 : vector<64x128xf32>
    %8 = vector.shape_cast %7 : vector<64x128xf32> to vector<4x2x8x128xf32>
    %c0_7 = arith.constant 0 : index
    %c0_8 = arith.constant 0 : index
    %c0_9 = arith.constant 0 : index
    %c0_10 = arith.constant 0 : index
    %9 = vector.load %arg6[%c0_7, %c0_8, %c0_9, %c0_10] : memref<1x4x8x128xbf16, #tpu.memory_space<vmem>>, vector<1x4x8x128xbf16>
    %10 = vector.shape_cast %9 : vector<1x4x8x128xbf16> to vector<4x8x128xbf16>
    %11 = vector.shape_cast %10 : vector<4x8x128xbf16> to vector<4x1x8x128xbf16>
    %12 = arith.extf %11 : vector<4x1x8x128xbf16> to vector<4x1x8x128xf32>
    %13 = vector.broadcast %12 : vector<4x1x8x128xf32> to vector<4x2x8x128xf32>
    %14 = arith.addf %8, %13 : vector<4x2x8x128xf32>
    %15 = vector.shape_cast %14 : vector<4x2x8x128xf32> to vector<8x8x128xf32>
    %16 = arith.truncf %15 : vector<8x8x128xf32> to vector<8x8x128xbf16>
    %c0_11 = arith.constant 0 : index
    %c0_12 = arith.constant 0 : index
    %c0_13 = arith.constant 0 : index
    %c0_14 = arith.constant 0 : index
    %17 = vector.load %arg8[%c0_11, %c0_12, %c0_13, %c0_14] : memref<1x8x8x128xbf16, #tpu.memory_space<vmem>>, vector<1x8x8x128xbf16>
    %18 = vector.shape_cast %17 : vector<1x8x8x128xbf16> to vector<8x8x128xbf16>
    %19 = vector.shape_cast %16 : vector<8x8x128xbf16> to vector<1x8x8x128xbf16>
    tpu.vector_store %arg8[%c0_11, %c0_12, %c0_13, %c0_14], %19 {strides = array<i32>} : memref<1x8x8x128xbf16, #tpu.memory_space<vmem>>, vector<1x8x8x128xbf16>,
    %cst_15 = arith.constant 0.000000e+00 : bf16
    %20 = vector.broadcast %cst_15 : bf16 to vector<10x24x128xbf16>
    %c0_16 = arith.constant 0 : index
    %c0_17 = arith.constant 0 : index
    %c0_18 = arith.constant 0 : index
    %21 = vector.load %arg9[%c0_16, %c0_17, %c0_18] : memref<10x24x128xbf16, #tpu.memory_space<vmem>>, vector<10x24x128xbf16>
    tpu.vector_store %arg9[%c0_16, %c0_17, %c0_18], %20 {strides = array<i32>} : memref<10x24x128xbf16, #tpu.memory_space<vmem>>, vector<10x24x128xbf16>,
    %c1 = arith.constant 1 : index
    %c8 = arith.constant 8 : index
    %c0_19 = arith.constant 0 : index
    %22 = vector.load %arg9[%c1, %c8, %c0_19] : memref<10x24x128xbf16, #tpu.memory_space<vmem>>, vector<8x8x128xbf16>
    tpu.vector_store %arg9[%c1, %c8, %c0_19], %16 {strides = array<i32>} : memref<10x24x128xbf16, #tpu.memory_space<vmem>>, vector<8x8x128xbf16>,
    %cst_20 = arith.constant 0.000000e+00 : f32
    %23 = vector.broadcast %cst_20 : f32 to vector<64x128xf32>
    %c0_21 = arith.constant 0 : index
    %c7 = arith.constant 7 : index
    %c0_22 = arith.constant 0 : index
    %24 = vector.load %arg9[%c0_21, %c7, %c0_22] : memref<10x24x128xbf16, #tpu.memory_space<vmem>>, vector<10x8x128xbf16>
    %25 = vector.extract_strided_slice %24 {offsets = [0, 0, 0], sizes = [8, 8, 128], strides = [1, 1, 1]} : vector<10x8x128xbf16> to vector<8x8x128xbf16>
    %26 = vector.extract_strided_slice %24 {offsets = [1, 0, 0], sizes = [8, 8, 128], strides = [1, 1, 1]} : vector<10x8x128xbf16> to vector<8x8x128xbf16>
    %27 = vector.extract_strided_slice %24 {offsets = [2, 0, 0], sizes = [8, 8, 128], strides = [1, 1, 1]} : vector<10x8x128xbf16> to vector<8x8x128xbf16>
    %28 = tpu.concatenate %25, %26, %27 in 2 : vector<8x8x128xbf16>, vector<8x8x128xbf16>, vector<8x8x128xbf16> -> vector<8x8x384xbf16>
    %29 = vector.shape_cast %28 : vector<8x8x384xbf16> to vector<64x384xbf16>
    %c0_23 = arith.constant 0 : index
    %c0_24 = arith.constant 0 : index
    %c0_25 = arith.constant 0 : index
    %30 = vector.load %arg4[%c0_23, %c0_24, %c0_25] : memref<3x384x128xbf16, #tpu.memory_space<vmem>>, vector<1x384x128xbf16>
    %31 = vector.shape_cast %30 : vector<1x384x128xbf16> to vector<384x128xbf16>
    %cst_26 = arith.constant dense<0.000000e+00> : vector<64x128xf32>
    %32 = tpu.matmul %29, %31, %cst_26 {dimension_numbers = #tpu.dot_dimension_numbers<[1], [0], [0], [1], [0, 0, 1, 1], [], []>} : vector<64x384xbf16>, vector<384x128xbf16>, vector<64x128xf32> -> vector<64x128xf32>
    %33 = arith.addf %23, %32 : vector<64x128xf32>
    %c0_27 = arith.constant 0 : index
    %c8_28 = arith.constant 8 : index
    %c0_29 = arith.constant 0 : index
    %34 = vector.load %arg9[%c0_27, %c8_28, %c0_29] : memref<10x24x128xbf16, #tpu.memory_space<vmem>>, vector<10x8x128xbf16>
    %35 = vector.extract_strided_slice %34 {offsets = [0, 0, 0], sizes = [8, 8, 128], strides = [1, 1, 1]} : vector<10x8x128xbf16> to vector<8x8x128xbf16>
    %36 = vector.extract_strided_slice %34 {offsets = [1, 0, 0], sizes = [8, 8, 128], strides = [1, 1, 1]} : vector<10x8x128xbf16> to vector<8x8x128xbf16>
    %37 = vector.extract_strided_slice %34 {offsets = [2, 0, 0], sizes = [8, 8, 128], strides = [1, 1, 1]} : vector<10x8x128xbf16> to vector<8x8x128xbf16>
    %38 = tpu.concatenate %35, %36, %37 in 2 : vector<8x8x128xbf16>, vector<8x8x128xbf16>, vector<8x8x128xbf16> -> vector<8x8x384xbf16>
    %39 = vector.shape_cast %38 : vector<8x8x384xbf16> to vector<64x384xbf16>
    %c1_30 = arith.constant 1 : index
    %c0_31 = arith.constant 0 : index
    %c0_32 = arith.constant 0 : index
    %40 = vector.load %arg4[%c1_30, %c0_31, %c0_32] : memref<3x384x128xbf16, #tpu.memory_space<vmem>>, vector<1x384x128xbf16>
    %41 = vector.shape_cast %40 : vector<1x384x128xbf16> to vector<384x128xbf16>
    %cst_33 = arith.constant dense<0.000000e+00> : vector<64x128xf32>
    %42 = tpu.matmul %39, %41, %cst_33 {dimension_numbers = #tpu.dot_dimension_numbers<[1], [0], [0], [1], [0, 0, 1, 1], [], []>} : vector<64x384xbf16>, vector<384x128xbf16>, vector<64x128xf32> -> vector<64x128xf32>
    %43 = arith.addf %33, %42 : vector<64x128xf32>
    %c0_34 = arith.constant 0 : index
    %c9 = arith.constant 9 : index
    %c0_35 = arith.constant 0 : index
    %44 = vector.load %arg9[%c0_34, %c9, %c0_35] : memref<10x24x128xbf16, #tpu.memory_space<vmem>>, vector<10x8x128xbf16>
    %45 = vector.extract_strided_slice %44 {offsets = [0, 0, 0], sizes = [8, 8, 128], strides = [1, 1, 1]} : vector<10x8x128xbf16> to vector<8x8x128xbf16>
    %46 = vector.extract_strided_slice %44 {offsets = [1, 0, 0], sizes = [8, 8, 128], strides = [1, 1, 1]} : vector<10x8x128xbf16> to vector<8x8x128xbf16>
    %47 = vector.extract_strided_slice %44 {offsets = [2, 0, 0], sizes = [8, 8, 128], strides = [1, 1, 1]} : vector<10x8x128xbf16> to vector<8x8x128xbf16>
    %48 = tpu.concatenate %45, %46, %47 in 2 : vector<8x8x128xbf16>, vector<8x8x128xbf16>, vector<8x8x128xbf16> -> vector<8x8x384xbf16>
    %49 = vector.shape_cast %48 : vector<8x8x384xbf16> to vector<64x384xbf16>
    %c2 = arith.constant 2 : index
    %c0_36 = arith.constant 0 : index
    %c0_37 = arith.constant 0 : index
    %50 = vector.load %arg4[%c2, %c0_36, %c0_37] : memref<3x384x128xbf16, #tpu.memory_space<vmem>>, vector<1x384x128xbf16>
    %51 = vector.shape_cast %50 : vector<1x384x128xbf16> to vector<384x128xbf16>
    %cst_38 = arith.constant dense<0.000000e+00> : vector<64x128xf32>
    %52 = tpu.matmul %49, %51, %cst_38 {dimension_numbers = #tpu.dot_dimension_numbers<[1], [0], [0], [1], [0, 0, 1, 1], [], []>} : vector<64x384xbf16>, vector<384x128xbf16>, vector<64x128xf32> -> vector<64x128xf32>
    %53 = arith.addf %43, %52 : vector<64x128xf32>
    %c0_39 = arith.constant 0 : index
    %c0_40 = arith.constant 0 : index
    %54 = vector.load %arg5[%c0_39, %c0_40] : memref<1x128xf32, #tpu.memory_space<vmem>>, vector<1x128xf32>
    %55 = vector.broadcast %54 : vector<1x128xf32> to vector<64x128xf32>
    %56 = arith.addf %53, %55 : vector<64x128xf32>
    %57 = vector.shape_cast %56 : vector<64x128xf32> to vector<8x8x128xf32>
    %c0_41 = arith.constant 0 : index
    %c0_42 = arith.constant 0 : index
    %c0_43 = arith.constant 0 : index
    %c0_44 = arith.constant 0 : index
    %58 = vector.load %arg7[%c0_41, %c0_42, %c0_43, %c0_44] : memref<1x8x8x128xf32, #tpu.memory_space<vmem>>, vector<1x8x8x128xf32>
    %59 = vector.shape_cast %58 : vector<1x8x8x128xf32> to vector<8x8x128xf32>
    %60 = vector.shape_cast %57 : vector<8x8x128xf32> to vector<1x8x8x128xf32>
    tpu.vector_store %arg7[%c0_41, %c0_42, %c0_43, %c0_44], %60 {strides = array<i32>} : memref<1x8x8x128xf32, #tpu.memory_space<vmem>>, vector<1x8x8x128xf32>,
    return
  }
  func.func @transform_0(%arg0: i32) -> (i32, i32, i32, i32) {
    %c0_i32 = arith.constant 0 : i32
    %c0_i32_0 = arith.constant 0 : i32
    %c0_i32_1 = arith.constant 0 : i32
    %c0_i32_2 = arith.constant 0 : i32
    return %arg0, %c0_i32, %c0_i32_0, %c0_i32_1 : i32, i32, i32, i32
  }
  func.func @transform_1(%arg0: i32) -> (i32, i32) {
    %c0_i32 = arith.constant 0 : i32
    %c0_i32_0 = arith.constant 0 : i32
    %c0_i32_1 = arith.constant 0 : i32
    return %c0_i32, %c0_i32_0 : i32, i32
  }
  func.func @transform_2(%arg0: i32) -> (i32, i32) {
    %c0_i32 = arith.constant 0 : i32
    %c0_i32_0 = arith.constant 0 : i32
    %c0_i32_1 = arith.constant 0 : i32
    return %c0_i32, %c0_i32_0 : i32, i32
  }
  func.func @transform_3(%arg0: i32) -> (i32, i32, i32) {
    %c0_i32 = arith.constant 0 : i32
    %c0_i32_0 = arith.constant 0 : i32
    %c0_i32_1 = arith.constant 0 : i32
    %c0_i32_2 = arith.constant 0 : i32
    return %c0_i32, %c0_i32_0, %c0_i32_1 : i32, i32, i32
  }
  func.func @transform_4(%arg0: i32) -> (i32, i32) {
    %c0_i32 = arith.constant 0 : i32
    %c0_i32_0 = arith.constant 0 : i32
    %c0_i32_1 = arith.constant 0 : i32
    return %c0_i32, %c0_i32_0 : i32, i32
  }
  func.func @transform_5(%arg0: i32) -> (i32, i32, i32, i32) {
    %c0_i32 = arith.constant 0 : i32
    %c0_i32_0 = arith.constant 0 : i32
    %c0_i32_1 = arith.constant 0 : i32
    %c0_i32_2 = arith.constant 0 : i32
    return %arg0, %c0_i32, %c0_i32_0, %c0_i32_1 : i32, i32, i32, i32
  }
  func.func @transform_6(%arg0: i32) -> (i32, i32, i32, i32) {
    %c0_i32 = arith.constant 0 : i32
    %c0_i32_0 = arith.constant 0 : i32
    %c0_i32_1 = arith.constant 0 : i32
    %c0_i32_2 = arith.constant 0 : i32
    return %arg0, %c0_i32, %c0_i32_0, %c0_i32_1 : i32, i32, i32, i32
  }
  func.func @transform_7(%arg0: i32) -> (i32, i32, i32, i32) {
    %c0_i32 = arith.constant 0 : i32
    %c0_i32_0 = arith.constant 0 : i32
    %c0_i32_1 = arith.constant 0 : i32
    %c0_i32_2 = arith.constant 0 : i32
    return %arg0, %c0_i32, %c0_i32_0, %c0_i32_1 : i32, i32, i32, i32
  }
}

module attributes {stable_mosaic.version = 11 : i64} {
  func.func @kernel(%arg0: i32, %arg1: memref<1x16x16x32xbf16, #tpu.memory_space<vmem>>, %arg2: memref<32x128xbf16, #tpu.memory_space<vmem>>, %arg3: memref<1x128xf32, #tpu.memory_space<vmem>>, %arg4: memref<3x384x128xbf16, #tpu.memory_space<vmem>>, %arg5: memref<1x128xf32, #tpu.memory_space<vmem>>, %arg6: memref<1x8x16x128xbf16, #tpu.memory_space<vmem>>, %arg7: memref<1x16x16x128xf32, #tpu.memory_space<vmem>>, %arg8: memref<18x32x128xbf16, #tpu.memory_space<vmem>>) attributes {dimension_semantics = [#tpu.dimension_semantics<parallel>], iteration_bounds = array<i64: 2>, scalar_prefetch = 0 : i64, scratch_operands = 1 : i64, tpu.core_type = #tpu.core_type<tc>, window_params = [{transform_indices = @transform_0, window_bounds = array<i64: 1, 16, 16, 32>}, {pipeline_mode = #tpu.pipeline_mode<synchronous>, transform_indices = @transform_1, window_bounds = array<i64: 32, 128>}, {pipeline_mode = #tpu.pipeline_mode<synchronous>, transform_indices = @transform_2, window_bounds = array<i64: 1, 128>}, {pipeline_mode = #tpu.pipeline_mode<synchronous>, transform_indices = @transform_3, window_bounds = array<i64: 3, 384, 128>}, {pipeline_mode = #tpu.pipeline_mode<synchronous>, transform_indices = @transform_4, window_bounds = array<i64: 1, 128>}, {transform_indices = @transform_5, window_bounds = array<i64: 1, 8, 16, 128>}, {transform_indices = @transform_6, window_bounds = array<i64: 1, 16, 16, 128>}]} {
    %c0 = arith.constant 0 : index
    %c0_0 = arith.constant 0 : index
    %c0_1 = arith.constant 0 : index
    %c0_2 = arith.constant 0 : index
    %0 = vector.load %arg1[%c0, %c0_0, %c0_1, %c0_2] : memref<1x16x16x32xbf16, #tpu.memory_space<vmem>>, vector<1x16x16x32xbf16>
    %1 = vector.shape_cast %0 : vector<1x16x16x32xbf16> to vector<16x16x32xbf16>
    %2 = vector.shape_cast %1 : vector<16x16x32xbf16> to vector<256x32xbf16>
    %c0_3 = arith.constant 0 : index
    %c0_4 = arith.constant 0 : index
    %3 = vector.load %arg2[%c0_3, %c0_4] : memref<32x128xbf16, #tpu.memory_space<vmem>>, vector<32x128xbf16>
    %cst = arith.constant dense<0.000000e+00> : vector<256x128xf32>
    %4 = tpu.matmul %2, %3, %cst {dimension_numbers = #tpu.dot_dimension_numbers<[1], [0], [0], [1], [0, 0, 1, 1], [], []>} : vector<256x32xbf16>, vector<32x128xbf16>, vector<256x128xf32> -> vector<256x128xf32>
    %c0_5 = arith.constant 0 : index
    %c0_6 = arith.constant 0 : index
    %5 = vector.load %arg3[%c0_5, %c0_6] : memref<1x128xf32, #tpu.memory_space<vmem>>, vector<1x128xf32>
    %6 = vector.broadcast %5 : vector<1x128xf32> to vector<256x128xf32>
    %7 = arith.addf %4, %6 : vector<256x128xf32>
    %8 = vector.shape_cast %7 : vector<256x128xf32> to vector<8x2x16x128xf32>
    %c0_7 = arith.constant 0 : index
    %c0_8 = arith.constant 0 : index
    %c0_9 = arith.constant 0 : index
    %c0_10 = arith.constant 0 : index
    %9 = vector.load %arg6[%c0_7, %c0_8, %c0_9, %c0_10] : memref<1x8x16x128xbf16, #tpu.memory_space<vmem>>, vector<1x8x16x128xbf16>
    %10 = vector.shape_cast %9 : vector<1x8x16x128xbf16> to vector<8x16x128xbf16>
    %11 = vector.shape_cast %10 : vector<8x16x128xbf16> to vector<8x1x16x128xbf16>
    %12 = arith.extf %11 : vector<8x1x16x128xbf16> to vector<8x1x16x128xf32>
    %13 = vector.broadcast %12 : vector<8x1x16x128xf32> to vector<8x2x16x128xf32>
    %14 = arith.addf %8, %13 : vector<8x2x16x128xf32>
    %15 = vector.shape_cast %14 : vector<8x2x16x128xf32> to vector<16x16x128xf32>
    %16 = arith.truncf %15 : vector<16x16x128xf32> to vector<16x16x128xbf16>
    %cst_11 = arith.constant 0.000000e+00 : bf16
    %17 = vector.broadcast %cst_11 : bf16 to vector<18x32x128xbf16>
    %c0_12 = arith.constant 0 : index
    %c0_13 = arith.constant 0 : index
    %c0_14 = arith.constant 0 : index
    %18 = vector.load %arg8[%c0_12, %c0_13, %c0_14] : memref<18x32x128xbf16, #tpu.memory_space<vmem>>, vector<18x32x128xbf16>
    tpu.vector_store %arg8[%c0_12, %c0_13, %c0_14], %17 {strides = array<i32>} : memref<18x32x128xbf16, #tpu.memory_space<vmem>>, vector<18x32x128xbf16>,
    %c1 = arith.constant 1 : index
    %c8 = arith.constant 8 : index
    %c0_15 = arith.constant 0 : index
    %19 = vector.load %arg8[%c1, %c8, %c0_15] : memref<18x32x128xbf16, #tpu.memory_space<vmem>>, vector<16x16x128xbf16>
    tpu.vector_store %arg8[%c1, %c8, %c0_15], %16 {strides = array<i32>} : memref<18x32x128xbf16, #tpu.memory_space<vmem>>, vector<16x16x128xbf16>,
    %cst_16 = arith.constant 0.000000e+00 : f32
    %20 = vector.broadcast %cst_16 : f32 to vector<256x128xf32>
    %c0_17 = arith.constant 0 : index
    %c7 = arith.constant 7 : index
    %c0_18 = arith.constant 0 : index
    %21 = vector.load %arg8[%c0_17, %c7, %c0_18] : memref<18x32x128xbf16, #tpu.memory_space<vmem>>, vector<18x16x128xbf16>
    %22 = vector.extract_strided_slice %21 {offsets = [0, 0, 0], sizes = [16, 16, 128], strides = [1, 1, 1]} : vector<18x16x128xbf16> to vector<16x16x128xbf16>
    %23 = vector.extract_strided_slice %21 {offsets = [1, 0, 0], sizes = [16, 16, 128], strides = [1, 1, 1]} : vector<18x16x128xbf16> to vector<16x16x128xbf16>
    %24 = vector.extract_strided_slice %21 {offsets = [2, 0, 0], sizes = [16, 16, 128], strides = [1, 1, 1]} : vector<18x16x128xbf16> to vector<16x16x128xbf16>
    %25 = tpu.concatenate %22, %23, %24 in 2 : vector<16x16x128xbf16>, vector<16x16x128xbf16>, vector<16x16x128xbf16> -> vector<16x16x384xbf16>
    %26 = vector.shape_cast %25 : vector<16x16x384xbf16> to vector<256x384xbf16>
    %c0_19 = arith.constant 0 : index
    %c0_20 = arith.constant 0 : index
    %c0_21 = arith.constant 0 : index
    %27 = vector.load %arg4[%c0_19, %c0_20, %c0_21] : memref<3x384x128xbf16, #tpu.memory_space<vmem>>, vector<1x384x128xbf16>
    %28 = vector.shape_cast %27 : vector<1x384x128xbf16> to vector<384x128xbf16>
    %cst_22 = arith.constant dense<0.000000e+00> : vector<256x128xf32>
    %29 = tpu.matmul %26, %28, %cst_22 {dimension_numbers = #tpu.dot_dimension_numbers<[1], [0], [0], [1], [0, 0, 1, 1], [], []>} : vector<256x384xbf16>, vector<384x128xbf16>, vector<256x128xf32> -> vector<256x128xf32>
    %30 = arith.addf %20, %29 : vector<256x128xf32>
    %c0_23 = arith.constant 0 : index
    %c8_24 = arith.constant 8 : index
    %c0_25 = arith.constant 0 : index
    %31 = vector.load %arg8[%c0_23, %c8_24, %c0_25] : memref<18x32x128xbf16, #tpu.memory_space<vmem>>, vector<18x16x128xbf16>
    %32 = vector.extract_strided_slice %31 {offsets = [0, 0, 0], sizes = [16, 16, 128], strides = [1, 1, 1]} : vector<18x16x128xbf16> to vector<16x16x128xbf16>
    %33 = vector.extract_strided_slice %31 {offsets = [1, 0, 0], sizes = [16, 16, 128], strides = [1, 1, 1]} : vector<18x16x128xbf16> to vector<16x16x128xbf16>
    %34 = vector.extract_strided_slice %31 {offsets = [2, 0, 0], sizes = [16, 16, 128], strides = [1, 1, 1]} : vector<18x16x128xbf16> to vector<16x16x128xbf16>
    %35 = tpu.concatenate %32, %33, %34 in 2 : vector<16x16x128xbf16>, vector<16x16x128xbf16>, vector<16x16x128xbf16> -> vector<16x16x384xbf16>
    %36 = vector.shape_cast %35 : vector<16x16x384xbf16> to vector<256x384xbf16>
    %c1_26 = arith.constant 1 : index
    %c0_27 = arith.constant 0 : index
    %c0_28 = arith.constant 0 : index
    %37 = vector.load %arg4[%c1_26, %c0_27, %c0_28] : memref<3x384x128xbf16, #tpu.memory_space<vmem>>, vector<1x384x128xbf16>
    %38 = vector.shape_cast %37 : vector<1x384x128xbf16> to vector<384x128xbf16>
    %cst_29 = arith.constant dense<0.000000e+00> : vector<256x128xf32>
    %39 = tpu.matmul %36, %38, %cst_29 {dimension_numbers = #tpu.dot_dimension_numbers<[1], [0], [0], [1], [0, 0, 1, 1], [], []>} : vector<256x384xbf16>, vector<384x128xbf16>, vector<256x128xf32> -> vector<256x128xf32>
    %40 = arith.addf %30, %39 : vector<256x128xf32>
    %c0_30 = arith.constant 0 : index
    %c9 = arith.constant 9 : index
    %c0_31 = arith.constant 0 : index
    %41 = vector.load %arg8[%c0_30, %c9, %c0_31] : memref<18x32x128xbf16, #tpu.memory_space<vmem>>, vector<18x16x128xbf16>
    %42 = vector.extract_strided_slice %41 {offsets = [0, 0, 0], sizes = [16, 16, 128], strides = [1, 1, 1]} : vector<18x16x128xbf16> to vector<16x16x128xbf16>
    %43 = vector.extract_strided_slice %41 {offsets = [1, 0, 0], sizes = [16, 16, 128], strides = [1, 1, 1]} : vector<18x16x128xbf16> to vector<16x16x128xbf16>
    %44 = vector.extract_strided_slice %41 {offsets = [2, 0, 0], sizes = [16, 16, 128], strides = [1, 1, 1]} : vector<18x16x128xbf16> to vector<16x16x128xbf16>
    %45 = tpu.concatenate %42, %43, %44 in 2 : vector<16x16x128xbf16>, vector<16x16x128xbf16>, vector<16x16x128xbf16> -> vector<16x16x384xbf16>
    %46 = vector.shape_cast %45 : vector<16x16x384xbf16> to vector<256x384xbf16>
    %c2 = arith.constant 2 : index
    %c0_32 = arith.constant 0 : index
    %c0_33 = arith.constant 0 : index
    %47 = vector.load %arg4[%c2, %c0_32, %c0_33] : memref<3x384x128xbf16, #tpu.memory_space<vmem>>, vector<1x384x128xbf16>
    %48 = vector.shape_cast %47 : vector<1x384x128xbf16> to vector<384x128xbf16>
    %cst_34 = arith.constant dense<0.000000e+00> : vector<256x128xf32>
    %49 = tpu.matmul %46, %48, %cst_34 {dimension_numbers = #tpu.dot_dimension_numbers<[1], [0], [0], [1], [0, 0, 1, 1], [], []>} : vector<256x384xbf16>, vector<384x128xbf16>, vector<256x128xf32> -> vector<256x128xf32>
    %50 = arith.addf %40, %49 : vector<256x128xf32>
    %c0_35 = arith.constant 0 : index
    %c0_36 = arith.constant 0 : index
    %51 = vector.load %arg5[%c0_35, %c0_36] : memref<1x128xf32, #tpu.memory_space<vmem>>, vector<1x128xf32>
    %52 = vector.broadcast %51 : vector<1x128xf32> to vector<256x128xf32>
    %53 = arith.addf %50, %52 : vector<256x128xf32>
    %54 = vector.shape_cast %53 : vector<256x128xf32> to vector<16x16x128xf32>
    %c0_37 = arith.constant 0 : index
    %c0_38 = arith.constant 0 : index
    %c0_39 = arith.constant 0 : index
    %c0_40 = arith.constant 0 : index
    %55 = vector.load %arg7[%c0_37, %c0_38, %c0_39, %c0_40] : memref<1x16x16x128xf32, #tpu.memory_space<vmem>>, vector<1x16x16x128xf32>
    %56 = vector.shape_cast %55 : vector<1x16x16x128xf32> to vector<16x16x128xf32>
    %57 = vector.shape_cast %54 : vector<16x16x128xf32> to vector<1x16x16x128xf32>
    tpu.vector_store %arg7[%c0_37, %c0_38, %c0_39, %c0_40], %57 {strides = array<i32>} : memref<1x16x16x128xf32, #tpu.memory_space<vmem>>, vector<1x16x16x128xf32>,
    return
  }
  func.func @transform_0(%arg0: i32) -> (i32, i32, i32, i32) {
    %c0_i32 = arith.constant 0 : i32
    %c0_i32_0 = arith.constant 0 : i32
    %c0_i32_1 = arith.constant 0 : i32
    %c0_i32_2 = arith.constant 0 : i32
    return %arg0, %c0_i32, %c0_i32_0, %c0_i32_1 : i32, i32, i32, i32
  }
  func.func @transform_1(%arg0: i32) -> (i32, i32) {
    %c0_i32 = arith.constant 0 : i32
    %c0_i32_0 = arith.constant 0 : i32
    %c0_i32_1 = arith.constant 0 : i32
    return %c0_i32, %c0_i32_0 : i32, i32
  }
  func.func @transform_2(%arg0: i32) -> (i32, i32) {
    %c0_i32 = arith.constant 0 : i32
    %c0_i32_0 = arith.constant 0 : i32
    %c0_i32_1 = arith.constant 0 : i32
    return %c0_i32, %c0_i32_0 : i32, i32
  }
  func.func @transform_3(%arg0: i32) -> (i32, i32, i32) {
    %c0_i32 = arith.constant 0 : i32
    %c0_i32_0 = arith.constant 0 : i32
    %c0_i32_1 = arith.constant 0 : i32
    %c0_i32_2 = arith.constant 0 : i32
    return %c0_i32, %c0_i32_0, %c0_i32_1 : i32, i32, i32
  }
  func.func @transform_4(%arg0: i32) -> (i32, i32) {
    %c0_i32 = arith.constant 0 : i32
    %c0_i32_0 = arith.constant 0 : i32
    %c0_i32_1 = arith.constant 0 : i32
    return %c0_i32, %c0_i32_0 : i32, i32
  }
  func.func @transform_5(%arg0: i32) -> (i32, i32, i32, i32) {
    %c0_i32 = arith.constant 0 : i32
    %c0_i32_0 = arith.constant 0 : i32
    %c0_i32_1 = arith.constant 0 : i32
    %c0_i32_2 = arith.constant 0 : i32
    return %arg0, %c0_i32, %c0_i32_0, %c0_i32_1 : i32, i32, i32, i32
  }
  func.func @transform_6(%arg0: i32) -> (i32, i32, i32, i32) {
    %c0_i32 = arith.constant 0 : i32
    %c0_i32_0 = arith.constant 0 : i32
    %c0_i32_1 = arith.constant 0 : i32
    %c0_i32_2 = arith.constant 0 : i32
    return %arg0, %c0_i32, %c0_i32_0, %c0_i32_1 : i32, i32, i32, i32
  }
}

</mosaic_0001>

<bundles_post_ra>
// kernel: pyramid_features2_forward.4
= control target key start
LH: loop header
LB: loop body
LE: loop exit
PB: predicated region body
PF: predicated region fallthrough
CT: control target
= control target key end

     0   :  { %13 = vsyncpa [#allocation4], 0  ;;  %s4248_s0 = inlined_call_operand.vmem [shape: bf16[2,8,8,64], index: 0, kind: input, shape index: {}]   ;;  %s4249_s1 = inlined_call_operand.vmem [shape: bf16[64,128], index: 1, kind: input, shape index: {}]   ;;  %s4250_s2 = inlined_call_operand.vmem [shape: f32[1,128], index: 2, kind: input, shape index: {}]   ;;  %s4251_s3 = inlined_call_operand.vmem [shape: bf16[3,384,128], index: 3, kind: input, shape index: {}]   ;;  %s4252_s4 = inlined_call_operand.vmem [shape: f32[1,128], index: 4, kind: input, shape index: {}]   ;;  %s4253_s5 = inlined_call_operand.vmem [shape: bf16[2,4,8,128], index: 5, kind: input, shape index: {}]   ;;  %s4254_s6 = inlined_call_operand.hbm [shape: f32[2,8,8,128], index: 6, kind: output, shape index: {0}]   ;;  %s4255_s7 = inlined_call_operand.vmem [shape: bf16[2,8,8,128], index: 7, kind: output, shape index: {1}]  }
   0x1   :  { %15 = vsyncpa [#allocation4 + $0x1], 0  ;;  %s3259_s24 = smov 0   ;;  %s3261_s25 = smov 0  }
   0x2   :  { %s3263_s26 = smov 0   ;;  %s3265_s27 = smov 0  }
   0x3 LB: > { %s3280_s28 = sadd.s32 4294967295, %s3213_s27   ;;  %s2375_s29 = sadd.s32 4294967294, %s3213_s27   ;;  %s3213_s27 = sphi %s3265_s27, %s4308_s27   ;;  %s3209_s26 = sphi %s3263_s26, %s4307_s26   ;;  %s3205_s25 = sphi %s3261_s25, %s4306_s25   ;;  %s3201_s24 = sphi %s3259_s24, %s4305_s24  }
   0x4   : > { %s3284_s30 = sadd.s32 1, %s3213_s27   ;;  %s164_s8 = sadd.s32 1, %s3209_s26 }
   0x5   : > { %s161_s9 = ssub.s32 %s3213_s27, %s3284_s30  ;;  %p174_p0 = scmp.ne.s32.totalorder %s3209_s26, %s3205_s25 }
   0x6   : > { %p162_p1 = scmp.eq.s32.totalorder %s161_s9, 0  ;;  %p175_p2 = scmp.eq.s32.totalorder %s3280_s28, 1 }
   0x7   : > { %p180_p3 = scmp.ne.s32.totalorder %s3205_s25, %s3201_s24  ;;  %p181_p4 = scmp.eq.s32.totalorder %s2375_s29, 1 }
   0x8   : > { %s3295_s10 = scalar_select %p162_p1, %s3209_s26, %s164_s8  }
   0x9   : > { %p3297_p5 = por %p175_p2, %p174_p0  ;;  %p3301_p6 = por %p181_p4, %p180_p3 }
   0xa   : > { %p2378_p7 = scmp.ge.s32.totalorder %s3213_s27, 1  ;;  %p253_p8 = scmp.lt.s32.totalorder %s3213_s27, 3 }
   0xc   : > { %p254_p9 = pnand %p2378_p7, %p253_p8 }
   0xe   : > { %257 = sbr.rel (%p254_p9) target bundleno = 562 (0x232), region = 44 }
  0x13   : > { %v3008_v0 = vld [vmem:[%s4249_s1 + $0x18] sm:$0xff]   ;;  %p295_p10 = scmp.lt.s32.totalorder %s3280_s28, 1  ;;  %v3009_v1 = vld [vmem:[%s4249_s1 + $0x10] sm:$0xff]   ;;  %v3010_v2 = vld [vmem:[%s4249_s1 + $0x8] sm:$0xff]   ;;  %vm378_vm0 = vcmask 523264   ;;  %v3215_v20 = vmov 0  }
  0x14   : > { %2878 = vmatprep.subr.bf16.mxu0 %v3008_v0  ;;  %v3016_v3 = vld [vmem:[%s4251_s3 + $0x138] sm:$0xff]   ;;  %v3011_v6 = vld [vmem:[%s4249_s1] sm:$0xff]   ;;  %v3019_v8 = vld [vmem:[%s4251_s3 + $0x130] sm:$0xff]   ;;  %498 = vst [vmem:[#allocation2 + $0x28] sm:$0xf] %v3215_v20 }
  0x15   : > { %s3315_s17 = scalar_select %p295_p10, %s3280_s28, 1  ;;  %2879 = vmatpush3.bf16.msra.mxu0 %v3008_v0  ;;  %v3017_v4 = vld [vmem:[%s4251_s3 + $0xf8] sm:$0xff]   ;;  %2722 = vmatprep.subr.bf16.mxu1 %v3016_v3  ;;  %v3020_v10 = vld [vmem:[%s4251_s3 + $0xf0] sm:$0xff]   ;;  %v3022_v13 = vld [vmem:[%s4251_s3 + $0x128] sm:$0xff]   ;;  %488 = vst [vmem:[#allocation2] sm:$0xf] %v3215_v20 }
  0x16   : > { %2880 = vmatprep.subr.bf16.mxu0 %v3009_v1  ;;  %2723 = vmatpush3.bf16.msra.mxu1 %v3017_v4  ;;  %v3018_v7 = vld [vmem:[%s4251_s3 + $0x178] sm:$0xff]   ;;  %v3021_v12 = vld [vmem:[%s4251_s3 + $0x170] sm:$0xff]   ;;  %v3023_v15 = vld [vmem:[%s4251_s3 + $0xe8] sm:$0xff]   ;;  %489 = vst [vmem:[#allocation2 + $0x4] sm:$0xf] %v3215_v20 }
  0x17   : > { %s2678_s20 = sshll.u32 %s3315_s17, 5  ;;  %2724 = vmatprep.subr.bf16.mxu1 %v3019_v8  ;;  %v3024_v16 = vld [vmem:[%s4251_s3 + $0x168] sm:$0xff]   ;;  %v3025_v17 = vld [vmem:[%s4251_s3 + $0x120] sm:$0xff]   ;;  %490 = vst [vmem:[#allocation2 + $0x8] sm:$0xf] %v3215_v20  ;;  %v3028_v21 = vld [vmem:[%s4251_s3 + $0x118] sm:$0xff]  }
  0x18   : > { %s299_s8 = scalar_lea.vmem %s4248_s0, %s2678_s20  ;;  %v3026_v18 = vld [vmem:[%s4251_s3 + $0xe0] sm:$0xff]   ;;  %491 = vst [vmem:[#allocation2 + $0xc] sm:$0xf] %v3215_v20  ;;  %492 = vst [vmem:[#allocation2 + $0x10] sm:$0xf] %v3215_v20  ;;  %v3029_v22 = vld [vmem:[%s4251_s3 + $0xd8] sm:$0xff]   ;;  %s3459_s13 = scalar_lea.vmem %s4255_s7, %s2678_s20 }
  0x19   : > { %v3012_v5 = vld [vmem:[%s299_s8] sm:$0xff]   ;;  %2881 = vmatpush3.bf16.msra.mxu0 %v3009_v1  ;;  %v3013_v9 = vld [vmem:[%s299_s8 + $0x8] sm:$0xff]   ;;  %v3014_v11 = vld [vmem:[%s299_s8 + $0x10] sm:$0xff]   ;;  %493 = vst [vmem:[#allocation2 + $0x14] sm:$0xf] %v3215_v20  ;;  %s2679_s18 = sshll.u32 %s3315_s17, 4 }
  0x1a   : > { %2882 = vmatprep.subr.bf16.mxu0 %v3010_v2  ;;  %2886 = vmatprep.mubr.msk.bf16.mxu0 %vm378_vm0, %v3012_v5  ;;  %v3015_v14 = vld [vmem:[%s299_s8 + $0x18] sm:$0xff]   ;;  %v3027_v19 = vld [vmem:[%s4251_s3 + $0x160] sm:$0xff]   ;;  %494 = vst [vmem:[#allocation2 + $0x18] sm:$0xf] %v3215_v20  ;;  %495 = vst [vmem:[#allocation2 + $0x1c] sm:$0xf] %v3215_v20  ;;  %s304_s22 = scalar_lea.vmem %s4253_s5, %s2679_s18 }
  0x1b   : > { %2725 = vmatpush3.bf16.msra.mxu1 %v3020_v10  ;;  %496 = vst [vmem:[#allocation2 + $0x20] sm:$0xf] %v3215_v20  ;;  %497 = vst [vmem:[#allocation2 + $0x24] sm:$0xf] %v3215_v20  ;;  %v3030_v23 = vld [vmem:[%s4251_s3 + $0x158] sm:$0xff]   ;;  %v3031_v24 = vld [vmem:[%s4251_s3 + $0x110] sm:$0xff]  }
  0x1c   : > { %2726 = vmatprep.subr.bf16.mxu1 %v3022_v13  ;;  %499 = vst [vmem:[#allocation2 + $0x2c] sm:$0xf] %v3215_v20  ;;  %500 = vst [vmem:[#allocation2 + $0x30] sm:$0xf] %v3215_v20  ;;  %v3032_v25 = vld [vmem:[%s4251_s3 + $0xd0] sm:$0xff]   ;;  %v3034_v27 = vld [vmem:[%s4251_s3 + $0x108] sm:$0xff]  }
  0x1d   : > { %2883 = vmatpush3.bf16.msra.mxu0 %v3010_v2  ;;  %501 = vst [vmem:[#allocation2 + $0x34] sm:$0xf] %v3215_v20  ;;  %502 = vst [vmem:[#allocation2 + $0x38] sm:$0xf] %v3215_v20  ;;  %v3033_v26 = vld [vmem:[%s4251_s3 + $0x150] sm:$0xff]   ;;  %v3035_v28 = vld [vmem:[%s4251_s3 + $0xc8] sm:$0xff]  }
  0x1e   : > { %2884 = vmatprep.subr.bf16.mxu0 %v3011_v6  ;;  %503 = vst [vmem:[#allocation2 + $0x3c] sm:$0xf] %v3215_v20  ;;  %504 = vst [vmem:[#allocation2 + $0x40] sm:$0xf] %v3215_v20  ;;  %v3036_v29 = vld [vmem:[%s4251_s3 + $0x148] sm:$0xff]   ;;  %v3037_v30 = vld [vmem:[%s4251_s3 + $0x100] sm:$0xff]  }
  0x1f   : > { %2727 = vmatpush3.bf16.msra.mxu1 %v3023_v15  ;;  %505 = vst [vmem:[#allocation2 + $0x44] sm:$0xf] %v3215_v20  ;;  %506 = vst [vmem:[#allocation2 + $0x48] sm:$0xf] %v3215_v20  ;;  %v3038_v31 = vld [vmem:[%s4251_s3 + $0xc0] sm:$0xff]   ;;  %v3044_v33 = vld [vmem:[%s4251_s3 + $0x78] sm:$0xff]  }
  0x20   : > { %2728 = vmatprep.subr.bf16.mxu1 %v3025_v17  ;;  %507 = vst [vmem:[#allocation2 + $0x4c] sm:$0xf] %v3215_v20  ;;  %508 = vst [vmem:[#allocation2 + $0x50] sm:$0xf] %v3215_v20  ;;  %v3039_v32 = vld [vmem:[%s4251_s3 + $0x140] sm:$0xff]   ;;  %v3411_v34 = vld [vmem:[%s4251_s3 + $0xb8] sm:$0xff]  }
  0x21   : > { %2885 = vmatpush3.bf16.msra.mxu0 %v3011_v6  ;;  %509 = vst [vmem:[#allocation2 + $0x54] sm:$0xf] %v3215_v20  ;;  %510 = vst [vmem:[#allocation2 + $0x58] sm:$0xf] %v3215_v20  ;;  %v2683_v36 = vld [vmem:[%s304_s22] sm:$0xff]   ;;  %v3428_v46 = vld [vmem:[%s304_s22 + $0x8] sm:$0xff]  }
  0x22   : > { %2894 = vmatprep.subr.bf16.mxu0 %v3018_v7  ;;  %511 = vst [vmem:[#allocation2 + $0x5c] sm:$0xf] %v3215_v20  ;;  %512 = vst [vmem:[#allocation2 + $0x60] sm:$0xf] %v3215_v20  ;;  %v3418_v35 = vld [vmem:[#allocation2 + $0x24] sm:$0x8]  ;;  %v2685_v39 = vunpack.c.h.bf16 %v2683_v36  ;;  %v2684_v45 = vunpack.c.l.bf16 %v2683_v36  ;;  %v2689_v57 = vunpack.c.h.bf16 %v3428_v46  ;;  %v2688_v58 = vunpack.c.l.bf16 %v3428_v46 }
  0x23   : > { %2729 = vmatpush3.bf16.msra.mxu1 %v3026_v18  ;;  %513 = vst [vmem:[#allocation2 + $0x64] sm:$0xf] %v3215_v20  ;;  %514 = vst [vmem:[#allocation2 + $0x68] sm:$0xf] %v3215_v20  ;;  %v2404_v37 = vcombine.low %v3418_v35, %v3418_v35  ;;  %v3425_v38 = vld [vmem:[%s4250_s2] ss:$0 sm:$0xff] }
  0x24   : > { %2887 = vmatmul.mubr.msk.bf16.vlgmr.msra.gmra.mxu0 %vm378_vm0, %v3013_v9  ;;  %515 = vst [vmem:[#allocation2 + $0x6c] sm:$0xf] %v3215_v20  ;;  %516 = vst [vmem:[#allocation2 + $0x70] sm:$0xf] %v3215_v20  ;;  %2730 = vmatprep.subr.bf16.mxu1 %v3028_v21  ;;  %v531_v40 = vld [vmem:[#allocation2 + $0x18] sm:$0x8] }
  0x25   : > { %2890 = vmatprep.mubr.msk.bf16.mxu0 %vm378_vm0, %v3014_v11  ;;  %2895 = vmatpush3.bf16.msra.mxu0 %v3018_v7  ;;  %517 = vst [vmem:[#allocation2 + $0x74] sm:$0xf] %v3215_v20  ;;  %v527_v41 = vld [vmem:[#allocation2] sm:$0x8]  ;;  %v529_v42 = vld [vmem:[#allocation2 + $0xc] sm:$0x8]  ;;  %v2400_v50 = vcombine.low %v531_v40, %v531_v40  ;;  %v2407_v60 = vcombine.low %v531_v40, %v3418_v35 }
  0x26   : > { %2896 = vmatprep.subr.bf16.mxu0 %v3021_v12  ;;  %v3432_v48 = vshrl.u32 %v2404_v37, 16  ;;  %v2399_v51 = vcombine.low %v527_v41, %v529_v42  ;;  %v2403_v52 = vcombine.low %v529_v42, %v531_v40  ;;  %v535_v55 = vld [vmem:[#allocation2 + $0x30] sm:$0x8]  ;;  %v3444_v1 = vld [vmem:[#allocation2 + $0x3c] sm:$0x8]  ;;  %s285_s22 = sand.u32 1, %s3205_s25  }
  0x27   : > { %2731 = vmatpush3.bf16.msra.mxu1 %v3029_v22  ;;  %v3446_v3 = vshrl.u32 %v2400_v50, 16  ;;  %v2408_v6 = vcombine.low %v535_v55, %v535_v55  ;;  %v2411_v10 = vcombine.low %v3418_v35, %v535_v55  ;;  %v3462_v13 = vshrl.u32 %v2407_v60, 16  ;;  %v3494_v42 = vld [vmem:[#allocation2 + $0x2c] sm:$0x1]  ;;  %s2379_s8 = sshll.u32 %s285_s22, 6  ;;  %s4208_s16 = scalar_lea.sflag [#allocation4], %s285_s22 }
  0x28   : > { %2732 = vmatprep.subr.bf16.mxu1 %v3031_v24  ;;  %v2434_v0 = vrot.slane %v3432_v48, 11  ;;  %v3448_v4 = vshrl.u32 %v2399_v51, 16  ;;  %v3450_v5 = vshrl.u32 %v2403_v52, 16  ;;  %v2415_v15 = vcombine.low %v535_v55, %v3444_v1  ;;  %v3502_v52 = vld [vmem:[#allocation2 + $0x20] sm:$0x1]  ;;  %s4159_s9 = scalar_lea.vmem [#allocation3], %s2379_s8 }
  0x29   : > { %2897 = vmatpush3.bf16.msra.mxu0 %v3021_v12  ;;  %v2432_v21 = vrot.slane %v3446_v3, 11  ;;  %v3471_v24 = vshrl.u32 %v2408_v6, 16  ;;  %v3509_v60 = vld [vmem:[#allocation2 + $0x60] sm:$0x8]  ;;  %v2563_v6 = vcombine.low %v3494_v42, %v3494_v42  ;;  %vm619_vm1 = vsmask.f32 256 }
  0x2a   : > { %2898 = vmatprep.subr.bf16.mxu0 %v3024_v16  ;;  %v3486_v36 = vshrl.u32 %v2415_v15, 16  ;;  %vm620_vm2 = vsmask.f32 4368  ;;  %vm1625_vm4 = vsmask.f32 3328  ;;  %s2273_s17 = sshll.u32 %s4159_s9, 4  ;;  %s4202_s17 = int_to_ptr.vmem [resolvable:$true] %s2273_s17 }
  0x2b   : > { %2733 = vmatpush3.bf16.msra.mxu1 %v3032_v25  ;;  %v3430_v47 = vld [vmem:[#allocation2 + $0x70] sm:$0xf]  ;;  %vm3627_vm3 = vmor %vm619_vm1, %vm620_vm2  ;;  %vm1626_vm5 = vsmask.f32 7440  ;;  %s3216_s18 = smov [#allocation3]  }
  0x2c   : > { %2891 = vmatmul.mubr.msk.bf16.gmra.mxu0 %vm378_vm0, %v3015_v14  ;;  %2734 = vmatprep.subr.bf16.mxu1 %v3034_v27  ;;  %v3439_v59 = vcombine.low %v3430_v47, %v3430_v47  ;;  %v2412_v14 = vcombine.low %v3444_v1, %v3444_v1  ;;  %vm3909_vm6 = vmor %vm1625_vm4, %vm1626_vm5  ;;  %s3157_s19 = sshll.u32 %s3216_s18, 4  ;;  %s3158_s19 = int_to_ptr.vmem [resolvable:$false] %s3157_s19 }
  0x2d   : > { %2899 = vmatpush3.bf16.msra.mxu0 %v3024_v16  ;;  %s3159_s21 = scalar_lea.vmem %s3158_s19, 2048  ;;  %p3160_p0 = scmp.lt.s32.totalorder %s4202_s17, %s3158_s19 }
  0x2e   : > { %2900 = vmatprep.subr.bf16.mxu0 %v3027_v19  ;;  %v823_v12 = vshrl.u32 %v3439_v59, 16  ;;  %v3484_v35 = vshrl.u32 %v2412_v14, 16 }
  0x2f   : > { %2735 = vmatpush3.bf16.msra.mxu1 %v3035_v28 }
  0x30   : > { %2736 = vmatprep.subr.bf16.mxu1 %v3037_v30  ;;  %v3479_v30 = vld [vmem:[#allocation2 + $0x54] sm:$0x8]  ;;  %v3492_v41 = vrot.slane %v823_v12, 7  ;;  %v2559_v12 = vcombine.low %v3502_v52, %v3502_v52 }
  0x31   : > { %2901 = vmatpush3.bf16.msra.mxu0 %v3027_v19  ;;  %v2420_v51 = vcombine.low %v3479_v30, %v3479_v30 }
  0x32   : > { %2902 = vmatprep.subr.bf16.mxu0 %v3030_v23 }
  0x33   : > { %2737 = vmatpush3.bf16.msra.mxu1 %v3038_v31 }
  0x34   : > { %2774 = vmatprep.subr.bf16.mxu1 %v3044_v33  ;;  %v3482_v33 = vshrl.u32 %v2411_v10, 16  ;;  %v3522_v10 = vshrl.u32 %v2420_v51, 16 }
  0x35   : > { %2903 = vmatpush3.bf16.msra.mxu0 %v3030_v23 }
  0x36   : > { %2904 = vmatprep.subr.bf16.mxu0 %v3033_v26 }
  0x39   : > { %2905 = vmatpush3.bf16.msra.mxu0 %v3033_v26 }
  0x3a   : > { %2906 = vmatprep.subr.bf16.mxu0 %v3036_v29 }
  0x3d   : > { %2907 = vmatpush3.bf16.msra.mxu0 %v3036_v29  ;;  %v3477_v29 = vld [vmem:[#allocation2 + $0x48] sm:$0x8] }
  0x3e   : > { %2908 = vmatprep.subr.bf16.mxu0 %v3039_v32  ;;  %v2416_v50 = vcombine.low %v3477_v29, %v3477_v29 }
  0x41   : > { %2909 = vmatpush3.bf16.msra.mxu0 %v3039_v32 }
  0x42   : > { %2918 = vmatprep.subr.bf16.mxu0 %v3411_v34 }
  0xe4   : > { %v2888_v43 = vpop.f32.mrf.mxu0 }
  0xe5   : > { %v434_v44 = vadd.f32 %v2888_v43, %v3425_v38 }
  0xe6   : > { %v425_v49 = vpop.f32.mrf.mxu0 }
  0xe7   : > { %v466_v53 = vadd.f32 %v2685_v39, %v434_v44  ;;  %v426_v54 = vadd.f32 %v3425_v38, %v425_v49 }
  0xe8   : > { %v2889_v56 = vpop.f32.mrf.mxu0 }
  0xe9   : > { %v474_v61 = vpack.c.bf16 %v466_v53, %v466_v53  ;;  %v464_v62 = vadd.f32 %v2684_v45, %v426_v54  ;;  %v437_v63 = vadd.f32 %v2889_v56, %v3425_v38  ;;  %v2419_v56 = vcombine.low %v3444_v1, %v3477_v29 }
  0xea   : > { %v428_v2 = vpop.f32.mrf.mxu0 }
  0xeb   : > { %521 = vst [vmem:[#allocation2 + $0x28] sm:$0xf] %v474_v61  ;;  %v472_v7 = vpack.c.bf16 %v464_v62, %v464_v62  ;;  %v467_v8 = vadd.f32 %v2685_v39, %v437_v63  ;;  %v429_v9 = vadd.f32 %v3425_v38, %v428_v2  ;;  %v3102_v61 = vld [vmem:[#allocation2 + $0x6c] ss:$0 sps:$4 sm:$0x88]   ;;  %v3529_v15 = vshrl.u32 %v2419_v56, 16 }
  0xec   : > { %v2892_v11 = vpop.f32.mrf.mxu0  ;;  %v3562_v56 = vld [vmem:[#allocation2 + $0x38] sm:$0x1] }
  0xed   : > { %519 = vst [vmem:[#allocation2 + $0x10] sm:$0xf] %v472_v7  ;;  %v475_v16 = vpack.c.bf16 %v467_v8, %v467_v8  ;;  %v2698_v17 = vpack.c.bf16 %v467_v8, %v466_v53  ;;  %v465_v18 = vadd.f32 %v2684_v45, %v429_v9  ;;  %v450_v19 = vadd.f32 %v2892_v11, %v3425_v38  ;;  %v528_v8 = vld [vmem:[#allocation2 + $0x4] sm:$0xf] }
  0xee   : > { %v441_v20 = vpop.f32.mrf.mxu0  ;;  %v826_v45 = vshll.u32 %v3439_v59, 16  ;;  %v3520_v9 = vshrl.u32 %v2416_v50, 16  ;;  %v2424_v11 = vcombine.low %v3509_v60, %v3509_v60  ;;  %v3553_v50 = vshll.u32 %v2563_v6, 16  ;;  %v3053_v6 = vld [vmem:[%s4251_s3 + $0x30] sm:$0xff]   ;;  %v3589_v59 = vld [vmem:[#allocation2 + $0x44] sm:$0x1] }
  0xef   : > { %2711 = vst [vmem:[%s3459_s13 + $0x8] sm:$0xff] %v2698_v17   ;;  %522 = vst [vmem:[#allocation2 + $0x34] sm:$0xf] %v475_v16  ;;  %v473_v25 = vpack.c.bf16 %v465_v18, %v465_v18  ;;  %v2693_v26 = vpack.c.bf16 %v465_v18, %v464_v62  ;;  %v470_v27 = vadd.f32 %v2689_v57, %v450_v19  ;;  %v818_v16 = vshrl.u32 %v3102_v61, 16  ;;  %v1534_v17 = vld [vmem:[#allocation2 + $0x8] sm:$0x1] }
  0xf0   : > { %v442_v28 = vadd.f32 %v3425_v38, %v441_v20  ;;  %v2893_v31 = vpop.f32.mrf.mxu0  ;;  %v3533_v20 = vld [vmem:[#allocation2 + $0x14] sm:$0x1] }
  0xf1   : > { %2694 = vst [vmem:[%s3459_s13] sm:$0xff] %v2693_v26   ;;  %520 = vst [vmem:[#allocation2 + $0x1c] sm:$0xf] %v473_v25  ;;  %v478_v37 = vpack.c.bf16 %v470_v27, %v470_v27  ;;  %v453_v40 = vadd.f32 %v2893_v31, %v3425_v38 }
  0xf2   : > { %v468_v39 = vadd.f32 %v2688_v58, %v442_v28  ;;  %v444_v43 = vpop.f32.mrf.mxu0  ;;  %v534_v44 = vld [vmem:[#allocation2 + $0x28] sm:$0xf]  ;;  %v3046_v28 = vld [vmem:[%s4251_s3 + $0x38] sm:$0xff]  }
  0xf3   : > { %525 = vst [vmem:[#allocation2 + $0x58] sm:$0xf] %v478_v37  ;;  %v471_v54 = vadd.f32 %v2689_v57, %v453_v40  ;;  %v445_v55 = vadd.f32 %v3425_v38, %v444_v43  ;;  %v3518_v1 = vcombine.low %v534_v44, %v534_v44  ;;  %v3549_v40 = vshrl.u32 %v2424_v11, 16 }
  0xf4   : > { %v476_v53 = vpack.c.bf16 %v468_v39, %v468_v39  ;;  %v530_v14 = vld [vmem:[#allocation2 + $0x10] sm:$0xf]  ;;  %v3551_v43 = vshll.u32 %v2559_v12, 16 }
  0xf5   : > { %v479_v57 = vpack.c.bf16 %v471_v54, %v471_v54  ;;  %v2708_v7 = vpack.c.bf16 %v471_v54, %v470_v27  ;;  %v469_v38 = vadd.f32 %v2688_v58, %v445_v55  ;;  %v667_v31 = vshrl.u32 %v3518_v1, 16  ;;  %v3054_v12 = vld [vmem:[%s4251_s3 + $0xb0] sm:$0xff]  }
  0xf6   : > { %523 = vst [vmem:[#allocation2 + $0x40] sm:$0xf] %v476_v53  ;;  %v3531_v19 = vld [vmem:[#allocation2 + $0x34] sm:$0xf]  ;;  %v3544_v37 = vcombine.low %v528_v8, %v530_v14  ;;  %v2558_v55 = vcombine.low %v1534_v17, %v3533_v20  ;;  %v2562_v17 = vcombine.low %v3533_v20, %v3502_v52  ;;  %v3710_v54 = vld [vmem:[#allocation2 + $0x70] ss:$0 sps:$4 sm:$0xff]  }
  0xf7   : > { %2713 = vst [vmem:[%s3459_s13 + $0x18] sm:$0xff] %v2708_v7   ;;  %526 = vst [vmem:[#allocation2 + $0x64] sm:$0xf] %v479_v57  ;;  %v477_v46 = vpack.c.bf16 %v469_v38, %v469_v38  ;;  %v2703_v58 = vpack.c.bf16 %v469_v38, %v468_v39  ;;  %v3052_v39 = vld [vmem:[%s4251_s3 + $0x70] sm:$0xff]   ;;  %v3558_v53 = vcombine.low %v534_v44, %v3531_v19 }
  0xf8   : > { %v532_v18 = vld [vmem:[#allocation2 + $0x1c] sm:$0xf]  ;;  %v2423_v38 = vcombine.low %v3477_v29, %v3479_v30  ;;  %v3055_v29 = vld [vmem:[%s4251_s3 + $0x68] sm:$0xff]   ;;  %v628_v3 = vshrl.u32 %v3544_v37, 16 }
  0xf9   : > { %2712 = vst [vmem:[%s3459_s13 + $0x10] sm:$0xff] %v2703_v58   ;;  %524 = vst [vmem:[#allocation2 + $0x4c] sm:$0xf] %v477_v46  ;;  %v2402_v25 = vcombine.low %v532_v18, %v532_v18  ;;  %v3536_v26 = vcombine.low %v530_v14, %v532_v18  ;;  %v3538_v27 = vcombine.low %v532_v18, %v534_v44  ;;  %v669_v46 = vrot.slane %v667_v31, 7  ;;  %s2681_s13 = sshll.u32 %s3280_s28, 10  ;;  %s3153_s28 = scalar_lea.vmem %s4202_s17, 1024 }
  0xfa   : > { %v3575_v44 = vor.u32 %v826_v45, %v3492_v41  ;;  %v3587_v58 = vrot.slane %v818_v16, 11  ;;  %v3594_v45 = vld [vmem:[#allocation2 + $0x58] sm:$0xf]  ;;  %v2427_v14 = vcombine.low %v3479_v30, %v3509_v60  ;;  %v2567_v16 = vcombine.low %v3562_v56, %v3562_v56  ;;  %s4200_s15 = scalar_lea.hbm %s4254_s6, %s2681_s13  ;;  %p3154_p11 = scmp.ne.s32.totalorder %s4202_s17, %s3153_s28 }
  0xfb   : > { %v641_v51 = vshrl.u32 %v2402_v25, 16  ;;  %1113 = vmatprep.mubr.bf16.mxu1 %v3536_v26  ;;  %2910 = vmatprep.mubr.bf16.mxu0 %v3538_v27  ;;  %v644_v41 = vshll.u32 %v2402_v25, 16  ;;  %v670_v18 = vshll.u32 %v3518_v1, 16  ;;  %v2570_v31 = vcombine.low %v3494_v42, %v3562_v56  ;;  %p3161_p1 = scmp.lt.s32.totalorder %s3159_s21, %s3153_s28 }
  0xfc   : > { %1114 = vmatmul.mubr.bf16.vlgmr.msra.gmra.mxu1 %v3544_v37  ;;  %v3612_v20 = vshrl.u32 %v2423_v38, 16  ;;  %v2571_v1 = vcombine.low %v3589_v59, %v3589_v59  ;;  %v3061_v38 = vld [vmem:[%s4251_s3 + $0xa8] sm:$0xff]   ;;  %v3643_v2 = vshrl.u32 %v2427_v14, 16  ;;  %v3661_v14 = vld [vmem:[#allocation2 + $0x5c] sm:$0x1]  ;;  %v706_v63 = vshrl.u32 %v3558_v53, 16  ;;  %p3155_p12 = pnand %p3154_p11, %p3297_p5 }
  0xfd   : > { %v3565_v61 = vld [vmem:[#allocation2 + $0x40] sm:$0xf]  ;;  %v643_v8 = vrot.slane %v641_v51, 7  ;;  %2775 = vmatpush3.bf16.msra.mxu1 %v3046_v28  ;;  %1121 = vmatprep.mubr.bf16.mxu1 %v3558_v53  ;;  %v3605_v28 = vshll.u32 %v2558_v55, 16  ;;  %v3056_v51 = vld [vmem:[%s4251_s3 + $0x28] sm:$0xff]   ;;  %v709_v23 = vshll.u32 %v3558_v53, 16  ;;  %p3162_p2 = por %p3161_p1, %p3160_p0 }
  0xfe   : > { %v3581_v11 = vcombine.low %v3531_v19, %v3565_v61  ;;  %2776 = vmatprep.subr.bf16.mxu1 %v3052_v39  ;;  %v2566_v39 = vcombine.low %v3502_v52, %v3494_v42  ;;  %v672_v42 = vor.u32 %v670_v18, %v669_v46  ;;  %v3645_v46 = vshll.u32 %v2562_v17, 16  ;;  %v544_v17 = vld [vmem:[#allocation2 + $0x64] sm:$0xf]  ;;  %p3156_p13 = pneg %p3155_p12 }
  0xff   : > { %v646_v60 = vor.u32 %v644_v41, %v643_v8  ;;  %v3065_v8 = vld [vmem:[%s4251_s3 + $0x60] sm:$0xff]   ;;  %v3647_v18 = vshll.u32 %v2567_v16, 16  ;;  %v3659_v41 = vshll.u32 %v2570_v31, 16  ;;  %v3668_v57 = vshll.u32 %v2571_v1, 16  ;;  %v3695_v16 = vld [vmem:[#allocation2 + $0x28] sm:$0xf] }
 0x100   : > { %2911 = vmatmul.mubr.bf16.vlgmr.msra.gmra.mxu0 %v3581_v11  ;;  %v3610_v30 = vld [vmem:[#allocation2 + $0x4c] sm:$0xf]  ;;  %v3666_v7 = vshll.u32 %v2566_v39, 16  ;;  %v673_v31 = vsel %vm3627_vm3, %v2434_v0, %v672_v42  ;;  %v3683_v39 = vld [vmem:[#allocation2 + $0x50] sm:$0x1]  ;;  %v2574_v1 = vcombine.low %v3562_v56, %v3589_v59  ;;  %v2579_v42 = vcombine.low %v3661_v14, %v3661_v14  ;;  %p3163_p3 = pnand %p3162_p2, %p3156_p13 }
 0x101   : > { %2919 = vmatpush3.bf16.msra.mxu0 %v3411_v34  ;;  %2777 = vmatpush3.bf16.msra.mxu1 %v3053_v6  ;;  %v3623_v34 = vcombine.low %v3610_v30, %v3594_v45  ;;  %4265 = vst [vmem:[#allocation6_spill] sm:$0xff] %v3647_v18  ;;  %v3652_v6 = vcombine.low %v3565_v61, %v3610_v30  ;;  %4266 = vst [vmem:[#allocation7_spill] sm:$0xff] %v3659_v41  ;;  %v630_v56 = vrot.slane %v628_v3, 7  ;;  %v3074_v3 = vld [vmem:[%s4251_s3 + $0x50] sm:$0xff]  }
 0x102   : > { %2920 = vmatprep.subr.bf16.mxu0 %v3054_v12  ;;  %2778 = vmatprep.subr.bf16.mxu1 %v3055_v29  ;;  %v654_v29 = vshrl.u32 %v3536_v26, 16  ;;  %v647_v52 = vsel %vm3627_vm3, %v2432_v21, %v646_v60  ;;  %4267 = vst [vmem:[#allocation8_spill] sm:$0xff] %v3666_v7  ;;  %4268 = vst [vmem:[#allocation9_spill] sm:$0xff] %v3668_v57  ;;  %v2495_v21 = vcombine.low %v544_v17, %v3430_v47  ;;  %v3069_v60 = vld [vmem:[%s4251_s3 + $0xa0] sm:$0xff]  }
 0x103   : > { %2914 = vmatprep.mubr.bf16.mxu0 %v3623_v34  ;;  %v2522_v47 = vcombine.low %v647_v52, %v673_v31  ;;  %v2575_v0 = vcombine.low %v3683_v39, %v3683_v39  ;;  %v3702_v31 = vcombine.low %v3531_v19, %v3531_v19  ;;  %v3706_v48 = vcombine.low %v3565_v61, %v3565_v61  ;;  %v3071_v19 = vld [vmem:[%s4251_s3 + $0x18] sm:$0xff]  }
 0x104   : > { %1122 = vmatmul.mubr.bf16.gmra.mxu1 %v3538_v27  ;;  %v656_v25 = vrot.slane %v654_v29, 7  ;;  %v657_v52 = vshll.u32 %v3536_v26, 16  ;;  %v3073_v26 = vld [vmem:[%s4251_s3 + $0x98] sm:$0xff]   ;;  %v3754_v49 = vcombine.low %v544_v17, %v544_v17  ;;  %v708_v22 = vrot.slane %v706_v63, 7 }
 0x105   : > { %2921 = vmatpush3.bf16.msra.mxu0 %v3054_v12  ;;  %2779 = vmatpush3.bf16.msra.mxu1 %v3056_v51  ;;  %v3066_v12 = vld [vmem:[%s4251_s3 + $0x20] sm:$0xff]   ;;  %v3070_v51 = vld [vmem:[%s4251_s3 + $0x58] sm:$0xff]   ;;  %v693_v61 = vshrl.u32 %v3702_v31, 16  ;;  %v719_v62 = vshrl.u32 %v3706_v48, 16  ;;  %v722_v57 = vshll.u32 %v3706_v48, 16 }
 0x106   : > { %1129 = vmatprep.mubr.bf16.mxu1 %v3652_v6  ;;  %2922 = vmatprep.subr.bf16.mxu0 %v3061_v38  ;;  %v659_v29 = vor.u32 %v657_v52, %v656_v25  ;;  %v3076_v25 = vld [vmem:[%s4251_s3 + $0x90] sm:$0xff]   ;;  %v800_v7 = vshll.u32 %v3754_v49, 16 }
 0x107   : > { %2780 = vmatprep.subr.bf16.mxu1 %v3065_v8  ;;  %v3744_v8 = vcombine.low %v3594_v45, %v544_v17  ;;  %v3077_v17 = vld [vmem:[%s4251_s3 + $0x48] sm:$0xff]   ;;  %v695_v52 = vrot.slane %v693_v61, 7  ;;  %v758_v61 = vshrl.u32 %v3652_v6, 16 }
 0x108   : > { %2915 = vmatmul.mubr.bf16.gmra.mxu0 %v2495_v21  ;;  %v3734_v21 = vshll.u32 %v2575_v0, 16  ;;  %v680_v0 = vshrl.u32 %v3538_v27, 16 }
 0x109   : > { %2923 = vmatpush3.bf16.msra.mxu0 %v3061_v38  ;;  %2934 = vmatprep.mubr.bf16.mxu0 %v2522_v47  ;;  %v3718_v38 = vshll.u32 %v2574_v1, 16  ;;  %v3722_v47 = vcombine.low %v3610_v30, %v3610_v30  ;;  %v3736_v1 = vshll.u32 %v2579_v42, 16  ;;  %v631_v30 = vshll.u32 %v3544_v37, 16  ;;  %v3750_v42 = vld [vmem:[#allocation2 + $0x1c] sm:$0xf] }
 0x10a   : > { %2781 = vmatpush3.bf16.msra.mxu1 %v3066_v12  ;;  %2924 = vmatprep.subr.bf16.mxu0 %v3069_v60  ;;  %v3732_v12 = vcombine.low %v3695_v16, %v3695_v16  ;;  %4270 = vst [vmem:[#allocation11_spill] sm:$0xff] %v3734_v21  ;;  %v696_v37 = vshll.u32 %v3702_v31, 16  ;;  %v682_v41 = vrot.slane %v680_v0, 7 }
 0x10b   : > { %4269 = vst [vmem:[#allocation10_spill] sm:$0xff] %v3718_v38  ;;  %2782 = vmatprep.subr.bf16.mxu1 %v3070_v51  ;;  %v3741_v51 = vcombine.low %v3594_v45, %v3594_v45  ;;  %v3075_v45 = vld [vmem:[%s4251_s3 + $0x10] sm:$0xff]   ;;  %v745_v32 = vshrl.u32 %v3722_v47, 16  ;;  %v721_v38 = vrot.slane %v719_v62, 7  ;;  %v748_v53 = vshll.u32 %v3722_v47, 16  ;;  %v3081_v47 = vld [vmem:[%s4251_s3 + $0x88] sm:$0xff]  }
 0x10c   : > { %1130 = vmatmul.mubr.bf16.gmra.mxu1 %v3581_v11  ;;  %v1674_v18 = vshll.u32 %v3732_v12, 16 }
 0x10d   : > { %2925 = vmatpush3.bf16.msra.mxu0 %v3069_v60  ;;  %1137 = vmatprep.mubr.bf16.mxu1 %v3744_v8  ;;  %v633_v60 = vor.u32 %v631_v30, %v630_v56  ;;  %v4271_v56 = vrot.slane %v3450_v5, 11  ;;  %v771_v31 = vshrl.u32 %v3741_v51, 16  ;;  %v797_v5 = vshrl.u32 %v3754_v49, 16 }
 0x10e   : > { %2783 = vmatpush3.bf16.msra.mxu1 %v3071_v19  ;;  %2926 = vmatprep.subr.bf16.mxu0 %v3073_v26  ;;  %v1671_v19 = vshrl.u32 %v3732_v12, 16  ;;  %v747_v48 = vrot.slane %v745_v32, 7  ;;  %v761_v12 = vshll.u32 %v3652_v6, 16  ;;  %v810_v49 = vshrl.u32 %v3744_v8, 16 }
 0x10f   : > { %2784 = vmatprep.subr.bf16.mxu1 %v3074_v3  ;;  %v3776_v30 = vsel %vm3627_vm3, %v4271_v56, %v659_v29  ;;  %v2557_v3 = vcombine.low %v3750_v42, %v3750_v42  ;;  %v3078_v29 = vld [vmem:[%s4251_s3 + $0x8] sm:$0xff]   ;;  %v4272_v56 = vrot.slane %v3448_v4, 11  ;;  %v683_v4 = vshll.u32 %v3538_v27, 16  ;;  %v3083_v27 = vld [vmem:[%s4251_s3] sm:$0xff]  }
 0x110   : > { %v773_v0 = vrot.slane %v771_v31, 7  ;;  %v799_v31 = vrot.slane %v797_v5, 7  ;;  %v4273_v6 = vrot.slane %v3462_v13, 11  ;;  %v4275_v5 = vrot.slane %v3484_v35, 11  ;;  %v3086_v13 = vld [vmem:[%s4251_s3 + $0x1b8] sm:$0xff]  }
 0x111   : > { %2927 = vmatpush3.bf16.msra.mxu0 %v3073_v26  ;;  %v3791_v62 = vsel %vm3627_vm3, %v4272_v56, %v633_v60  ;;  %v3082_v26 = vld [vmem:[%s4251_s3 + $0x40] sm:$0xff]   ;;  %v1643_v32 = vshrl.u32 %v2557_v3, 16  ;;  %v1646_v60 = vshll.u32 %v2557_v3, 16  ;;  %v698_v56 = vor.u32 %v696_v37, %v695_v52 }
 0x112   : > { %2785 = vmatpush3.bf16.msra.mxu1 %v3075_v45  ;;  %2928 = vmatprep.subr.bf16.mxu0 %v3076_v25  ;;  %v2521_v63 = vcombine.high %v3791_v62, %v3776_v30  ;;  %v774_v45 = vshll.u32 %v3741_v51, 16  ;;  %v685_v21 = vor.u32 %v683_v4, %v682_v41  ;;  %v3084_v51 = vld [vmem:[%s4251_s3 + $0x80] sm:$0xff]   ;;  %v711_v37 = vor.u32 %v709_v23, %v708_v22  ;;  %v3091_v4 = vld [vmem:[%s4251_s3 + $0x238] sm:$0xff]  }
 0x113   : > { %2786 = vmatprep.subr.bf16.mxu1 %v3077_v17  ;;  %v724_v17 = vor.u32 %v722_v57, %v721_v38  ;;  %v732_v57 = vshrl.u32 %v3581_v11, 16  ;;  %v3814_v38 = vrot.slane %v1671_v19, 4  ;;  %v760_v41 = vrot.slane %v758_v61, 7 }
 0x114   : > { %1138 = vmatmul.mubr.bf16.gmra.mxu1 %v3623_v34  ;;  %v750_v52 = vor.u32 %v748_v53, %v747_v48  ;;  %v776_v22 = vor.u32 %v774_v45, %v773_v0  ;;  %v1645_v23 = vrot.slane %v1643_v32, 4  ;;  %v1648_v3 = vrot.slane %v1646_v60, 5  ;;  %v3094_v45 = vld [vmem:[%s4251_s3 + $0x1f0] sm:$0xff]  }
 0x115   : > { %2929 = vmatpush3.bf16.msra.mxu0 %v3076_v25  ;;  %1435 = vmatprep.mubr.bf16.mxu1 %v2521_v63  ;;  %v3085_v25 = vld [vmem:[%s4251_s3 + $0x1f8] sm:$0xff]   ;;  %v2520_v19 = vcombine.low %v3791_v62, %v3776_v30  ;;  %v4274_v61 = vrot.slane %v3471_v24, 11  ;;  %v725_v48 = vsel %vm3627_vm3, %v4275_v5, %v724_v17  ;;  %v1533_v63 = vld [vmem:[#allocation2 + $0x4] sm:$0xf]  ;;  %v734_v30 = vrot.slane %v732_v57, 7 }
 0x116   : > { %2787 = vmatpush3.bf16.msra.mxu1 %v3078_v29  ;;  %2930 = vmatprep.subr.bf16.mxu0 %v3081_v47  ;;  %v3827_v29 = vsel %vm3627_vm3, %v4273_v6, %v685_v21  ;;  %v4276_v21 = vrot.slane %v3482_v33, 11  ;;  %v1676_v62 = vrot.slane %v1674_v18, 5  ;;  %v4277_v0 = vrot.slane %v3520_v9, 11 }
 0x117   : > { %2788 = vmatprep.subr.bf16.mxu1 %v3082_v26  ;;  %v699_v53 = vsel %vm3627_vm3, %v4274_v61, %v698_v56  ;;  %v1535_v26 = vld [vmem:[#allocation2 + $0x10] sm:$0xf]  ;;  %v735_v18 = vshll.u32 %v3581_v11, 16  ;;  %v763_v32 = vor.u32 %v761_v12, %v760_v41  ;;  %v784_v60 = vshrl.u32 %v3623_v34, 16 }
 0x118   : > { %v3844_v24 = vsel %vm3627_vm3, %v4276_v21, %v711_v37  ;;  %v2560_v35 = vcombine.low %v1535_v26, %v3750_v42  ;;  %v751_v33 = vsel %vm3627_vm3, %v4277_v0, %v750_v52  ;;  %v4278_v17 = vrot.slane %v3522_v10, 11  ;;  %v3095_v41 = vld [vmem:[%s4251_s3 + $0x1b0] sm:$0xff]   ;;  %v3103_v0 = vld [vmem:[%s4251_s3 + $0x228] sm:$0xff]  }
 0x119   : > { %2931 = vmatpush3.bf16.msra.mxu0 %v3081_v47  ;;  %v3847_v47 = vld [vmem:[#allocation2 + $0x68] sm:$0x1]  ;;  %v2524_v56 = vcombine.high %v3827_v29, %v3844_v24  ;;  %v2556_v37 = vcombine.low %v1533_v63, %v1535_v26  ;;  %v812_v57 = vrot.slane %v810_v49, 7  ;;  %v802_v52 = vor.u32 %v800_v7, %v799_v31  ;;  %v3096_v10 = vld [vmem:[%s4251_s3 + $0x230] sm:$0xff]  }
 0x11a   : > { %2789 = vmatpush3.bf16.msra.mxu1 %v3083_v27  ;;  %2932 = vmatprep.subr.bf16.mxu0 %v3084_v51  ;;  %v777_v9 = vsel %vm3627_vm3, %v4278_v17, %v776_v22  ;;  %v1649_v27 = vor.u32 %v1648_v3, %v1645_v23  ;;  %v2583_v11 = vcombine.low %v3847_v47, %v3847_v47  ;;  %v1660_v22 = vshll.u32 %v2560_v35, 16  ;;  %v3097_v23 = vld [vmem:[%s4251_s3 + $0x1e8] sm:$0xff]   ;;  %v3891_v63 = vld [vmem:[#allocation2 + $0x34] sm:$0xf] }
 0x11b   : > { %2826 = vmatprep.subr.bf16.mxu1 %v3085_v25  ;;  %v2525_v25 = vcombine.low %v699_v53, %v725_v48  ;;  %v737_v12 = vor.u32 %v735_v18, %v734_v30  ;;  %v1677_v49 = vor.u32 %v1676_v62, %v3814_v38  ;;  %v813_v7 = vshll.u32 %v3744_v8, 16 }
 0x11c   : > { %v2528_v31 = vcombine.low %v751_v33, %v777_v9  ;;  %v786_v3 = vrot.slane %v784_v60, 7  ;;  %v4279_v6 = vrot.slane %v3529_v15, 11  ;;  %v1650_v61 = vrot.slane %v1649_v27, 4  ;;  %v3104_v33 = vld [vmem:[%s4251_s3 + $0x1e0] sm:$0xff]  }
 0x11d   : > { %2933 = vmatpush3.bf16.msra.mxu0 %v3084_v51  ;;  %1436 = vmatmul.mubr.bf16.vlgmr.msra.gmra.mxu1 %v2520_v19  ;;  %v1657_v51 = vshrl.u32 %v2560_v35, 16  ;;  %v787_v19 = vshll.u32 %v3623_v34, 16  ;;  %v1629_v53 = vshrl.u32 %v2556_v37, 16  ;;  %v1632_v8 = vshll.u32 %v2556_v37, 16 }
 0x11e   : > { %2827 = vmatpush3.bf16.msra.mxu1 %v3086_v13  ;;  %1443 = vmatprep.mubr.bf16.mxu1 %v2524_v56  ;;  %v3885_v38 = vsel %vm3627_vm3, %v4279_v6, %v763_v32  ;;  %v4280_v5 = vrot.slane %v3549_v40, 11  ;;  %v2564_v34 = vcombine.low %v3750_v42, %v3695_v16  ;;  %v1794_v15 = vrot.slane %v3736_v1, 5  ;;  %v3098_v13 = vld [vmem:[%s4251_s3 + $0x1a8] sm:$0xff]   ;;  %v3923_v32 = vld [vmem:[#allocation2 + $0x40] sm:$0xf] }
 0x11f   : > { %2942 = vmatprep.subr.bf16.mxu0 %v3091_v4  ;;  %2828 = vmatprep.subr.bf16.mxu1 %v3094_v45  ;;  %v2582_v26 = vcombine.low %v3683_v39, %v3661_v14  ;;  %v4281_v40 = vrot.slane %v3486_v36, 11  ;;  %v1678_v30 = vrot.slane %v1677_v49, 4  ;;  %v1659_v62 = vrot.slane %v1657_v51, 4 }
 0x120   : > { %2935 = vmatmul.mubr.bf16.vlgmr.msra.gmra.mxu0 %v2525_v25  ;;  %v803_v48 = vsel %vm3627_vm3, %v4280_v5, %v802_v52  ;;  %v1662_v35 = vrot.slane %v1660_v22, 5  ;;  %v789_v45 = vor.u32 %v787_v19, %v786_v3  ;;  %v815_v18 = vor.u32 %v813_v7, %v812_v57  ;;  %v3938_v25 = vld [vmem:[#allocation2 + $0x58] sm:$0xf] }
 0x121   : > { %2938 = vmatprep.mubr.bf16.mxu0 %v2528_v31  ;;  %2943 = vmatpush3.bf16.msra.mxu0 %v3091_v4  ;;  %v3905_v21 = vsel %vm3627_vm3, %v4281_v40, %v737_v12  ;;  %v2523_v4 = vcombine.low %v3827_v29, %v3844_v24  ;;  %v4284_v60 = vrot.slane %v3551_v43, 5  ;;  %v1631_v24 = vrot.slane %v1629_v53, 4  ;;  %v3952_v12 = vld [vmem:[#allocation2 + $0x4c] sm:$0xf]  ;;  %v3111_v22 = vld [vmem:[%s4251_s3 + $0x1d8] sm:$0xff]  }
 0x122   : > { %2829 = vmatpush3.bf16.msra.mxu1 %v3095_v41  ;;  %2944 = vmatprep.subr.bf16.mxu0 %v3096_v10  ;;  %v2527_v36 = vcombine.high %v3905_v21, %v3885_v38  ;;  %v1634_v56 = vrot.slane %v1632_v8, 5  ;;  %v2565_v17 = vcombine.low %v3891_v63, %v3891_v63  ;;  %v4285_v9 = vsel %vm3627_vm3, %v3587_v58, %v3575_v44  ;;  %v3110_v44 = vld [vmem:[%s4251_s3 + $0x220] sm:$0xff]  }
 0x123   : > { %2830 = vmatprep.subr.bf16.mxu1 %v3097_v23  ;;  %v1655_v29 = vsel %vm3909_vm6, %v1650_v61, %v4284_v60  ;;  %v2531_v27 = vcombine.low %v803_v48, %v4285_v9  ;;  %v2568_v37 = vcombine.low %v3695_v16, %v3891_v63  ;;  %v1685_v43 = vshrl.u32 %v2564_v34, 16  ;;  %v3117_v9 = vld [vmem:[%s4251_s3 + $0x190] sm:$0xff]  }
 0x124   : > { %v1688_v57 = vshll.u32 %v2564_v34, 16  ;;  %v4286_v52 = vrot.slane %v3553_v50, 5  ;;  %v1663_v58 = vor.u32 %v1662_v35, %v1659_v62  ;;  %v2569_v16 = vcombine.low %v3923_v32, %v3923_v32 }
 0x125   : > { %2945 = vmatpush3.bf16.msra.mxu0 %v3096_v10  ;;  %1444 = vmatmul.mubr.bf16.gmra.mxu1 %v2523_v4  ;;  %v3109_v10 = vld [vmem:[%s4251_s3 + $0x1a0] sm:$0xff]   ;;  %v4287_v50 = vcombine.low %v3589_v59, %v3683_v39  ;;  %v4288_v7 = vrot.slane %v3643_v2, 11  ;;  %v2573_v23 = vcombine.low %v3952_v12, %v3952_v12  ;;  %v4289_v59 = vshrl.u32 %v3710_v54, 16  ;;  %v3115_v4 = vld [vmem:[%s4251_s3 + $0x218] sm:$0xff]  }
 0x126   : > { %2831 = vmatpush3.bf16.msra.mxu1 %v3098_v13  ;;  %1451 = vmatprep.mubr.bf16.mxu1 %v2527_v36  ;;  %v1683_v41 = vsel %vm3909_vm6, %v1678_v30, %v4286_v52  ;;  %v4290_v19 = vrot.slane %v3612_v20, 11  ;;  %v1635_v61 = vor.u32 %v1634_v56, %v1631_v24  ;;  %v1699_v2 = vshrl.u32 %v2565_v17, 16  ;;  %v3112_v20 = vld [vmem:[%s4251_s3 + $0x198] sm:$0xff]   ;;  %v3116_v36 = vld [vmem:[%s4251_s3 + $0x1d0] sm:$0xff]  }
 0x127   : > { %v3957_v49 = vshll.u32 %v4287_v50, 16  ;;  %2946 = vmatprep.subr.bf16.mxu0 %v3103_v0  ;;  %2832 = vmatprep.subr.bf16.mxu1 %v3104_v33  ;;  %v2638_v51 = vcombine.low %v1655_v29, %v1683_v41  ;;  %v3966_v31 = vsel %vm3627_vm3, %v4288_v7, %v815_v18  ;;  %v3972_v3 = vrot.slane %v4289_v59, 4 }
 0x128   : > { %2939 = vmatmul.mubr.bf16.gmra.mxu0 %v2531_v27  ;;  %v3978_v6 = vsel %vm3627_vm3, %v4290_v19, %v789_v45  ;;  %v2577_v53 = vcombine.low %v3938_v25, %v3938_v25  ;;  %v1687_v8 = vrot.slane %v1685_v43, 4  ;;  %v1690_v5 = vrot.slane %v1688_v57, 5  ;;  %v3118_v27 = vld [vmem:[%s4251_s3 + $0x210] sm:$0xff]  }
 0x129   : > { %2947 = vmatpush3.bf16.msra.mxu0 %v3103_v0  ;;  %2958 = vmatprep.mubr.bf16.mxu0 %v2638_v51  ;;  %v1713_v48 = vshrl.u32 %v2568_v37, 16  ;;  %v1702_v34 = vshll.u32 %v2565_v17, 16  ;;  %v1664_v55 = vrot.slane %v1663_v58, 4  ;;  %v1716_v13 = vshll.u32 %v2568_v37, 16 }
 0x12a   : > { %2833 = vmatpush3.bf16.msra.mxu1 %v3109_v10  ;;  %2948 = vmatprep.subr.bf16.mxu0 %v3110_v44  ;;  %v1727_v40 = vshrl.u32 %v2569_v16, 16  ;;  %v1730_v30 = vshll.u32 %v2569_v16, 16  ;;  %v2526_v62 = vcombine.low %v3905_v21, %v3885_v38  ;;  %v2530_v35 = vcombine.high %v3978_v6, %v3966_v31  ;;  %v1549_v38 = vld [vmem:[#allocation2 + $0x64] sm:$0xf]  ;;  %v3119_v10 = vld [vmem:[%s4251_s3 + $0x1c8] sm:$0xff]  }
 0x12b   : > { %2834 = vmatprep.subr.bf16.mxu1 %v3111_v22  ;;  %v1755_v0 = vshrl.u32 %v2573_v23, 16  ;;  %v1758_v33 = vshll.u32 %v2573_v23, 16  ;;  %v1636_v45 = vrot.slane %v1635_v61, 4  ;;  %v1783_v18 = vshrl.u32 %v2577_v53, 16 }
 0x12c   : > { %v1786_v60 = vshll.u32 %v2577_v53, 16  ;;  %v2576_v29 = vcombine.low %v3923_v32, %v3952_v12  ;;  %v1691_v21 = vor.u32 %v1690_v5, %v1687_v8  ;;  %v1715_v24 = vrot.slane %v1713_v48, 4  ;;  %v3125_v8 = vld [vmem:[%s4251_s3 + $0x208] sm:$0xff]  }
 0x12d   : > { %2949 = vmatpush3.bf16.msra.mxu0 %v3110_v44  ;;  %1452 = vmatmul.mubr.bf16.gmra.mxu1 %v2526_v62  ;;  %v1701_v56 = vrot.slane %v1699_v2, 4  ;;  %v1704_v17 = vrot.slane %v1702_v34, 5  ;;  %v4291_v37 = vrot.slane %v3645_v46, 5  ;;  %v1718_v57 = vrot.slane %v1716_v13, 5 }
 0x12e   : > { %2835 = vmatpush3.bf16.msra.mxu1 %v3112_v20  ;;  %1459 = vmatprep.mubr.bf16.mxu1 %v2530_v35  ;;  %v1729_v52 = vrot.slane %v1727_v40, 4  ;;  %v1732_v41 = vrot.slane %v1730_v30, 5  ;;  %v1757_v44 = vrot.slane %v1755_v0, 4  ;;  %v1760_v58 = vrot.slane %v1758_v33, 5  ;;  %v3127_v33 = vld [vmem:[%s4251_s3 + $0x180] sm:$0xff]  }
 0x12f   : > { %v4007_v43 = vsel %vm3909_vm6, %v1664_v55, %v4291_v37  ;;  %2950 = vmatprep.subr.bf16.mxu0 %v3115_v4  ;;  %2836 = vmatprep.subr.bf16.mxu1 %v3116_v36  ;;  %v2572_v16 = vcombine.low %v3891_v63, %v3923_v32  ;;  %v2581_v50 = vcombine.low %v1549_v38, %v1549_v38  ;;  %v1785_v46 = vrot.slane %v1783_v18, 4  ;;  %v3120_v63 = vld [vmem:[%s4251_s3 + $0x188] sm:$0xff]   ;;  %v3148_v35 = vld [vmem:[#allocation2 + $0x74] ss:$0 sps:$4 sm:$0x11]  }
 0x130   : > { %v1788_v51 = vrot.slane %v1786_v60, 5  ;;  %v1769_v22 = vshrl.u32 %v2576_v29, 16  ;;  %v1772_v7 = vshll.u32 %v2576_v29, 16  ;;  %v2529_v23 = vcombine.low %v3978_v6, %v3966_v31 }
 0x131   : > { %2951 = vmatpush3.bf16.msra.mxu0 %v3115_v4  ;;  %v4292_v59 = vrot.slane %v3605_v28, 5  ;;  %v1705_v61 = vor.u32 %v1704_v17, %v1701_v56  ;;  %v4293_v2 = vshll.u32 %v3710_v54, 16  ;;  %v1692_v31 = vrot.slane %v1691_v21, 4  ;;  %v3126_v54 = vld [vmem:[%s4251_s3 + $0x1c0] sm:$0xff]  }
 0x132   : > { %2837 = vmatpush3.bf16.msra.mxu1 %v3117_v9  ;;  %2952 = vmatprep.subr.bf16.mxu0 %v3118_v27  ;;  %v1719_v28 = vor.u32 %v1718_v57, %v1715_v24  ;;  %v1733_v6 = vor.u32 %v1732_v41, %v1729_v52  ;;  %v1741_v5 = vshrl.u32 %v2572_v16, 16  ;;  %v1744_v48 = vshll.u32 %v2572_v16, 16  ;;  %v4294_v24 = vld [vmem:[#allocation8_spill] sm:$0xff] }
 0x133   : > { %v4020_v19 = vsel %vm3909_vm6, %v1636_v45, %v4292_v59  ;;  %v4024_v53 = vrot.slane %v4293_v2, 5  ;;  %2838 = vmatprep.subr.bf16.mxu1 %v3119_v10  ;;  %v1811_v34 = vshrl.u32 %v2581_v50, 16  ;;  %v1814_v20 = vshll.u32 %v2581_v50, 16  ;;  %v3128_v45 = vld [vmem:[%s4251_s3 + $0x200] sm:$0xff]   ;;  %v4296_v10 = vld [vmem:[#allocation6_spill] sm:$0xff] }
 0x134   : > { %v2637_v32 = vcombine.high %v4020_v19, %v4007_v43  ;;  %v1761_v55 = vor.u32 %v1760_v58, %v1757_v44  ;;  %v1789_v13 = vor.u32 %v1788_v51, %v1785_v46  ;;  %v1771_v40 = vrot.slane %v1769_v22, 4  ;;  %v4298_v46 = vld [vmem:[#allocation7_spill] sm:$0xff] }
 0x135   : > { %v1774_v30 = vrot.slane %v1772_v7, 5  ;;  %2953 = vmatpush3.bf16.msra.mxu0 %v3118_v27  ;;  %1460 = vmatmul.mubr.bf16.gmra.mxu1 %v2529_v23  ;;  %v1780_v62 = vrot.slane %v3957_v49, 5  ;;  %v2580_v4 = vcombine.low %v3952_v12, %v3938_v25  ;;  %v2584_v36 = vcombine.low %v3938_v25, %v1549_v38  ;;  %v4300_v7 = vld [vmem:[#allocation9_spill] sm:$0xff]  ;;  %v4302_v2 = vld [vmem:[#allocation11_spill] sm:$0xff] }
 0x136   : > { %v2586_v0 = vcombine.low %v3661_v14, %v3847_v47  ;;  %2839 = vmatpush3.bf16.msra.mxu1 %v3120_v63  ;;  %2125 = vmatprep.mubr.bf16.mxu1 %v2637_v32  ;;  %v1720_v49 = vrot.slane %v1719_v28, 4  ;;  %v1706_v18 = vrot.slane %v1705_v61, 4  ;;  %v1734_v60 = vrot.slane %v1733_v6, 4 }
 0x137   : > { %v1820_v25 = vshll.u32 %v2583_v11, 16  ;;  %2954 = vmatprep.subr.bf16.mxu0 %v3125_v8  ;;  %2840 = vmatprep.subr.bf16.mxu1 %v3126_v54  ;;  %v1743_v12 = vrot.slane %v1741_v5, 4  ;;  %v1746_v29 = vrot.slane %v1744_v48, 5  ;;  %v1813_v38 = vrot.slane %v1811_v34, 4  ;;  %v4304_v5 = vld [vmem:[#allocation10_spill] sm:$0xff] }
 0x138   : > { %v1816_v21 = vrot.slane %v1814_v20, 5  ;;  %v4295_v56 = vrot.slane %v4294_v24, 5  ;;  %v1762_v9 = vrot.slane %v1761_v55, 4  ;;  %v1790_v27 = vrot.slane %v1789_v13, 4 }
 0x139   : > { %v1775_v37 = vor.u32 %v1774_v30, %v1771_v40  ;;  %2955 = vmatpush3.bf16.msra.mxu0 %v3125_v8  ;;  %v1797_v57 = vshrl.u32 %v2580_v4, 16  ;;  %v1800_v52 = vshll.u32 %v2580_v4, 16  ;;  %v1825_v41 = vshrl.u32 %v2584_v36, 16 }
 0x13a   : > { %v1697_v17 = vsel %vm3909_vm6, %v1692_v31, %v4295_v56  ;;  %v1828_v47 = vshll.u32 %v2584_v36, 16  ;;  %v2636_v11 = vcombine.low %v4020_v19, %v4007_v43  ;;  %2841 = vmatpush3.bf16.msra.mxu1 %v3127_v33  ;;  %2956 = vmatprep.subr.bf16.mxu0 %v3128_v45  ;;  %v4297_v44 = vrot.slane %v4296_v10, 5 }
 0x13b   : > { %v1845_v16 = vor.u32 %v4024_v53, %v3972_v3  ;;  %v1848_v50 = vshll.u32 %v3148_v35, 16  ;;  %v4299_v51 = vrot.slane %v4298_v46, 5  ;;  %v4301_v23 = vrot.slane %v4300_v7, 5 }
 0x13c   : > { %v1711_v58 = vsel %vm3909_vm6, %v1706_v18, %v4297_v44  ;;  %v1747_v59 = vor.u32 %v1746_v29, %v1743_v12  ;;  %v1817_v19 = vor.u32 %v1816_v21, %v1813_v38  ;;  %v4303_v63 = vrot.slane %v4302_v2, 5 }
 0x13d   : > { %v1725_v22 = vsel %vm3909_vm6, %v1720_v49, %v4299_v51  ;;  %v1739_v43 = vsel %vm3909_vm6, %v1734_v60, %v4301_v23  ;;  %v1795_v3 = vsel %vm3909_vm6, %v1790_v27, %v1794_v15  ;;  %v1776_v53 = vrot.slane %v1775_v37, 4  ;;  %2957 = vmatpush3.bf16.msra.mxu0 %v3128_v45  ;;  %2126 = vmatmul.mubr.bf16.vlgmr.msra.gmra.mxu1 %v2636_v11 }
 0x13e   : > { %v2640_v61 = vcombine.high %v1697_v17, %v1725_v22  ;;  %v1767_v32 = vsel %vm3909_vm6, %v1762_v9, %v4303_v63  ;;  %v1799_v31 = vrot.slane %v1797_v57, 4  ;;  %v1802_v28 = vrot.slane %v1800_v52, 5 }
 0x13f   : > { %v1827_v6 = vrot.slane %v1825_v41, 4  ;;  %v1830_v8 = vrot.slane %v1828_v47, 5  ;;  %v2641_v54 = vcombine.low %v1711_v58, %v1739_v43  ;;  %v1752_v48 = vrot.slane %v4304_v5, 5 }
 0x140   : > { %2133 = vmatprep.mubr.bf16.mxu1 %v2640_v61  ;;  %v1822_v34 = vrot.slane %v1820_v25, 5  ;;  %v1850_v20 = vrot.slane %v1848_v50, 5  ;;  %v2644_v55 = vcombine.low %v1767_v32, %v1795_v3  ;;  %v1748_v13 = vrot.slane %v1747_v59, 4 }
 0x141   : > { %v1818_v40 = vrot.slane %v1817_v19, 4  ;;  %v1846_v1 = vrot.slane %v1845_v16, 4  ;;  %2959 = vmatmul.mubr.bf16.vlgmr.msra.gmra.mxu0 %v2641_v54  ;;  %v1806_v15 = vshll.u32 %v2582_v26, 16  ;;  %v1781_v30 = vsel %vm3909_vm6, %v1776_v53, %v1780_v62 }
 0x142   : > { %2962 = vmatprep.mubr.bf16.mxu0 %v2644_v55  ;;  %v1803_v35 = vor.u32 %v1802_v28, %v1799_v31  ;;  %v1831_v4 = vor.u32 %v1830_v8, %v1827_v6  ;;  %v1834_v36 = vshll.u32 %v2586_v0, 16  ;;  %v2639_v33 = vcombine.low %v1697_v17, %v1725_v22 }
 0x143   : > { %v1753_v45 = vsel %vm3909_vm6, %v1748_v13, %v1752_v48  ;;  %v1823_v49 = vsel %vm3909_vm6, %v1818_v40, %v1822_v34  ;;  %v1851_v18 = vsel %vm3909_vm6, %v1846_v1, %v1850_v20  ;;  %v1808_v39 = vrot.slane %v1806_v15, 5 }
 0x144   : > { %v2643_v60 = vcombine.high %v1753_v45, %v1781_v30  ;;  %v1804_v14 = vrot.slane %v1803_v35, 4  ;;  %v1832_v26 = vrot.slane %v1831_v4, 4  ;;  %v1836_v25 = vrot.slane %v1834_v36, 5 }
 0x145   : > { %2134 = vmatmul.mubr.bf16.gmra.mxu1 %v2639_v33  ;;  %v2647_v62 = vcombine.low %v1823_v49, %v1851_v18  ;;  %v2642_v29 = vcombine.low %v1753_v45, %v1781_v30 }
 0x146   : > { %2141 = vmatprep.mubr.bf16.mxu1 %v2643_v60  ;;  %v1809_v0 = vsel %vm3909_vm6, %v1804_v14, %v1808_v39  ;;  %v1837_v12 = vsel %vm3909_vm6, %v1832_v26, %v1836_v25 }
 0x147   : > { %v2646_v38 = vcombine.high %v1809_v0, %v1837_v12  ;;  %v2645_v21 = vcombine.low %v1809_v0, %v1837_v12 }
 0x149   : > { %2963 = vmatmul.mubr.bf16.gmra.mxu0 %v2647_v62 }
 0x14d   : > { %2142 = vmatmul.mubr.bf16.gmra.mxu1 %v2642_v29 }
 0x14e   : > { %2149 = vmatprep.mubr.bf16.mxu1 %v2646_v38 }
 0x155   : > { %2150 = vmatmul.mubr.bf16.gmra.mxu1 %v2645_v21 }
 0x1bc   : > { %v2738_v24 = vpop.f32.mrf.mxu1 }
 0x1be   : > { %v2739_v56 = vpop.f32.mrf.mxu1 }
 0x1bf   : > { %v2740_v15 = vadd.f32 %v2739_v56, %v2738_v24 }
 0x1c0   : > { %v2741_v17 = vpop.f32.mrf.mxu1  ;;  %v4096_v27 = vpop.f32.mrf.mxu0 }
 0x1c2   : > { %v2742_v9 = vpop.f32.mrf.mxu1  ;;  %v1180_v52 = vpop.f32.mrf.mxu0 }
 0x1c3   : > { %v1181_v33 = vadd.f32 %v2740_v15, %v1180_v52  ;;  %v2743_v45 = vadd.f32 %v2742_v9, %v2741_v17 }
 0x1c4   : > { %v2744_v37 = vpop.f32.mrf.mxu1  ;;  %v4098_v11 = vpop.f32.mrf.mxu0 }
 0x1c6   : > { %v2745_v57 = vpop.f32.mrf.mxu1  ;;  %v1183_v44 = vpop.f32.mrf.mxu0 }
 0x1c7   : > { %v2746_v26 = vadd.f32 %v2745_v57, %v2744_v37  ;;  %v1184_v0 = vadd.f32 %v2743_v45, %v1183_v44  ;;  %v4153_v37 = vld [vmem:[%s4252_s4] ss:$0 sm:$0xff] }
 0x1c8   : > { %v2747_v41 = vpop.f32.mrf.mxu1  ;;  %v4108_v50 = vpop.f32.mrf.mxu0 }
 0x1c9   : > { %v1189_v9 = vadd.f32 %v4096_v27, %v2746_v26 }
 0x1ca   : > { %v2748_v47 = vpop.f32.mrf.mxu1  ;;  %v4114_v22 = vpop.f32.mrf.mxu0 }
 0x1cb   : > { %v2749_v52 = vadd.f32 %v2748_v47, %v2747_v41 }
 0x1cc   : > { %v4100_v42 = vpop.f32.mrf.mxu1  ;;  %v4120_v43 = vpop.f32.mrf.mxu0 }
 0x1cd   : > { %v1192_v27 = vadd.f32 %v4098_v11, %v2749_v52 }
 0x1ce   : > { %v4102_v10 = vpop.f32.mrf.mxu1  ;;  %v4122_v61 = vpop.f32.mrf.mxu0 }
 0x1cf   : > { %v2752_v41 = vadd.f32 %v4102_v10, %v4100_v42 }
 0x1d0   : > { %v4104_v58 = vpop.f32.mrf.mxu1 }
 0x1d1   : > { %v1197_v10 = vadd.f32 %v2752_v41, %v4114_v22 }
 0x1d2   : > { %v4106_v16 = vpop.f32.mrf.mxu1 }
 0x1d3   : > { %v2755_v11 = vadd.f32 %v4106_v16, %v4104_v58 }
 0x1d4   : > { %v4110_v46 = vpop.f32.mrf.mxu1 }
 0x1d5   : > { %v1200_v58 = vadd.f32 %v2755_v11, %v4122_v61 }
 0x1d6   : > { %v4112_v51 = vpop.f32.mrf.mxu1 }
 0x1d7   : > { %v2758_v22 = vadd.f32 %v4112_v51, %v4110_v46 }
 0x1d8   : > { %v4116_v7 = vpop.f32.mrf.mxu1 }
 0x1da   : > { %v4118_v23 = vpop.f32.mrf.mxu1 }
 0x1db   : > { %v2761_v46 = vadd.f32 %v4118_v23, %v4116_v7 }
 0x1dd   : > { %v2790_v59 = vpop.f32.mrf.mxu1 }
 0x1df   : > { %v2791_v19 = vpop.f32.mrf.mxu1 }
 0x1e0   : > { %v4124_v63 = vpop.f32.mrf.mxu0  ;;  %v2792_v4 = vadd.f32 %v2791_v19, %v2790_v59 }
 0x1e1   : > { %v2793_v2 = vpop.f32.mrf.mxu1 }
 0x1e2   : > { %v1502_v53 = vpop.f32.mrf.mxu0  ;;  %v1438_v60 = vadd.f32 %v2792_v4, %v1181_v33 }
 0x1e3   : > { %v2794_v32 = vpop.f32.mrf.mxu1 }
 0x1e4   : > { %v4126_v6 = vpop.f32.mrf.mxu0  ;;  %v2795_v14 = vadd.f32 %v2794_v32, %v2793_v2  ;;  %v1503_v21 = vadd.f32 %v1502_v53, %v1438_v60 }
 0x1e5   : > { %v2796_v3 = vpop.f32.mrf.mxu1 }
 0x1e6   : > { %v1505_v5 = vpop.f32.mrf.mxu0  ;;  %v1441_v24 = vadd.f32 %v2795_v14, %v1184_v0 }
 0x1e7   : > { %v2797_v31 = vpop.f32.mrf.mxu1 }
 0x1e8   : > { %v4130_v20 = vpop.f32.mrf.mxu0  ;;  %v2798_v29 = vadd.f32 %v2797_v31, %v2796_v3  ;;  %v1506_v53 = vadd.f32 %v1505_v5, %v1441_v24 }
 0x1e9   : > { %v2799_v28 = vpop.f32.mrf.mxu1 }
 0x1ea   : > { %v4134_v40 = vpop.f32.mrf.mxu0  ;;  %v1446_v2 = vadd.f32 %v2798_v29, %v1189_v9  ;;  %v1205_v9 = vadd.f32 %v4108_v50, %v2758_v22  ;;  %v1208_v50 = vadd.f32 %v4120_v43, %v2761_v46 }
 0x1eb   : > { %v2800_v8 = vpop.f32.mrf.mxu1 }
 0x1ec   : > { %v4140_v35 = vpop.f32.mrf.mxu0  ;;  %v2801_v32 = vadd.f32 %v2800_v8, %v2799_v28  ;;  %v1511_v8 = vadd.f32 %v4124_v63, %v1446_v2 }
 0x1ed   : > { %v2802_v54 = vpop.f32.mrf.mxu1 }
 0x1ee   : > { %v4144_v18 = vpop.f32.mrf.mxu0  ;;  %v1449_v5 = vadd.f32 %v2801_v32, %v1192_v27 }
 0x1ef   : > { %v2803_v48 = vpop.f32.mrf.mxu1 }
 0x1f0   : > { %v1514_v63 = vadd.f32 %v4126_v6, %v1449_v5 }
 0x1f1   : > { %v4128_v34 = vpop.f32.mrf.mxu1 }
 0x1f3   : > { %v2806_v55 = vpop.f32.mrf.mxu1 }
 0x1f5   : > { %v4132_v13 = vpop.f32.mrf.mxu1 }
 0x1f7   : > { %v4136_v1 = vpop.f32.mrf.mxu1 }
 0x1f8   : > { %v2810_v6 = vadd.f32 %v4136_v1, %v4132_v13 }
 0x1f9   : > { %v4138_v30 = vpop.f32.mrf.mxu1 }
 0x1fb   : > { %v4142_v36 = vpop.f32.mrf.mxu1 }
 0x1fc   : > { %v2813_v13 = vadd.f32 %v4142_v36, %v4138_v30 }
 0x1fd   : > { %v2842_v49 = vpop.f32.mrf.mxu1 }
 0x1ff   : > { %v2843_v39 = vpop.f32.mrf.mxu1 }
 0x200   : > { %v2844_v25 = vadd.f32 %v2843_v39, %v2842_v49  ;;  %v2804_v49 = vadd.f32 %v2803_v48, %v2802_v54 }
 0x201   : > { %v2960_v62 = vpop.f32.mrf.mxu0  ;;  %v2845_v12 = vpop.f32.mrf.mxu1 }
 0x202   : > { %v1454_v54 = vadd.f32 %v2804_v49, %v1197_v10 }
 0x203   : > { %v2192_v38 = vpop.f32.mrf.mxu0  ;;  %v2846_v17 = vpop.f32.mrf.mxu1 }
 0x204   : > { %v2193_v56 = vadd.f32 %v2844_v25, %v2192_v38  ;;  %v2847_v57 = vadd.f32 %v2846_v17, %v2845_v12  ;;  %v2807_v25 = vadd.f32 %v2806_v55, %v4128_v34  ;;  %v1519_v24 = vadd.f32 %v4134_v40, %v1454_v54 }
 0x205   : > { %v2961_v59 = vpop.f32.mrf.mxu0  ;;  %v2848_v19 = vpop.f32.mrf.mxu1 }
 0x206   : > { %v2223_v44 = vadd.f32 %v2193_v56, %v1503_v21  ;;  %v1457_v34 = vadd.f32 %v2807_v25, %v1200_v58 }
 0x207   : > { %v2195_v3 = vpop.f32.mrf.mxu0  ;;  %v2849_v4 = vpop.f32.mrf.mxu1 }
 0x208   : > { %v2238_v31 = vadd.f32 %v4153_v37, %v2223_v44  ;;  %v2196_v15 = vadd.f32 %v2847_v57, %v2195_v3  ;;  %v2850_v47 = vadd.f32 %v2849_v4, %v2848_v19  ;;  %v1522_v57 = vadd.f32 %v4144_v18, %v1457_v34 }
 0x209   : > { %v2964_v45 = vpop.f32.mrf.mxu0  ;;  %v2851_v28 = vpop.f32.mrf.mxu1  ;;  %v1462_v44 = vadd.f32 %v2810_v6, %v1205_v9  ;;  %v1465_v3 = vadd.f32 %v2813_v13, %v1208_v50 }
 0x20a   : > { %2246 = vst [vmem:[%s4159_s9] sm:$0xff] %v2238_v31  ;;  %v2224_v33 = vadd.f32 %v2196_v15, %v1506_v53  ;;  %v2201_v60 = vadd.f32 %v2960_v62, %v2850_v47 }
 0x20b   : > { %v2852_v42 = vpop.f32.mrf.mxu1  ;;  %v2208_v0 = vpop.f32.mrf.mxu0  ;;  %v1527_v32 = vadd.f32 %v4130_v20, %v1462_v44  ;;  %v1530_v15 = vadd.f32 %v4140_v35, %v1465_v3 }
 0x20c   : > { %v2239_v14 = vadd.f32 %v4153_v37, %v2224_v33  ;;  %v2225_v39 = vadd.f32 %v2201_v60, %v1511_v8  ;;  %v2853_v26 = vadd.f32 %v2852_v42, %v2851_v28 }
 0x20d   : > { %v2854_v12 = vpop.f32.mrf.mxu1  ;;  %v2965_v55 = vpop.f32.mrf.mxu0 }
 0x20e   : > { %2247 = vst [vmem:[%s4159_s9 + $0x8] sm:$0xff] %v2239_v14  ;;  %v2240_v48 = vadd.f32 %v4153_v37, %v2225_v39  ;;  %v2204_v62 = vadd.f32 %v2961_v59, %v2853_v26 }
 0x20f   : > { %v2855_v16 = vpop.f32.mrf.mxu1  ;;  %v2211_v59 = vpop.f32.mrf.mxu0 }
 0x210   : > { %2248 = vst [vmem:[%s4159_s9 + $0x10] sm:$0xff] %v2240_v48  ;;  %v2226_v29 = vadd.f32 %v2204_v62, %v1514_v63  ;;  %v2856_v38 = vadd.f32 %v2855_v16, %v2854_v12 }
 0x211   : > { %v2857_v21 = vpop.f32.mrf.mxu1 }
 0x212   : > { %v2241_v56 = vadd.f32 %v4153_v37, %v2226_v29  ;;  %v2209_v17 = vadd.f32 %v2856_v38, %v2208_v0 }
 0x213   : > { %v2858_v61 = vpop.f32.mrf.mxu1 }
 0x214   : > { %2249 = vst [vmem:[%s4159_s9 + $0x18] sm:$0xff] %v2241_v56  ;;  %v2227_v51 = vadd.f32 %v2209_v17, %v1519_v24  ;;  %v2859_v52 = vadd.f32 %v2858_v61, %v2857_v21 }
 0x215   : > { %v2860_v40 = vpop.f32.mrf.mxu1 }
 0x216   : > { %v2242_v1 = vadd.f32 %v4153_v37, %v2227_v51  ;;  %v2212_v19 = vadd.f32 %v2859_v52, %v2211_v59 }
 0x217   : > { %v2861_v2 = vpop.f32.mrf.mxu1 }
 0x218   : > { %2250 = vst [vmem:[%s4159_s9 + $0x20] sm:$0xff] %v2242_v1  ;;  %v2228_v7 = vadd.f32 %v2212_v19, %v1522_v57  ;;  %v2862_v23 = vadd.f32 %v2861_v2, %v2860_v40 }
 0x219   : > { %v2863_v18 = vpop.f32.mrf.mxu1 }
 0x21a   : > { %v2243_v53 = vadd.f32 %v4153_v37, %v2228_v7  ;;  %v2217_v30 = vadd.f32 %v2964_v45, %v2862_v23 }
 0x21b   : > { %v2864_v36 = vpop.f32.mrf.mxu1 }
 0x21c   : > { %2251 = vst [vmem:[%s4159_s9 + $0x28] sm:$0xff] %v2243_v53  ;;  %v2229_v31 = vadd.f32 %v2217_v30, %v1527_v32  ;;  %v2865_v43 = vadd.f32 %v2864_v36, %v2863_v18 }
 0x21e   : > { %v2244_v4 = vadd.f32 %v4153_v37, %v2229_v31  ;;  %v2220_v27 = vadd.f32 %v2965_v55, %v2865_v43 }
 0x220   : > { %2252 = vst [vmem:[%s4159_s9 + $0x30] sm:$0xff] %v2244_v4  ;;  %v2230_v20 = vadd.f32 %v2220_v27, %v1530_v15 }
 0x222   : > { %v2245_v41 = vadd.f32 %v4153_v37, %v2230_v20 }
 0x224   : > { %2253 = vst [vmem:[%s4159_s9 + $0x38] sm:$0xff] %v2245_v41 }
 0x225   : > { %3166 = shalt.err (!%p3163_p3)
}
 0x226   : > { %s3167_s22 = scalar_lea.hbm %s4200_s15, 1024  ;;  %s3171_s29 = scalar_lea.hbm %s4254_s6, 2048 }
 0x227   : > { %p3168_p4 = scmp.ne.s32.totalorder %s4200_s15, %s3167_s22  ;;  %p3172_p9 = scmp.lt.s32.totalorder %s4200_s15, %s4254_s6 }
 0x228   : > { %p3173_p10 = scmp.lt.s32.totalorder %s3171_s29, %s3167_s22 }
 0x229   : > { %p3169_p7 = pnand %p3168_p4, %p3297_p5 }
 0x22a   : > { %p3174_p11 = por %p3173_p10, %p3172_p9 }
 0x22b   : > { %p3170_p8 = pneg %p3169_p7 }
 0x22d   : > { %p3175_p12 = pnand %p3174_p11, %p3170_p8 }
 0x22f   : > { %3178 = shalt.err (!%p3175_p12)
}
 0x230   : > { %s3217_s20 = smov 128   ;;  %s3218_s14 = smov 8  }
 0x231   : > { %2966 = dma.vmem_to_hbm [thread:$0]  (%p3297_p5), %s4202_s17, 1024, %s4200_s15, %s4208_s16, %s3217_s20, %s3217_s20, %s3218_s14  }
 0x232 PF: > { %p2972_p13 = scmp.ge.s32.totalorder %s3213_s27, 2  ;;  %s2291_s28 = sand.u32 1, %s3201_s24  }
 0x233   : > { %s2292_s18 = scalar_lea.sflag [#allocation4], %s2291_s28 }
 0x234   : > { %p2969_p0 = pnand %p2972_p13, %p3301_p6 }
 0x236   : > { %p2970_p1 = pneg %p2969_p0 }
 0x238   : > { %3196 = dma.done.wait (%p2970_p1), %s2292_s18, 1024  }
 0x239   : > { %3198 = vsyncadd (%p2970_p1), %s2292_s18, 4294966272  ;;  %p18_p2 = scmp.ge.s32.totalorder %s3284_s30, 4   ;;  %s4305_s24 = smov %s3205_s25 }
 0x23a   : > { %s4306_s25 = smov %s3209_s26  ;;  %s4307_s26 = smov %s3295_s10 }
 0x23b   : > { %s4308_s27 = smov %s3284_s30  ;;  %20 = sbr.rel (!%p18_p2) target bundleno = 3 (0x3), region = 97 }
 0x240   :  { %2305 = vsyncpa [#allocation4], 1 }
 0x241   :  { %2307 = vsyncpa [#allocation4 + $0x1], 1 }

// kernel: pyramid_features2_forward.3
= control target key start
LH: loop header
LB: loop body
LE: loop exit
PB: predicated region body
PF: predicated region fallthrough
CT: control target
= control target key end

     0   :  { %s2433_s21 = smov 0   ;;  %s2850_s0 = inlined_call_operand.vmem [shape: bf16[2,4,8,128], index: 0, kind: input, shape index: {}]   ;;  %s2851_s1 = inlined_call_operand.vmem [shape: bf16[128,128], index: 1, kind: input, shape index: {}]   ;;  %s2852_s2 = inlined_call_operand.vmem [shape: f32[1,128], index: 2, kind: input, shape index: {}]   ;;  %s2853_s3 = inlined_call_operand.vmem [shape: bf16[3,384,128], index: 3, kind: input, shape index: {}]   ;;  %s2854_s4 = inlined_call_operand.vmem [shape: f32[1,128], index: 4, kind: input, shape index: {}]   ;;  %s2855_s5 = inlined_call_operand.vmem [shape: f32[2,4,8,128], index: 5, kind: output, shape index: {0}]   ;;  %s2856_s6 = inlined_call_operand.vmem [shape: bf16[2,4,8,128], index: 6, kind: output, shape index: {1}]  }
   0x1 LB: > { %s1801_s22 = sadd.s32 4294967295, %s2395_s21   ;;  %p1805_p0 = scmp.ge.s32.totalorder %s2395_s21, 1  ;;  %s2395_s21 = sphi %s2433_s21, %s17_s21  }
   0x2   : > { %p215_p1 = scmp.lt.s32.totalorder %s2395_s21, 3 }
   0x4   : > { %p216_p2 = pnand %p1805_p0, %p215_p1 }
   0x5   : > { %p250_p3 = scmp.lt.s32.totalorder (!%p216_p2), %s1801_s22, 1 }
   0x6   : > { %219 = sbr.rel (%p216_p2) target bundleno = 539 (0x21b), region = 40 }
   0xb   : > { %v2274_v0 = vld [vmem:[%s2851_s1 + $0x38] sm:$0xff]   ;;  %v2275_v1 = vld [vmem:[%s2851_s1 + $0x30] sm:$0xff]   ;;  %s2862_s22 = smov (!%p250_p3, %s1801_s22), 1  ;;  %v2276_v2 = vld [vmem:[%s2851_s1 + $0x28] sm:$0xff]   ;;  %v2397_v24 = vmov 0   ;;  %v402_v37 = vlaneseq }
   0xc   : > { %2185 = vmatprep.subr.bf16.mxu0 %v2274_v0  ;;  %s2047_s29 = sshll.u32 %s2862_s22, 4  ;;  %v2277_v3 = vld [vmem:[%s2851_s1 + $0x20] sm:$0xff]   ;;  %v2284_v5 = vld [vmem:[%s2853_s3 + $0x138] sm:$0xff]   ;;  %v2287_v8 = vld [vmem:[%s2853_s3 + $0x130] sm:$0xff]   ;;  %429 = vst [vmem:[#allocation2 + $0x28] sm:$0xf] %v2397_v24 }
   0xd   : > { %2186 = vmatpush3.bf16.msra.mxu0 %v2274_v0  ;;  %s2458_s8 = scalar_lea.vmem %s2850_s0, %s2047_s29  ;;  %v2278_v6 = vld [vmem:[%s2851_s1 + $0x18] sm:$0xff]   ;;  %2071 = vmatprep.subr.bf16.mxu1 %v2284_v5  ;;  %v2279_v9 = vld [vmem:[%s2851_s1 + $0x10] sm:$0xff]   ;;  %v2290_v11 = vld [vmem:[%s2853_s3 + $0x128] sm:$0xff]   ;;  %419 = vst [vmem:[#allocation2] sm:$0xf] %v2397_v24  ;;  %v403_v38 = vshrl.u32 %v402_v37, 7  ;;  %s264_s13 = scalar_lea.vmem %s2856_s6, %s2047_s29 }
   0xe   : > { %2187 = vmatprep.subr.bf16.mxu0 %v2275_v1  ;;  %v2282_v4 = vld [vmem:[%s2458_s8] sm:$0xff]   ;;  %v2286_v7 = vld [vmem:[%s2853_s3 + $0xf8] sm:$0xff]   ;;  %v2289_v10 = vld [vmem:[%s2853_s3 + $0xf0] sm:$0xff]   ;;  %420 = vst [vmem:[#allocation2 + $0x4] sm:$0xf] %v2397_v24  ;;  %s2048_s17 = sshll.u32 %s2862_s22, 5 }
   0xf   : > { %2201 = vmatprep.mubr.bf16.mxu0 %v2282_v4  ;;  %2072 = vmatpush3.bf16.msra.mxu1 %v2286_v7  ;;  %v2280_v12 = vld [vmem:[%s2851_s1 + $0x8] sm:$0xff]   ;;  %v2281_v14 = vld [vmem:[%s2851_s1] sm:$0xff]   ;;  %v2285_v15 = vld [vmem:[%s2853_s3 + $0x178] sm:$0xff]   ;;  %421 = vst [vmem:[#allocation2 + $0x8] sm:$0xf] %v2397_v24  ;;  %vm404_vm0 = vcmp.lt.s32.totalorder %v403_v38, 4  ;;  %s259_s23 = scalar_lea.vmem %s2855_s5, %s2048_s17 }
  0x10   : > { %2073 = vmatprep.subr.bf16.mxu1 %v2287_v8  ;;  %v2292_v13 = vld [vmem:[%s2853_s3 + $0xe8] sm:$0xff]   ;;  %v2288_v17 = vld [vmem:[%s2853_s3 + $0x170] sm:$0xff]   ;;  %v2293_v19 = vld [vmem:[%s2853_s3 + $0x120] sm:$0xff]   ;;  %422 = vst [vmem:[#allocation2 + $0xc] sm:$0xf] %v2397_v24 }
  0x11   : > { %2188 = vmatpush3.bf16.msra.mxu0 %v2275_v1  ;;  %v2283_v16 = vld [vmem:[%s2458_s8 + $0x8] sm:$0xff]   ;;  %v2294_v20 = vld [vmem:[%s2853_s3 + $0x160] sm:$0xff]   ;;  %v2296_v22 = vld [vmem:[%s2853_s3 + $0x118] sm:$0xff]   ;;  %423 = vst [vmem:[#allocation2 + $0x10] sm:$0xf] %v2397_v24 }
  0x12   : > { %2189 = vmatprep.subr.bf16.mxu0 %v2276_v2  ;;  %v2291_v18 = vld [vmem:[%s2853_s3 + $0x168] sm:$0xff]   ;;  %v2295_v21 = vld [vmem:[%s2853_s3 + $0xe0] sm:$0xff]   ;;  %v2297_v23 = vld [vmem:[%s2853_s3 + $0x158] sm:$0xff]   ;;  %424 = vst [vmem:[#allocation2 + $0x14] sm:$0xf] %v2397_v24 }
  0x13   : > { %2074 = vmatpush3.bf16.msra.mxu1 %v2289_v10  ;;  %425 = vst [vmem:[#allocation2 + $0x18] sm:$0xf] %v2397_v24  ;;  %426 = vst [vmem:[#allocation2 + $0x1c] sm:$0xf] %v2397_v24  ;;  %v2298_v25 = vld [vmem:[%s2853_s3 + $0xd8] sm:$0xff]   ;;  %v2299_v26 = vld [vmem:[%s2853_s3 + $0x110] sm:$0xff]  }
  0x14   : > { %2075 = vmatprep.subr.bf16.mxu1 %v2290_v11  ;;  %427 = vst [vmem:[#allocation2 + $0x20] sm:$0xf] %v2397_v24  ;;  %428 = vst [vmem:[#allocation2 + $0x24] sm:$0xf] %v2397_v24  ;;  %v2300_v27 = vld [vmem:[%s2853_s3 + $0x150] sm:$0xff]   ;;  %v2302_v29 = vld [vmem:[%s2853_s3 + $0x108] sm:$0xff]  }
  0x15   : > { %2190 = vmatpush3.bf16.msra.mxu0 %v2276_v2  ;;  %430 = vst [vmem:[#allocation2 + $0x2c] sm:$0xf] %v2397_v24  ;;  %431 = vst [vmem:[#allocation2 + $0x30] sm:$0xf] %v2397_v24  ;;  %v2301_v28 = vld [vmem:[%s2853_s3 + $0xd0] sm:$0xff]   ;;  %v2303_v30 = vld [vmem:[%s2853_s3 + $0x148] sm:$0xff]  }
  0x16   : > { %2191 = vmatprep.subr.bf16.mxu0 %v2277_v3  ;;  %432 = vst [vmem:[#allocation2 + $0x34] sm:$0xf] %v2397_v24  ;;  %433 = vst [vmem:[#allocation2 + $0x38] sm:$0xf] %v2397_v24  ;;  %v2304_v31 = vld [vmem:[%s2853_s3 + $0xc8] sm:$0xff]   ;;  %v2305_v32 = vld [vmem:[%s2853_s3 + $0x100] sm:$0xff]  }
  0x17   : > { %2076 = vmatpush3.bf16.msra.mxu1 %v2292_v13  ;;  %434 = vst [vmem:[#allocation2 + $0x3c] sm:$0xf] %v2397_v24  ;;  %435 = vst [vmem:[#allocation2 + $0x40] sm:$0xf] %v2397_v24  ;;  %v2306_v33 = vld [vmem:[%s2853_s3 + $0x140] sm:$0xff]   ;;  %v2312_v35 = vld [vmem:[%s2853_s3 + $0x78] sm:$0xff]  }
  0x18   : > { %2077 = vmatprep.subr.bf16.mxu1 %v2293_v19  ;;  %436 = vst [vmem:[#allocation2 + $0x44] sm:$0xf] %v2397_v24  ;;  %v2307_v34 = vld [vmem:[%s2853_s3 + $0xc0] sm:$0xff]   ;;  %v2555_v36 = vld [vmem:[%s2853_s3 + $0xb8] sm:$0xff]   ;;  %v444_v61 = vld [vmem:[#allocation2 + $0xc] sm:$0x8] }
  0x19   : > { %2192 = vmatpush3.bf16.msra.mxu0 %v2277_v3  ;;  %v1812_v39 = vld [vmem:[%s2852_s2] ss:$0 sm:$0xff]  ;;  %v442_v60 = vld [vmem:[#allocation2] sm:$0x8]  ;;  %v443_v63 = vld [vmem:[#allocation2 + $0x4] sm:$0xf] }
  0x1a   : > { %2193 = vmatprep.subr.bf16.mxu0 %v2278_v6  ;;  %v2570_v58 = vld [vmem:[#allocation2 + $0x18] sm:$0x8]  ;;  %v1823_v3 = vcombine.low %v442_v60, %v444_v61  ;;  %vm494_vm1 = vsmask.f32 256  ;;  %vm495_vm2 = vsmask.f32 4368 }
  0x1b   : > { %2078 = vmatpush3.bf16.msra.mxu1 %v2295_v21  ;;  %v2572_v59 = vld [vmem:[#allocation2 + $0x24] sm:$0x8]  ;;  %v1824_v0 = vcombine.low %v2570_v58, %v2570_v58  ;;  %v1827_v5 = vcombine.low %v444_v61, %v2570_v58  ;;  %v2318_v21 = vld [vmem:[%s2853_s3 + $0x38] sm:$0xff]   ;;  %vm2603_vm3 = vmor %vm494_vm1, %vm495_vm2  ;;  %vm1264_vm4 = vsmask.f32 3328 }
  0x1c   : > { %2079 = vmatprep.subr.bf16.mxu1 %v2296_v22  ;;  %v1828_v1 = vcombine.low %v2572_v59, %v2572_v59  ;;  %v498_v13 = vshrl.u32 %v1823_v3, 16  ;;  %v2334_v3 = vld [vmem:[%s2853_s3 + $0x98] sm:$0xff]   ;;  %vm1265_vm5 = vsmask.f32 7440 }
  0x1d   : > { %2194 = vmatpush3.bf16.msra.mxu0 %v2278_v6  ;;  %vm2734_vm6 = vmor %vm1264_vm4, %vm1265_vm5 }
  0x1e   : > { %2195 = vmatprep.subr.bf16.mxu0 %v2279_v9  ;;  %v453_v8 = vld [vmem:[#allocation2 + $0x40] sm:$0xf]  ;;  %v537_v10 = vshrl.u32 %v1828_v1, 16 }
  0x1f   : > { %2080 = vmatpush3.bf16.msra.mxu1 %v2298_v25 }
  0x20   : > { %2081 = vmatprep.subr.bf16.mxu1 %v2299_v26  ;;  %v1842_v25 = vrot.slane %v537_v10, 11  ;;  %v2662_v10 = vld [vmem:[#allocation2 + $0x2c] sm:$0x1] }
  0x21   : > { %2196 = vmatpush3.bf16.msra.mxu0 %v2279_v9  ;;  %v511_v9 = vshrl.u32 %v1824_v0, 16 }
  0x22   : > { %2197 = vmatprep.subr.bf16.mxu0 %v2280_v12 }
  0x23   : > { %2082 = vmatpush3.bf16.msra.mxu1 %v2301_v28  ;;  %v1840_v24 = vrot.slane %v511_v9, 11  ;;  %v1831_v9 = vcombine.low %v2570_v58, %v2572_v59  ;;  %v2336_v58 = vld [vmem:[%s2853_s3 + $0x50] sm:$0xff]  }
  0x24   : > { %2083 = vmatprep.subr.bf16.mxu1 %v2302_v29 }
  0x25   : > { %2198 = vmatpush3.bf16.msra.mxu0 %v2280_v12 }
  0x26   : > { %2199 = vmatprep.subr.bf16.mxu0 %v2281_v14 }
  0x27   : > { %2084 = vmatpush3.bf16.msra.mxu1 %v2304_v31  ;;  %v1839_v31 = vrot.slane %v498_v13, 11 }
  0x28   : > { %2085 = vmatprep.subr.bf16.mxu1 %v2305_v32 }
  0x29   : > { %2200 = vmatpush3.bf16.msra.mxu0 %v2281_v14 }
  0x2a   : > { %2205 = vmatprep.subr.bf16.mxu0 %v2285_v15 }
  0x2b   : > { %2086 = vmatpush3.bf16.msra.mxu1 %v2307_v34 }
  0x2c   : > { %2202 = vmatmul.mubr.bf16.vlgmr.msra.gmra.mxu0 %v2283_v16  ;;  %2109 = vmatprep.subr.bf16.mxu1 %v2312_v35  ;;  %v524_v16 = vshrl.u32 %v1827_v5, 16 }
  0x2d   : > { %2206 = vmatpush3.bf16.msra.mxu0 %v2285_v15 }
  0x2e   : > { %2207 = vmatprep.subr.bf16.mxu0 %v2288_v17  ;;  %v1841_v35 = vrot.slane %v524_v16, 11 }
  0x31   : > { %2208 = vmatpush3.bf16.msra.mxu0 %v2288_v17 }
  0x32   : > { %2209 = vmatprep.subr.bf16.mxu0 %v2291_v18 }
  0x35   : > { %2210 = vmatpush3.bf16.msra.mxu0 %v2291_v18 }
  0x36   : > { %2211 = vmatprep.subr.bf16.mxu0 %v2294_v20 }
  0x39   : > { %2212 = vmatpush3.bf16.msra.mxu0 %v2294_v20 }
  0x3a   : > { %2213 = vmatprep.subr.bf16.mxu0 %v2297_v23 }
  0x3d   : > { %2214 = vmatpush3.bf16.msra.mxu0 %v2297_v23  ;;  %v2320_v23 = vld [vmem:[%s2853_s3 + $0x70] sm:$0xff]  }
  0x3e   : > { %2215 = vmatprep.subr.bf16.mxu0 %v2300_v27 }
  0x41   : > { %2216 = vmatpush3.bf16.msra.mxu0 %v2300_v27 }
  0x42   : > { %2217 = vmatprep.subr.bf16.mxu0 %v2303_v30 }
  0x45   : > { %2218 = vmatpush3.bf16.msra.mxu0 %v2303_v30  ;;  %v2321_v30 = vld [vmem:[%s2853_s3 + $0xb0] sm:$0xff]  }
  0x46   : > { %2219 = vmatprep.subr.bf16.mxu0 %v2306_v33 }
  0x49   : > { %2220 = vmatpush3.bf16.msra.mxu0 %v2306_v33 }
  0x4a   : > { %2225 = vmatprep.subr.bf16.mxu0 %v2555_v36 }
  0xec   : > { %v2203_v40 = vpop.f32.mrf.mxu0 }
  0xed   : > { %v396_v41 = vadd.f32 %v2203_v40, %v1812_v39  ;;  %v2322_v40 = vld [vmem:[%s2853_s3 + $0x30] sm:$0xff]  }
  0xee   : > { %v387_v42 = vpop.f32.mrf.mxu0 }
  0xef   : > { %v409_v43 = vsel %vm404_vm0, %v396_v41, 0.0  ;;  %v388_v44 = vadd.f32 %v1812_v39, %v387_v42 }
  0xf0   : > { %v413_v45 = vpack.c.bf16 %v409_v43, %v409_v43  ;;  %v2204_v46 = vpop.f32.mrf.mxu0 }
  0xf1   : > { %v407_v47 = vsel %vm404_vm0, %v388_v44, 0.0  ;;  %v399_v48 = vadd.f32 %v2204_v46, %v1812_v39  ;;  %v1838_v46 = vcombine.low %v453_v8, %v453_v8 }
  0xf2   : > { %440 = vst [vmem:[#allocation2 + $0x28] sm:$0xf] %v413_v45  ;;  %v411_v49 = vpack.c.bf16 %v407_v47, %v407_v47  ;;  %v390_v50 = vpop.f32.mrf.mxu0 }
  0xf3   : > { %v410_v51 = vsel %vm404_vm0, %v399_v48, 0.0  ;;  %v391_v52 = vadd.f32 %v1812_v39, %v390_v50  ;;  %v2325_v48 = vld [vmem:[%s2853_s3 + $0x28] sm:$0xff]   ;;  %v594_v60 = vshrl.u32 %v1838_v46, 16 }
  0xf4   : > { %438 = vst [vmem:[#allocation2 + $0x10] sm:$0xf] %v411_v49  ;;  %v414_v53 = vpack.c.bf16 %v410_v51, %v410_v51  ;;  %v2058_v54 = vpack.c.bf16 %v410_v51, %v409_v43  ;;  %v2323_v43 = vld [vmem:[%s2853_s3 + $0x68] sm:$0xff]  }
  0xf5   : > { %v408_v55 = vsel %vm404_vm0, %v391_v52, 0.0 }
  0xf6   : > { %2060 = vst [vmem:[%s264_s13 + $0x8] sm:$0xff] %v2058_v54   ;;  %441 = vst [vmem:[#allocation2 + $0x34] sm:$0xf] %v414_v53  ;;  %v412_v56 = vpack.c.bf16 %v408_v55, %v408_v55  ;;  %v2053_v57 = vpack.c.bf16 %v408_v55, %v407_v47  ;;  %v2330_v54 = vld [vmem:[%s2853_s3 + $0x60] sm:$0xff]   ;;  %v450_v55 = vld [vmem:[#allocation2 + $0x30] sm:$0x8] }
  0xf7   : > { %v1835_v5 = vcombine.low %v2572_v59, %v450_v55  ;;  %v2337_v59 = vld [vmem:[%s2853_s3 + $0x90] sm:$0xff]  }
  0xf8   : > { %2054 = vst [vmem:[%s264_s13] sm:$0xff] %v2053_v57   ;;  %439 = vst [vmem:[#allocation2 + $0x1c] sm:$0xf] %v412_v56  ;;  %v2331_v57 = vld [vmem:[%s2853_s3 + $0xa0] sm:$0xff]  }
  0xf9   : > { %v449_v62 = vld [vmem:[#allocation2 + $0x28] sm:$0xf] }
  0xfa   : > { %v1830_v2 = vcombine.low %v449_v62, %v449_v62  ;;  %v2640_v61 = vld [vmem:[#allocation2 + $0x28] sm:$0xf] }
  0xfb   : > { %v445_v4 = vld [vmem:[#allocation2 + $0x10] sm:$0xf] }
  0xfc   : > { %v1825_v6 = vcombine.low %v443_v63, %v445_v4  ;;  %v542_v7 = vshrl.u32 %v1830_v2, 16  ;;  %v545_v26 = vshll.u32 %v1830_v2, 16  ;;  %v1832_v63 = vcombine.low %v450_v55, %v450_v55  ;;  %v2333_v2 = vld [vmem:[%s2853_s3 + $0x58] sm:$0xff]  }
  0xfd   : > { %v2579_v12 = vld [vmem:[#allocation2 + $0x34] sm:$0xf] }
  0xfe   : > { %v503_v11 = vshrl.u32 %v1825_v6, 16  ;;  %v544_v15 = vrot.slane %v542_v7, 7  ;;  %v1895_v22 = vcombine.low %v2579_v12, %v453_v8  ;;  %v506_v29 = vshll.u32 %v1825_v6, 16 }
  0xff   : > { %v447_v14 = vld [vmem:[#allocation2 + $0x1c] sm:$0xf]  ;;  %v2595_v33 = vcombine.low %v449_v62, %v2579_v12  ;;  %v2649_v1 = vcombine.low %v2579_v12, %v2579_v12  ;;  %v596_v7 = vrot.slane %v594_v60, 7  ;;  %v597_v8 = vshll.u32 %v1838_v46, 16  ;;  %v1215_v60 = vld [vmem:[#allocation2 + $0x14] sm:$0x1] }
 0x100   : > { %v1826_v17 = vcombine.low %v447_v14, %v447_v14  ;;  %v1829_v18 = vcombine.low %v445_v4, %v447_v14  ;;  %v2581_v19 = vcombine.low %v447_v14, %v449_v62  ;;  %v505_v20 = vrot.slane %v503_v11, 7  ;;  %v2634_v56 = vld [vmem:[#allocation2 + $0x1c] sm:$0xf]  ;;  %v2332_v62 = vld [vmem:[%s2853_s3 + $0x20] sm:$0xff]  }
 0x101   : > { %v547_v34 = vor.u32 %v545_v26, %v544_v15  ;;  %v1951_v0 = vcombine.low %v2634_v56, %v2634_v56  ;;  %v2346_v4 = vld [vmem:[#allocation2 + $0x3c] ss:$0 sps:$4 sm:$0x88]   ;;  %v2667_v12 = vshrl.u32 %v1832_v63, 16  ;;  %v1212_v15 = vld [vmem:[#allocation2 + $0x4] sm:$0xf] }
 0x102   : > { %v516_v27 = vshrl.u32 %v1826_v17, 16  ;;  %v529_v28 = vshrl.u32 %v1829_v18, 16  ;;  %880 = vmatprep.mubr.bf16.mxu1 %v1829_v18  ;;  %2221 = vmatprep.mubr.bf16.mxu0 %v2581_v19  ;;  %v519_v32 = vshll.u32 %v1826_v17, 16  ;;  %v532_v39 = vshll.u32 %v1829_v18, 16  ;;  %v2335_v11 = vld [vmem:[%s2853_s3 + $0x18] sm:$0xff]   ;;  %v2343_v63 = vld [vmem:[%s2853_s3 + $0x80] sm:$0xff]  }
 0x103   : > { %881 = vmatmul.mubr.bf16.vlgmr.msra.gmra.mxu1 %v1825_v6  ;;  %2222 = vmatmul.mubr.bf16.vlgmr.msra.gmra.mxu0 %v1895_v22  ;;  %v508_v42 = vor.u32 %v506_v29, %v505_v20  ;;  %v548_v47 = vsel %vm2603_vm3, %v1842_v25, %v547_v34  ;;  %v1955_v6 = vcombine.low %v2640_v61, %v2640_v61  ;;  %v1282_v13 = vshrl.u32 %v1951_v0, 16  ;;  %v2676_v18 = vld [vmem:[#allocation2 + $0x20] sm:$0x1] }
 0x104   : > { %v518_v37 = vrot.slane %v516_v27, 7  ;;  %v531_v38 = vrot.slane %v529_v28, 7  ;;  %2110 = vmatpush3.bf16.msra.mxu1 %v2318_v21  ;;  %2226 = vmatpush3.bf16.msra.mxu0 %v2555_v36  ;;  %v2324_v36 = vld [vmem:[%s2853_s3 + $0xa8] sm:$0xff]   ;;  %v1285_v14 = vshll.u32 %v1951_v0, 16  ;;  %v568_v16 = vshrl.u32 %v2649_v1, 16 }
 0x105   : > { %888 = vmatprep.mubr.bf16.mxu1 %v2595_v33  ;;  %2111 = vmatprep.subr.bf16.mxu1 %v2320_v23  ;;  %v2623_v50 = vsel %vm2603_vm3, %v1839_v31, %v508_v42  ;;  %v589_v17 = vshrl.u32 %v2346_v4, 16  ;;  %v2678_v20 = vshrl.u32 %v1835_v5, 16  ;;  %v1957_v21 = vcombine.low %v2662_v10, %v2662_v10 }
 0x106   : > { %2227 = vmatprep.subr.bf16.mxu0 %v2321_v30  ;;  %v521_v44 = vor.u32 %v519_v32, %v518_v37  ;;  %v534_v45 = vor.u32 %v532_v39, %v531_v38  ;;  %v1310_v22 = vshrl.u32 %v1955_v6, 16  ;;  %v1313_v23 = vshll.u32 %v1955_v6, 16  ;;  %v2339_v37 = vld [vmem:[%s2853_s3 + $0x48] sm:$0xff]  }
 0x107   : > { %v2682_v25 = vor.u32 %v597_v8, %v596_v7  ;;  %v2684_v26 = vshrl.u32 %v1831_v9, 16  ;;  %v555_v27 = vshrl.u32 %v2581_v19, 16  ;;  %v581_v29 = vshrl.u32 %v2595_v33, 16  ;;  %v2340_v38 = vld [vmem:[%s2853_s3 + $0x88] sm:$0xff]  }
 0x108   : > { %2112 = vmatpush3.bf16.msra.mxu1 %v2322_v40  ;;  %2228 = vmatpush3.bf16.msra.mxu0 %v2321_v30  ;;  %v522_v49 = vsel %vm2603_vm3, %v1840_v24, %v521_v44  ;;  %v2627_v51 = vsel %vm2603_vm3, %v1841_v35, %v534_v45  ;;  %v1214_v24 = vld [vmem:[#allocation2 + $0x10] sm:$0xf]  ;;  %v1953_v31 = vcombine.low %v2676_v18, %v2676_v18  ;;  %v1284_v32 = vrot.slane %v1282_v13, 4 }
 0x109   : > { %2113 = vmatprep.subr.bf16.mxu1 %v2323_v43  ;;  %2229 = vmatprep.subr.bf16.mxu0 %v2324_v36  ;;  %v1922_v52 = vcombine.low %v522_v49, %v548_v47  ;;  %v1921_v53 = vcombine.high %v2623_v50, %v2627_v51  ;;  %v1954_v28 = vcombine.low %v1214_v24, %v2634_v56  ;;  %v2338_v30 = vld [vmem:[%s2853_s3 + $0x10] sm:$0xff]   ;;  %v1287_v34 = vrot.slane %v1285_v14, 5  ;;  %v1213_v47 = vld [vmem:[#allocation2 + $0x8] sm:$0x1] }
 0x10a   : > { %v570_v35 = vrot.slane %v568_v16, 7  ;;  %v1844_v39 = vrot.slane %v2667_v12, 11  ;;  %v1846_v40 = vrot.slane %v589_v17, 11  ;;  %v1950_v42 = vcombine.low %v1212_v15, %v1214_v24 }
 0x10b   : > { %889 = vmatmul.mubr.bf16.gmra.mxu1 %v2581_v19  ;;  %2241 = vmatprep.mubr.bf16.mxu0 %v1922_v52  ;;  %v1845_v43 = vrot.slane %v2678_v20, 11  ;;  %v1315_v44 = vrot.slane %v1313_v23, 5  ;;  %v571_v45 = vshll.u32 %v2649_v1, 16  ;;  %v557_v46 = vrot.slane %v555_v27, 7 }
 0x10c   : > { %2114 = vmatpush3.bf16.msra.mxu1 %v2325_v48  ;;  %2230 = vmatpush3.bf16.msra.mxu0 %v2324_v36  ;;  %v1312_v36 = vrot.slane %v1310_v22, 4  ;;  %v1296_v48 = vshrl.u32 %v1954_v28, 16  ;;  %v1299_v49 = vshll.u32 %v1954_v28, 16  ;;  %v583_v52 = vrot.slane %v581_v29, 7  ;;  %v2351_v29 = vld [vmem:[%s2853_s3 + $0x1b8] sm:$0xff]  }
 0x10d   : > { %1146 = vmatprep.mubr.bf16.mxu1 %v1921_v53  ;;  %2115 = vmatprep.subr.bf16.mxu1 %v2330_v54  ;;  %v2341_v53 = vld [vmem:[%s2853_s3 + $0x8] sm:$0xff]   ;;  %v1843_v54 = vrot.slane %v2684_v26, 11  ;;  %v1288_v55 = vor.u32 %v1287_v34, %v1284_v32  ;;  %v573_v0 = vor.u32 %v571_v45, %v570_v35  ;;  %v558_v1 = vshll.u32 %v2581_v19, 16  ;;  %v2344_v19 = vld [vmem:[%s2853_s3] sm:$0xff]  }
 0x10e   : > { %2231 = vmatprep.subr.bf16.mxu0 %v2331_v57  ;;  %v600_v4 = vsel %vm2603_vm3, %v1846_v40, %v2682_v25  ;;  %v1316_v5 = vor.u32 %v1315_v44, %v1312_v36  ;;  %v1319_v6 = vshll.u32 %v1957_v21, 16  ;;  %v1956_v7 = vcombine.low %v1215_v60, %v2676_v18  ;;  %v2358_v40 = vld [vmem:[%s2853_s3 + $0x1b0] sm:$0xff]   ;;  %v2360_v44 = vld [vmem:[%s2853_s3 + $0x228] sm:$0xff]  }
 0x10f   : > { %v584_v8 = vshll.u32 %v2595_v33, 16  ;;  %v560_v9 = vor.u32 %v558_v1, %v557_v46  ;;  %v1301_v12 = vrot.slane %v1299_v49, 5  ;;  %v1289_v13 = vrot.slane %v1288_v55, 4  ;;  %v2347_v33 = vld [vmem:[%s2853_s3 + $0x1f8] sm:$0xff]   ;;  %v2361_v46 = vld [vmem:[%s2853_s3 + $0x1a8] sm:$0xff]  }
 0x110   : > { %2116 = vmatpush3.bf16.msra.mxu1 %v2332_v62  ;;  %2232 = vmatpush3.bf16.msra.mxu0 %v2331_v57  ;;  %v1291_v57 = vshll.u32 %v1953_v31, 16  ;;  %v2342_v62 = vld [vmem:[%s2853_s3 + $0x40] sm:$0xff]   ;;  %v1952_v15 = vcombine.low %v1213_v47, %v1215_v60  ;;  %v574_v16 = vsel %vm2603_vm3, %v1844_v39, %v573_v0  ;;  %v1317_v22 = vrot.slane %v1316_v5, 4  ;;  %v2356_v39 = vld [vmem:[%s2853_s3 + $0x1f0] sm:$0xff]   ;;  %v2370_v1 = vld [vmem:[%s2853_s3 + $0x218] sm:$0xff]  }
 0x111   : > { %2117 = vmatprep.subr.bf16.mxu1 %v2333_v2  ;;  %2233 = vmatprep.subr.bf16.mxu0 %v2334_v3  ;;  %v1268_v2 = vshrl.u32 %v1950_v42, 16  ;;  %v1321_v23 = vrot.slane %v1319_v6, 5  ;;  %v561_v24 = vsel %vm2603_vm3, %v1843_v54, %v560_v9  ;;  %v1305_v27 = vshll.u32 %v1956_v7, 16  ;;  %v1220_v47 = vld [vmem:[#allocation2 + $0x34] sm:$0xf]  ;;  %v2367_v54 = vld [vmem:[%s2853_s3 + $0x220] sm:$0xff]  }
 0x112   : > { %v1293_v14 = vrot.slane %v1291_v57, 5  ;;  %v1925_v28 = vcombine.low %v574_v16, %v600_v4  ;;  %v1920_v31 = vcombine.low %v2623_v50, %v2627_v51  ;;  %v1277_v35 = vshll.u32 %v1952_v15, 16  ;;  %v2357_v50 = vld [vmem:[%s2853_s3 + $0x230] sm:$0xff]   ;;  %v2383_v55 = vld [vmem:[#allocation2 + $0x40] ss:$0 sps:$4 sm:$0xff]  }
 0x113   : > { %v1270_v17 = vrot.slane %v1268_v2, 4  ;;  %v1307_v41 = vrot.slane %v1305_v27, 5  ;;  %v1959_v57 = vcombine.low %v1220_v47, %v1220_v47  ;;  %v1958_v60 = vcombine.low %v2634_v56, %v2640_v61 }
 0x114   : > { %2118 = vmatpush3.bf16.msra.mxu1 %v2335_v11  ;;  %2234 = vmatpush3.bf16.msra.mxu0 %v2334_v3  ;;  %v1271_v3 = vshll.u32 %v1950_v42, 16  ;;  %v1298_v11 = vrot.slane %v1296_v48, 4  ;;  %v2359_v42 = vld [vmem:[%s2853_s3 + $0x1e8] sm:$0xff]   ;;  %v1279_v36 = vrot.slane %v1277_v35, 5  ;;  %v1962_v0 = vcombine.low %v2640_v61, %v1220_v47  ;;  %v2372_v61 = vld [vmem:[%s2853_s3 + $0x1d0] sm:$0xff]  }
 0x115   : > { %2119 = vmatprep.subr.bf16.mxu1 %v2336_v58  ;;  %2235 = vmatprep.subr.bf16.mxu0 %v2337_v59  ;;  %v2348_v58 = vld [vmem:[%s2853_s3 + $0x238] sm:$0xff]   ;;  %v1366_v56 = vshrl.u32 %v2383_v55, 16  ;;  %v1369_v2 = vshll.u32 %v2383_v55, 16  ;;  %v1338_v4 = vshrl.u32 %v1959_v57, 16  ;;  %v1341_v5 = vshll.u32 %v1959_v57, 16 }
 0x116   : > { %v1273_v21 = vrot.slane %v1271_v3, 5  ;;  %v1302_v26 = vor.u32 %v1301_v12, %v1298_v11  ;;  %v1221_v3 = vld [vmem:[#allocation2 + $0x38] sm:$0x1]  ;;  %v1324_v6 = vshrl.u32 %v1958_v60, 16  ;;  %v1327_v7 = vshll.u32 %v1958_v60, 16  ;;  %v2373_v12 = vld [vmem:[%s2853_s3 + $0x210] sm:$0xff]  }
 0x117   : > { %v1352_v9 = vshrl.u32 %v1962_v0, 16  ;;  %v1355_v11 = vshll.u32 %v1962_v0, 16  ;;  %v1371_v15 = vrot.slane %v1369_v2, 5  ;;  %v1960_v16 = vcombine.low %v2676_v18, %v2662_v10  ;;  %v2376_v18 = vld [vmem:[%s2853_s3 + $0x208] sm:$0xff]  }
 0x118   : > { %2120 = vmatpush3.bf16.msra.mxu1 %v2338_v30  ;;  %2236 = vmatpush3.bf16.msra.mxu0 %v2337_v59  ;;  %v586_v59 = vor.u32 %v584_v8, %v583_v52  ;;  %v1294_v30 = vsel %vm2734_vm6, %v1289_v13, %v1293_v14  ;;  %v1274_v34 = vor.u32 %v1273_v21, %v1270_v17  ;;  %v1303_v20 = vrot.slane %v1302_v26, 4  ;;  %v2366_v52 = vld [vmem:[%s2853_s3 + $0x1e0] sm:$0xff]   ;;  %v2371_v8 = vld [vmem:[%s2853_s3 + $0x198] sm:$0xff]   ;;  %v2374_v21 = vld [vmem:[%s2853_s3 + $0x190] sm:$0xff]  }
 0x119   : > { %2121 = vmatprep.subr.bf16.mxu1 %v2339_v37  ;;  %2237 = vmatprep.subr.bf16.mxu0 %v2340_v38  ;;  %v2384_v13 = vld [vmem:[#allocation2 + $0x44] ss:$0 sps:$4 sm:$0x11]   ;;  %v1368_v14 = vrot.slane %v1366_v56, 4  ;;  %v1329_v17 = vrot.slane %v1327_v7, 5  ;;  %v1357_v26 = vrot.slane %v1355_v11, 5 }
 0x11a   : > { %v587_v32 = vsel %vm2603_vm3, %v1845_v43, %v586_v59  ;;  %v1275_v43 = vrot.slane %v1274_v34, 4  ;;  %v2768_v45 = vsel %vm2734_vm6, %v1303_v20, %v1307_v41  ;;  %v1326_v59 = vrot.slane %v1324_v6, 4  ;;  %v2377_v34 = vld [vmem:[%s2853_s3 + $0x188] sm:$0xff]  }
 0x11b   : > { %v1924_v37 = vcombine.high %v561_v24, %v587_v32  ;;  %v1923_v48 = vcombine.low %v561_v24, %v587_v32  ;;  %v1354_v24 = vrot.slane %v1352_v9, 4  ;;  %v1333_v32 = vshll.u32 %v1960_v16, 16 }
 0x11c   : > { %2122 = vmatpush3.bf16.msra.mxu1 %v2341_v53  ;;  %2238 = vmatpush3.bf16.msra.mxu0 %v2340_v38  ;;  %v1322_v38 = vsel %vm2734_vm6, %v1317_v22, %v1321_v23  ;;  %v2775_v49 = vsel %vm2734_vm6, %v1275_v43, %v1279_v36  ;;  %v2375_v22 = vld [vmem:[%s2853_s3 + $0x1c8] sm:$0xff]   ;;  %v1964_v23 = vcombine.low %v2662_v10, %v1221_v3  ;;  %v2378_v10 = vld [vmem:[%s2853_s3 + $0x1c0] sm:$0xff]  }
 0x11d   : > { %2123 = vmatprep.subr.bf16.mxu1 %v2342_v62  ;;  %2239 = vmatprep.subr.bf16.mxu0 %v2343_v63  ;;  %v2016_v51 = vcombine.low %v1294_v30, %v1322_v38  ;;  %v2015_v53 = vcombine.high %v2775_v49, %v2768_v45  ;;  %v2368_v62 = vld [vmem:[%s2853_s3 + $0x1a0] sm:$0xff]   ;;  %v1375_v30 = vshll.u32 %v2384_v13, 16  ;;  %v1358_v35 = vor.u32 %v1357_v26, %v1354_v24 }
 0x11e   : > { %v2379_v38 = vld [vmem:[%s2853_s3 + $0x200] sm:$0xff]  }
 0x11f   : > { %v1377_v20 = vrot.slane %v1375_v30, 5  ;;  %v1359_v43 = vrot.slane %v1358_v35, 4 }
 0x120   : > { %2124 = vmatpush3.bf16.msra.mxu1 %v2344_v19  ;;  %2240 = vmatpush3.bf16.msra.mxu0 %v2343_v63  ;;  %v2369_v63 = vld [vmem:[%s2853_s3 + $0x1d8] sm:$0xff]   ;;  %v1961_v19 = vcombine.low %v1221_v3, %v1221_v3 }
 0x121   : > { %2147 = vmatprep.subr.bf16.mxu1 %v2347_v33  ;;  %2245 = vmatprep.subr.bf16.mxu0 %v2348_v58  ;;  %v1340_v33 = vrot.slane %v1338_v4, 4 }
 0x122   : > { %v1347_v27 = vshll.u32 %v1961_v19, 16 }
 0x123   : > { %1147 = vmatmul.mubr.bf16.vlgmr.msra.gmra.mxu1 %v1920_v31  ;;  %2242 = vmatmul.mubr.bf16.vlgmr.msra.gmra.mxu0 %v1925_v28  ;;  %v1372_v28 = vor.u32 %v1371_v15, %v1368_v14  ;;  %v1330_v31 = vor.u32 %v1329_v17, %v1326_v59 }
 0x124   : > { %1154 = vmatprep.mubr.bf16.mxu1 %v1924_v37  ;;  %2148 = vmatpush3.bf16.msra.mxu1 %v2351_v29  ;;  %v1361_v37 = vshll.u32 %v1964_v23, 16 }
 0x125   : > { %2246 = vmatpush3.bf16.msra.mxu0 %v2348_v58  ;;  %2261 = vmatprep.mubr.bf16.mxu0 %v2016_v51  ;;  %v1343_v58 = vrot.slane %v1341_v5, 5  ;;  %v1331_v41 = vrot.slane %v1330_v31, 4 }
 0x126   : > { %2149 = vmatprep.subr.bf16.mxu1 %v2356_v39  ;;  %2247 = vmatprep.subr.bf16.mxu0 %v2357_v50  ;;  %v1349_v39 = vrot.slane %v1347_v27, 5  ;;  %v1363_v36 = vrot.slane %v1361_v37, 5 }
 0x127   : > { %v1344_v29 = vor.u32 %v1343_v58, %v1340_v33 }
 0x128   : > { %2150 = vmatpush3.bf16.msra.mxu1 %v2358_v40  ;;  %v1335_v40 = vrot.slane %v1333_v32, 5 }
 0x129   : > { %2248 = vmatpush3.bf16.msra.mxu0 %v2357_v50  ;;  %2151 = vmatprep.subr.bf16.mxu1 %v2359_v42  ;;  %v1373_v50 = vrot.slane %v1372_v28, 4  ;;  %v1345_v51 = vrot.slane %v1344_v29, 4  ;;  %v2380_v42 = vld [vmem:[%s2853_s3 + $0x180] sm:$0xff]  }
 0x12a   : > { %2249 = vmatprep.subr.bf16.mxu0 %v2360_v44  ;;  %v1336_v47 = vsel %vm2734_vm6, %v1331_v41, %v1335_v40 }
 0x12b   : > { %1155 = vmatmul.mubr.bf16.gmra.mxu1 %v1923_v48  ;;  %v2014_v48 = vcombine.low %v2775_v49, %v2768_v45 }
 0x12c   : > { %2152 = vmatpush3.bf16.msra.mxu1 %v2361_v46  ;;  %1628 = vmatprep.mubr.bf16.mxu1 %v2015_v53  ;;  %v1378_v46 = vsel %vm2734_vm6, %v1373_v50, %v1377_v20 }
 0x12d   : > { %2250 = vmatpush3.bf16.msra.mxu0 %v2360_v44  ;;  %2153 = vmatprep.subr.bf16.mxu1 %v2366_v52  ;;  %v1350_v44 = vsel %vm2734_vm6, %v1345_v51, %v1349_v39  ;;  %v1364_v52 = vsel %vm2734_vm6, %v1359_v43, %v1363_v36 }
 0x12e   : > { %2251 = vmatprep.subr.bf16.mxu0 %v2367_v54  ;;  %v2019_v53 = vcombine.low %v1350_v44, %v1378_v46  ;;  %v2017_v55 = vcombine.low %v1336_v47, %v1364_v52 }
 0x130   : > { %2154 = vmatpush3.bf16.msra.mxu1 %v2368_v62 }
 0x131   : > { %2252 = vmatpush3.bf16.msra.mxu0 %v2367_v54  ;;  %2155 = vmatprep.subr.bf16.mxu1 %v2369_v63  ;;  %v2018_v54 = vcombine.high %v1336_v47, %v1364_v52 }
 0x132   : > { %2253 = vmatprep.subr.bf16.mxu0 %v2370_v1 }
 0x134   : > { %2156 = vmatpush3.bf16.msra.mxu1 %v2371_v8 }
 0x135   : > { %2254 = vmatpush3.bf16.msra.mxu0 %v2370_v1  ;;  %2157 = vmatprep.subr.bf16.mxu1 %v2372_v61 }
 0x136   : > { %2255 = vmatprep.subr.bf16.mxu0 %v2373_v12 }
 0x138   : > { %2158 = vmatpush3.bf16.msra.mxu1 %v2374_v21 }
 0x139   : > { %2256 = vmatpush3.bf16.msra.mxu0 %v2373_v12  ;;  %2159 = vmatprep.subr.bf16.mxu1 %v2375_v22 }
 0x13a   : > { %2257 = vmatprep.subr.bf16.mxu0 %v2376_v18 }
 0x13c   : > { %2160 = vmatpush3.bf16.msra.mxu1 %v2377_v34 }
 0x13d   : > { %2258 = vmatpush3.bf16.msra.mxu0 %v2376_v18  ;;  %2161 = vmatprep.subr.bf16.mxu1 %v2378_v10  ;;  %v2044_v10 = vld [vmem:[%s2854_s4] ss:$0 sm:$0xff] }
 0x13e   : > { %2259 = vmatprep.subr.bf16.mxu0 %v2379_v38 }
 0x140   : > { %2162 = vmatpush3.bf16.msra.mxu1 %v2380_v42 }
 0x141   : > { %2260 = vmatpush3.bf16.msra.mxu0 %v2379_v38 }
 0x143   : > { %1629 = vmatmul.mubr.bf16.vlgmr.msra.gmra.mxu1 %v2014_v48 }
 0x144   : > { %2262 = vmatmul.mubr.bf16.vlgmr.msra.gmra.mxu0 %v2019_v53  ;;  %1636 = vmatprep.mubr.bf16.mxu1 %v2018_v54 }
 0x14b   : > { %1637 = vmatmul.mubr.bf16.gmra.mxu1 %v2017_v55 }
 0x1c3   : > { %v2087_v57 = vpop.f32.mrf.mxu1  ;;  %v2223_v49 = vpop.f32.mrf.mxu0 }
 0x1c5   : > { %v2088_v60 = vpop.f32.mrf.mxu1  ;;  %v931_v25 = vpop.f32.mrf.mxu0 }
 0x1c6   : > { %v2089_v19 = vadd.f32 %v2088_v60, %v2087_v57 }
 0x1c7   : > { %v2090_v62 = vpop.f32.mrf.mxu1  ;;  %v2224_v5 = vpop.f32.mrf.mxu0 }
 0x1c8   : > { %v932_v33 = vadd.f32 %v2089_v19, %v931_v25 }
 0x1c9   : > { %v2091_v63 = vpop.f32.mrf.mxu1  ;;  %v934_v7 = vpop.f32.mrf.mxu0 }
 0x1ca   : > { %v2092_v15 = vadd.f32 %v2091_v63, %v2090_v62 }
 0x1cb   : > { %v2093_v0 = vpop.f32.mrf.mxu1 }
 0x1cc   : > { %v935_v23 = vadd.f32 %v2092_v15, %v934_v7 }
 0x1cd   : > { %v2094_v1 = vpop.f32.mrf.mxu1 }
 0x1ce   : > { %v2095_v26 = vadd.f32 %v2094_v1, %v2093_v0 }
 0x1cf   : > { %v2096_v56 = vpop.f32.mrf.mxu1 }
 0x1d0   : > { %v940_v37 = vadd.f32 %v2223_v49, %v2095_v26 }
 0x1d1   : > { %v2097_v2 = vpop.f32.mrf.mxu1 }
 0x1d2   : > { %v2098_v38 = vadd.f32 %v2097_v2, %v2096_v56 }
 0x1d4   : > { %v943_v46 = vadd.f32 %v2224_v5, %v2098_v38 }
 0x1e3   : > { %v2125_v45 = vpop.f32.mrf.mxu1  ;;  %v2243_v61 = vpop.f32.mrf.mxu0 }
 0x1e5   : > { %v2126_v3 = vpop.f32.mrf.mxu1  ;;  %v1197_v11 = vpop.f32.mrf.mxu0 }
 0x1e6   : > { %v2127_v14 = vadd.f32 %v2126_v3, %v2125_v45 }
 0x1e7   : > { %v2128_v4 = vpop.f32.mrf.mxu1  ;;  %v2244_v13 = vpop.f32.mrf.mxu0 }
 0x1e8   : > { %v1149_v21 = vadd.f32 %v2127_v14, %v932_v33 }
 0x1e9   : > { %v2129_v6 = vpop.f32.mrf.mxu1  ;;  %v1200_v58 = vpop.f32.mrf.mxu0 }
 0x1ea   : > { %v2130_v59 = vadd.f32 %v2129_v6, %v2128_v4  ;;  %v1198_v30 = vadd.f32 %v1197_v11, %v1149_v21 }
 0x1eb   : > { %v2131_v8 = vpop.f32.mrf.mxu1 }
 0x1ec   : > { %v1152_v28 = vadd.f32 %v2130_v59, %v935_v23 }
 0x1ed   : > { %v2132_v9 = vpop.f32.mrf.mxu1 }
 0x1ee   : > { %v2133_v31 = vadd.f32 %v2132_v9, %v2131_v8  ;;  %v1201_v51 = vadd.f32 %v1200_v58, %v1152_v28 }
 0x1ef   : > { %v2134_v12 = vpop.f32.mrf.mxu1 }
 0x1f0   : > { %v1157_v40 = vadd.f32 %v2133_v31, %v940_v37 }
 0x1f1   : > { %v2135_v16 = vpop.f32.mrf.mxu1 }
 0x1f2   : > { %v2136_v42 = vadd.f32 %v2135_v16, %v2134_v12  ;;  %v1206_v53 = vadd.f32 %v2243_v61, %v1157_v40 }
 0x1f4   : > { %v1160_v54 = vadd.f32 %v2136_v42, %v943_v46 }
 0x1f6   : > { %v1209_v0 = vadd.f32 %v2244_v13, %v1160_v54 }
 0x203   : > { %v2163_v17 = vpop.f32.mrf.mxu1 }
 0x204   : > { %v2263_v22 = vpop.f32.mrf.mxu0 }
 0x205   : > { %v2164_v24 = vpop.f32.mrf.mxu1 }
 0x206   : > { %v2165_v18 = vadd.f32 %v2164_v24, %v2163_v17  ;;  %v1679_v27 = vpop.f32.mrf.mxu0 }
 0x207   : > { %v2166_v29 = vpop.f32.mrf.mxu1 }
 0x208   : > { %v1680_v32 = vadd.f32 %v2165_v18, %v1679_v27  ;;  %v2264_v34 = vpop.f32.mrf.mxu0 }
 0x209   : > { %v2167_v35 = vpop.f32.mrf.mxu1 }
 0x20a   : > { %v1694_v39 = vadd.f32 %v1680_v32, %v1198_v30  ;;  %v2168_v50 = vadd.f32 %v2167_v35, %v2166_v29  ;;  %v1682_v20 = vpop.f32.mrf.mxu0 }
 0x20b   : > { %v2169_v41 = vpop.f32.mrf.mxu1 }
 0x20c   : > { %v1705_v43 = vadd.f32 %v2044_v10, %v1694_v39  ;;  %v1683_v36 = vadd.f32 %v2168_v50, %v1682_v20 }
 0x20d   : > { %v2170_v44 = vpop.f32.mrf.mxu1 }
 0x20e   : > { %1709 = vst [vmem:[%s259_s23] sm:$0xff] %v1705_v43  ;;  %v1695_v47 = vadd.f32 %v1683_v36, %v1201_v51  ;;  %v2171_v48 = vadd.f32 %v2170_v44, %v2169_v41 }
 0x20f   : > { %v2172_v52 = vpop.f32.mrf.mxu1 }
 0x210   : > { %v1706_v55 = vadd.f32 %v2044_v10, %v1695_v47  ;;  %v1688_v57 = vadd.f32 %v2263_v22, %v2171_v48 }
 0x211   : > { %v2173_v60 = vpop.f32.mrf.mxu1 }
 0x212   : > { %1710 = vst [vmem:[%s259_s23 + $0x8] sm:$0xff] %v1706_v55  ;;  %v1696_v62 = vadd.f32 %v1688_v57, %v1206_v53  ;;  %v2174_v63 = vadd.f32 %v2173_v60, %v2172_v52 }
 0x214   : > { %v1707_v1 = vadd.f32 %v2044_v10, %v1696_v62  ;;  %v1691_v56 = vadd.f32 %v2264_v34, %v2174_v63 }
 0x216   : > { %1711 = vst [vmem:[%s259_s23 + $0x10] sm:$0xff] %v1707_v1  ;;  %v1697_v2 = vadd.f32 %v1691_v56, %v1209_v0 }
 0x218   : > { %v1708_v45 = vadd.f32 %v2044_v10, %v1697_v2 }
 0x21a   : > { %1712 = vst [vmem:[%s259_s23 + $0x18] sm:$0xff] %v1708_v45 }
 0x21b PF: > { %s17_s21 = sadd.s32 1, %s2395_s21  }
 0x21c   : > { %p14_p4 = scmp.ge.s32.totalorder %s17_s21, 4  }
 0x21e   :  { %16 = sbr.rel (!%p14_p4) target bundleno = 1 (0x1), region = 85 }

// kernel: pyramid_features2_forward.5
= control target key start
LH: loop header
LB: loop body
LE: loop exit
PB: predicated region body
PF: predicated region fallthrough
CT: control target
= control target key end

     0   :  { %11 = vsyncpa [#allocation4], 0  ;;  %s6506_s0 = inlined_call_operand.vmem [shape: bf16[2,16,16,32], index: 0, kind: input, shape index: {}]   ;;  %s6507_s1 = inlined_call_operand.vmem [shape: bf16[32,128], index: 1, kind: input, shape index: {}]   ;;  %s6508_s2 = inlined_call_operand.vmem [shape: f32[1,128], index: 2, kind: input, shape index: {}]   ;;  %s6509_s3 = inlined_call_operand.vmem [shape: bf16[3,384,128], index: 3, kind: input, shape index: {}]   ;;  %s6510_s4 = inlined_call_operand.vmem [shape: f32[1,128], index: 4, kind: input, shape index: {}]   ;;  %s6511_s5 = inlined_call_operand.vmem [shape: bf16[2,8,16,128], index: 5, kind: input, shape index: {}]   ;;  %s6512_s6 = inlined_call_operand.hbm [shape: f32[2,16,16,128], index: 6, kind: output, shape index: {}]  }
   0x1   :  { %13 = vsyncpa [#allocation4 + $0x1], 0  ;;  %s4983_s21 = smov 0   ;;  %s4985_s22 = smov 0  }
   0x2   :  { %s4987_s23 = smov 0   ;;  %s4989_s24 = smov 0  }
   0x3 LB: > { %s5004_s25 = sadd.s32 4294967295, %s4942_s24   ;;  %s3640_s26 = sadd.s32 4294967294, %s4942_s24   ;;  %s4942_s24 = sphi %s4989_s24, %s6561_s24   ;;  %s4938_s23 = sphi %s4987_s23, %s6560_s23   ;;  %s4934_s22 = sphi %s4985_s22, %s6559_s22   ;;  %s4930_s21 = sphi %s4983_s21, %s6558_s21  }
   0x4   : > { %s5008_s27 = sadd.s32 1, %s4942_s24   ;;  %s162_s28 = sadd.s32 1, %s4938_s23 }
   0x5   : > { %s159_s29 = ssub.s32 %s4942_s24, %s5008_s27  ;;  %p172_p0 = scmp.ne.s32.totalorder %s4938_s23, %s4934_s22 }
   0x6   : > { %p160_p1 = scmp.eq.s32.totalorder %s159_s29, 0  ;;  %p173_p2 = scmp.eq.s32.totalorder %s5004_s25, 1 }
   0x7   : > { %p178_p3 = scmp.ne.s32.totalorder %s4934_s22, %s4930_s21  ;;  %p179_p4 = scmp.eq.s32.totalorder %s3640_s26, 1 }
   0x8   : > { %s5019_s30 = scalar_select %p160_p1, %s4938_s23, %s162_s28  }
   0x9   : > { %p5021_p5 = por %p173_p2, %p172_p0  ;;  %p5025_p6 = por %p179_p4, %p178_p3 }
   0xa   : > { %p3643_p7 = scmp.ge.s32.totalorder %s4942_s24, 1  ;;  %p225_p8 = scmp.lt.s32.totalorder %s4942_s24, 3 }
   0xc   : > { %p226_p9 = pnand %p3643_p7, %p225_p8 }
   0xd   : > { %p260_p10 = scmp.lt.s32.totalorder (!%p226_p9), %s5004_s25, 1  ;;  %s257_s26 = sand.u32 (!%p226_p9), 1, %s4934_s22  }
   0xe   : > { %229 = sbr.rel (%p226_p9) target bundleno = 779 (0x30b), region = 44  ;;  %s3644_s28 = sshll.u32 (!%p226_p9), %s257_s26, 8 }
   0xf   : > { %s6359_s10 = scalar_lea.vmem (!%p226_p9), [#allocation3], %s3644_s28  ;;  %s4014_s11 = sshll.u32 (!%p226_p9), %s5004_s25, 12 }
  0x10   : > { %s3566_s12 = sshll.u32 (!%p226_p9), %s6359_s10, 4  ;;  %s6458_s16 = scalar_lea.hbm (!%p226_p9), %s6512_s6, %s4014_s11  ;;  %s6460_s12 = int_to_ptr.vmem [resolvable:$true] %s3566_s12 }
  0x13   : > { %v4702_v0 = vld [vmem:[%s6507_s1 + $0x8] sm:$0xff]   ;;  %v4703_v1 = vld [vmem:[%s6507_s1] sm:$0xff]   ;;  %s5039_s13 = scalar_select %p260_p10, %s5004_s25, 1  ;;  %v4720_v2 = vld [vmem:[%s6509_s3 + $0x138] sm:$0xff]   ;;  %vm406_vm0 = vcmask 261120   ;;  %v4944_v28 = vmov 0  }
  0x14   : > { %4480 = vmatprep.subr.bf16.mxu0 %v4702_v0  ;;  %v4721_v3 = vld [vmem:[%s6509_s3 + $0xf8] sm:$0xff]   ;;  %4072 = vmatprep.subr.bf16.mxu1 %v4720_v2  ;;  %v4722_v4 = vld [vmem:[%s6509_s3 + $0x130] sm:$0xff]   ;;  %v4724_v13 = vld [vmem:[%s6509_s3 + $0x128] sm:$0xff]   ;;  %705 = vst [vmem:[#allocation2 + $0x24] sm:$0xf] %v4944_v28  ;;  %s4882_s25 = scalar_lea.vmem %s6460_s12, 4096 }
  0x15   : > { %4481 = vmatpush3.bf16.msra.mxu0 %v4702_v0  ;;  %s3980_s18 = sshll.u32 %s5039_s13, 7  ;;  %4073 = vmatpush3.bf16.msra.mxu1 %v4721_v3  ;;  %v4723_v5 = vld [vmem:[%s6509_s3 + $0xf0] sm:$0xff]   ;;  %v4725_v14 = vld [vmem:[%s6509_s3 + $0x178] sm:$0xff]   ;;  %v4726_v24 = vld [vmem:[%s6509_s3 + $0xe8] sm:$0xff]   ;;  %696 = vst [vmem:[#allocation2] sm:$0xf] %v4944_v28  ;;  %p4883_p11 = scmp.ne.s32.totalorder %s6460_s12, %s4882_s25 }
  0x16   : > { %4482 = vmatprep.subr.bf16.mxu0 %v4703_v1  ;;  %s5054_s29 = scalar_lea.vmem %s6506_s0, %s3980_s18  ;;  %4074 = vmatprep.subr.bf16.mxu1 %v4722_v4  ;;  %v5103_v25 = vld [vmem:[%s6509_s3 + $0x170] sm:$0xff]   ;;  %v5108_v26 = vld [vmem:[%s6509_s3 + $0x120] sm:$0xff]   ;;  %697 = vst [vmem:[#allocation2 + $0x4] sm:$0xf] %v4944_v28  ;;  %698 = vst [vmem:[#allocation2 + $0x8] sm:$0xf] %v4944_v28 }
  0x17   : > { %v4704_v6 = vld [vmem:[%s5054_s29] sm:$0xff]   ;;  %v4705_v7 = vld [vmem:[%s5054_s29 + $0x8] sm:$0xff]   ;;  %v4706_v8 = vld [vmem:[%s5054_s29 + $0x10] sm:$0xff]   ;;  %699 = vst [vmem:[#allocation2 + $0xc] sm:$0xf] %v4944_v28  ;;  %s3981_s14 = sshll.u32 %s5039_s13, 6  ;;  %p4884_p12 = pnand %p4883_p11, %p5021_p5 }
  0x18   : > { %4484 = vmatprep.mubr.msk.bf16.mxu0 %vm406_vm0, %v4704_v6  ;;  %v4707_v9 = vld [vmem:[%s5054_s29 + $0x18] sm:$0xff]   ;;  %v4708_v10 = vld [vmem:[%s5054_s29 + $0x20] sm:$0xff]   ;;  %v4709_v11 = vld [vmem:[%s5054_s29 + $0x28] sm:$0xff]   ;;  %700 = vst [vmem:[#allocation2 + $0x10] sm:$0xf] %v4944_v28  ;;  %s5246_s17 = scalar_lea.vmem %s6511_s5, %s3981_s14  ;;  %s4945_s18 = smov [#allocation3]  }
  0x19   : > { %4483 = vmatpush3.bf16.msra.mxu0 %v4703_v1  ;;  %4075 = vmatpush3.bf16.msra.mxu1 %v4723_v5  ;;  %v4710_v12 = vld [vmem:[%s5054_s29 + $0x30] sm:$0xff]   ;;  %v4711_v15 = vld [vmem:[%s5054_s29 + $0x38] sm:$0xff]   ;;  %v4712_v16 = vld [vmem:[%s5054_s29 + $0x40] sm:$0xff]   ;;  %701 = vst [vmem:[#allocation2 + $0x14] sm:$0xf] %v4944_v28  ;;  %p4885_p13 = pneg %p4884_p12  ;;  %s4886_s19 = sshll.u32 %s4945_s18, 4  ;;  %s4887_s19 = int_to_ptr.vmem [resolvable:$false] %s4886_s19 }
  0x1a   : > { %4076 = vmatprep.subr.bf16.mxu1 %v4724_v13  ;;  %4516 = vmatprep.subr.bf16.mxu0 %v4725_v14  ;;  %v4713_v17 = vld [vmem:[%s5054_s29 + $0x48] sm:$0xff]   ;;  %v4714_v18 = vld [vmem:[%s5054_s29 + $0x50] sm:$0xff]   ;;  %v4715_v19 = vld [vmem:[%s5054_s29 + $0x58] sm:$0xff]   ;;  %702 = vst [vmem:[#allocation2 + $0x18] sm:$0xf] %v4944_v28  ;;  %s4888_s13 = scalar_lea.vmem %s4887_s19, 8192  ;;  %p4889_p0 = scmp.lt.s32.totalorder %s6460_s12, %s4887_s19 }
  0x1b   : > { %v4716_v20 = vld [vmem:[%s5054_s29 + $0x60] sm:$0xff]   ;;  %v4717_v21 = vld [vmem:[%s5054_s29 + $0x68] sm:$0xff]   ;;  %v4718_v22 = vld [vmem:[%s5054_s29 + $0x70] sm:$0xff]   ;;  %703 = vst [vmem:[#allocation2 + $0x1c] sm:$0xf] %v4944_v28  ;;  %p4890_p1 = scmp.lt.s32.totalorder %s4888_s13, %s4882_s25 }
  0x1c   : > { %4485 = vmatmul.mubr.msk.bf16.vlgmr.msra.gmra.mxu0 %vm406_vm0, %v4705_v7  ;;  %v4719_v23 = vld [vmem:[%s5054_s29 + $0x78] sm:$0xff]   ;;  %v5114_v27 = vld [vmem:[%s6509_s3 + $0xe0] sm:$0xff]   ;;  %704 = vst [vmem:[#allocation2 + $0x20] sm:$0xf] %v4944_v28  ;;  %706 = vst [vmem:[#allocation2 + $0x28] sm:$0xf] %v4944_v28 }
  0x1d   : > { %4488 = vmatprep.mubr.msk.bf16.mxu0 %vm406_vm0, %v4706_v8  ;;  %4517 = vmatpush3.bf16.msra.mxu0 %v4725_v14  ;;  %707 = vst [vmem:[#allocation2 + $0x2c] sm:$0xf] %v4944_v28  ;;  %708 = vst [vmem:[#allocation2 + $0x30] sm:$0xf] %v4944_v28  ;;  %v4731_v29 = vld [vmem:[%s6509_s3 + $0x168] sm:$0xff]   ;;  %v4730_v30 = vld [vmem:[%s6509_s3 + $0x118] sm:$0xff]   ;;  %p4891_p2 = por %p4890_p1, %p4889_p0 }
  0x1e   : > { %4077 = vmatpush3.bf16.msra.mxu1 %v4726_v24  ;;  %4518 = vmatprep.subr.bf16.mxu0 %v5103_v25  ;;  %709 = vst [vmem:[#allocation2 + $0x34] sm:$0xf] %v4944_v28  ;;  %710 = vst [vmem:[#allocation2 + $0x38] sm:$0xf] %v4944_v28  ;;  %v4732_v31 = vld [vmem:[%s6509_s3 + $0xd8] sm:$0xff]   ;;  %v4734_v32 = vld [vmem:[%s6509_s3 + $0x160] sm:$0xff]  }
  0x1f   : > { %711 = vst [vmem:[#allocation2 + $0x3c] sm:$0xf] %v4944_v28  ;;  %712 = vst [vmem:[#allocation2 + $0x40] sm:$0xf] %v4944_v28  ;;  %4078 = vmatprep.subr.bf16.mxu1 %v5108_v26  ;;  %v4733_v33 = vld [vmem:[%s6509_s3 + $0x110] sm:$0xff]   ;;  %v4737_v35 = vld [vmem:[%s6509_s3 + $0x158] sm:$0xff]   ;;  %p4892_p3 = pnand %p4891_p2, %p4885_p13 }
  0x20   : > { %713 = vst [vmem:[#allocation2 + $0x44] sm:$0xf] %v4944_v28  ;;  %714 = vst [vmem:[#allocation2 + $0x48] sm:$0xf] %v4944_v28  ;;  %v4735_v34 = vld [vmem:[%s6509_s3 + $0xd0] sm:$0xff]   ;;  %v4736_v36 = vld [vmem:[%s6509_s3 + $0x108] sm:$0xff]  }
  0x21   : > { %715 = vst [vmem:[#allocation2 + $0x4c] sm:$0xf] %v4944_v28  ;;  %716 = vst [vmem:[#allocation2 + $0x50] sm:$0xf] %v4944_v28  ;;  %4519 = vmatpush3.bf16.msra.mxu0 %v5103_v25  ;;  %v4738_v37 = vld [vmem:[%s6509_s3 + $0xc8] sm:$0xff]   ;;  %v4740_v38 = vld [vmem:[%s6509_s3 + $0x150] sm:$0xff]  }
  0x22   : > { %717 = vst [vmem:[#allocation2 + $0x54] sm:$0xf] %v4944_v28  ;;  %718 = vst [vmem:[#allocation2 + $0x58] sm:$0xf] %v4944_v28  ;;  %4079 = vmatpush3.bf16.msra.mxu1 %v5114_v27  ;;  %4520 = vmatprep.subr.bf16.mxu0 %v4731_v29  ;;  %v4739_v39 = vld [vmem:[%s6509_s3 + $0x100] sm:$0xff]   ;;  %v4748_v41 = vld [vmem:[%s6509_s3 + $0x148] sm:$0xff]  }
  0x23   : > { %719 = vst [vmem:[#allocation2 + $0x5c] sm:$0xf] %v4944_v28  ;;  %720 = vst [vmem:[#allocation2 + $0x60] sm:$0xf] %v4944_v28  ;;  %4080 = vmatprep.subr.bf16.mxu1 %v4730_v30  ;;  %v4741_v40 = vld [vmem:[%s6509_s3 + $0xc0] sm:$0xff]   ;;  %v5236_v43 = vld [vmem:[%s6509_s3 + $0xb8] sm:$0xff]  }
  0x24   : > { %4489 = vmatmul.mubr.msk.bf16.gmra.mxu0 %vm406_vm0, %v4707_v9  ;;  %721 = vst [vmem:[#allocation2 + $0x64] sm:$0xf] %v4944_v28  ;;  %722 = vst [vmem:[#allocation2 + $0x68] sm:$0xf] %v4944_v28  ;;  %v4753_v42 = vld [vmem:[%s6509_s3 + $0x140] sm:$0xff]   ;;  %v4781_v44 = vld [vmem:[%s6509_s3 + $0x78] sm:$0xff]  }
  0x25   : > { %4492 = vmatprep.mubr.msk.bf16.mxu0 %vm406_vm0, %v4708_v10  ;;  %723 = vst [vmem:[#allocation2 + $0x6c] sm:$0xf] %v4944_v28  ;;  %724 = vst [vmem:[#allocation2 + $0x70] sm:$0xf] %v4944_v28  ;;  %4521 = vmatpush3.bf16.msra.mxu0 %v4731_v29  ;;  %v4016_v45 = vld [vmem:[%s5246_s17] sm:$0xff]   ;;  %v5258_v52 = vld [vmem:[%s5246_s17 + $0x8] sm:$0xff]  }
  0x26   : > { %725 = vst [vmem:[#allocation2 + $0x74] sm:$0xf] %v4944_v28  ;;  %726 = vst [vmem:[#allocation2 + $0x78] sm:$0xf] %v4944_v28  ;;  %4081 = vmatpush3.bf16.msra.mxu1 %v4732_v31  ;;  %4522 = vmatprep.subr.bf16.mxu0 %v4734_v32  ;;  %v5252_v46 = vld [vmem:[%s6508_s2] ss:$0 sm:$0xff]  ;;  %v4017_v47 = vunpack.c.l.bf16 %v4016_v45  ;;  %v4018_v59 = vunpack.c.h.bf16 %v4016_v45  ;;  %v4021_v61 = vunpack.c.l.bf16 %v5258_v52  ;;  %v4022_v5 = vunpack.c.h.bf16 %v5258_v52 }
  0x27   : > { %727 = vst [vmem:[#allocation2 + $0x7c] sm:$0xf] %v4944_v28  ;;  %728 = vst [vmem:[#allocation2 + $0x80] sm:$0xf] %v4944_v28  ;;  %4082 = vmatprep.subr.bf16.mxu1 %v4733_v33  ;;  %v913_v48 = vld [vmem:[#allocation2] sm:$0x8] }
  0x28   : > { %729 = vst [vmem:[#allocation2 + $0x84] sm:$0xf] %v4944_v28  ;;  %730 = vst [vmem:[#allocation2 + $0x88] sm:$0xf] %v4944_v28  ;;  %v5254_v50 = vld [vmem:[#allocation2 + $0x8] sm:$0xf] }
  0x29   : > { %731 = vst [vmem:[#allocation2 + $0x8c] sm:$0xf] %v4944_v28  ;;  %732 = vst [vmem:[#allocation2 + $0x90] sm:$0xf] %v4944_v28  ;;  %4523 = vmatpush3.bf16.msra.mxu0 %v4734_v32  ;;  %v5260_v53 = vld [vmem:[#allocation2 + $0x4] sm:$0xf]  ;;  %v3717_v54 = vcombine.low %v5254_v50, %v5254_v50 }
  0x2a   : > { %733 = vst [vmem:[#allocation2 + $0x94] sm:$0xf] %v4944_v28  ;;  %734 = vst [vmem:[#allocation2 + $0x98] sm:$0xf] %v4944_v28  ;;  %4083 = vmatpush3.bf16.msra.mxu1 %v4735_v34  ;;  %4524 = vmatprep.subr.bf16.mxu0 %v4737_v35  ;;  %v3716_v56 = vcombine.low %v913_v48, %v5260_v53  ;;  %v5268_v62 = vld [vmem:[%s5246_s17 + $0x10] sm:$0xff]   ;;  %v5272_v2 = vld [vmem:[%s5246_s17 + $0x18] sm:$0xff]  }
  0x2b   : > { %735 = vst [vmem:[#allocation2 + $0x9c] sm:$0xf] %v4944_v28  ;;  %736 = vst [vmem:[#allocation2 + $0xa0] sm:$0xf] %v4944_v28  ;;  %4084 = vmatprep.subr.bf16.mxu1 %v4736_v36  ;;  %v1121_v3 = vshrl.u32 %v3717_v54, 16  ;;  %v1124_v8 = vshll.u32 %v3717_v54, 16 }
  0x2c   : > { %4493 = vmatmul.mubr.msk.bf16.gmra.mxu0 %vm406_vm0, %v4709_v11  ;;  %737 = vst [vmem:[#allocation2 + $0xa4] sm:$0xf] %v4944_v28  ;;  %738 = vst [vmem:[#allocation2 + $0xa8] sm:$0xf] %v4944_v28  ;;  %v1113_v6 = vshrl.u32 %v3716_v56, 16  ;;  %v1116_v7 = vshll.u32 %v3716_v56, 16 }
  0x2d   : > { %4496 = vmatprep.mubr.msk.bf16.mxu0 %vm406_vm0, %v4710_v12  ;;  %739 = vst [vmem:[#allocation2 + $0xac] sm:$0xf] %v4944_v28  ;;  %740 = vst [vmem:[#allocation2 + $0xb0] sm:$0xf] %v4944_v28  ;;  %4525 = vmatpush3.bf16.msra.mxu0 %v4737_v35  ;;  %v4025_v12 = vunpack.c.l.bf16 %v5268_v62  ;;  %v5289_v24 = vld [vmem:[%s5246_s17 + $0x28] sm:$0xff]   ;;  %v5297_v29 = vrot.slane %v1124_v8, 4 }
  0x2e   : > { %741 = vst [vmem:[#allocation2 + $0xb4] sm:$0xf] %v4944_v28  ;;  %742 = vst [vmem:[#allocation2 + $0xb8] sm:$0xf] %v4944_v28  ;;  %4085 = vmatpush3.bf16.msra.mxu1 %v4738_v37  ;;  %4526 = vmatprep.subr.bf16.mxu0 %v4740_v38  ;;  %v5293_v27 = vrot.slane %v1113_v6, 3  ;;  %v5300_v30 = vld [vmem:[%s5246_s17 + $0x30] sm:$0xff]  }
  0x2f   : > { %743 = vst [vmem:[#allocation2 + $0xbc] sm:$0xf] %v4944_v28  ;;  %744 = vst [vmem:[#allocation2 + $0xc0] sm:$0xf] %v4944_v28  ;;  %4086 = vmatprep.subr.bf16.mxu1 %v4739_v39  ;;  %v5308_v36 = vld [vmem:[%s5246_s17 + $0x38] sm:$0xff]  }
  0x30   : > { %745 = vst [vmem:[#allocation2 + $0xc4] sm:$0xf] %v4944_v28  ;;  %746 = vst [vmem:[#allocation2 + $0xc8] sm:$0xf] %v4944_v28  ;;  %v919_v39 = vld [vmem:[#allocation2 + $0x20] sm:$0x8]  ;;  %v4045_v56 = vunpack.c.l.bf16 %v5308_v36 }
  0x31   : > { %747 = vst [vmem:[#allocation2 + $0xcc] sm:$0xf] %v4944_v28  ;;  %748 = vst [vmem:[#allocation2 + $0xd0] sm:$0xf] %v4944_v28  ;;  %4527 = vmatpush3.bf16.msra.mxu0 %v4740_v38  ;;  %vm1111_vm1 = vsmask.f32 4352 }
  0x32   : > { %749 = vst [vmem:[#allocation2 + $0xd4] sm:$0xf] %v4944_v28  ;;  %750 = vst [vmem:[#allocation2 + $0xd8] sm:$0xf] %v4944_v28  ;;  %4087 = vmatpush3.bf16.msra.mxu1 %v4741_v40  ;;  %4528 = vmatprep.subr.bf16.mxu0 %v4748_v41  ;;  %vm2699_vm2 = vsmask.f32 7424 }
  0x33   : > { %751 = vst [vmem:[#allocation2 + $0xdc] sm:$0xf] %v4944_v28  ;;  %752 = vst [vmem:[#allocation2 + $0xe0] sm:$0xf] %v4944_v28  ;;  %4564 = vmatprep.subr.bf16.mxu1 %v5236_v43 }
  0x34   : > { %4497 = vmatmul.mubr.msk.bf16.gmra.mxu0 %vm406_vm0, %v4711_v15  ;;  %753 = vst [vmem:[#allocation2 + $0xe4] sm:$0xf] %v4944_v28  ;;  %754 = vst [vmem:[#allocation2 + $0xe8] sm:$0xf] %v4944_v28  ;;  %v4026_v15 = vunpack.c.h.bf16 %v5268_v62 }
  0x35   : > { %4500 = vmatprep.mubr.msk.bf16.mxu0 %vm406_vm0, %v4712_v16  ;;  %755 = vst [vmem:[#allocation2 + $0xec] sm:$0xf] %v4944_v28  ;;  %756 = vst [vmem:[#allocation2 + $0xf0] sm:$0xf] %v4944_v28  ;;  %4529 = vmatpush3.bf16.msra.mxu0 %v4748_v41  ;;  %v4029_v16 = vunpack.c.l.bf16 %v5272_v2  ;;  %v4037_v41 = vunpack.c.l.bf16 %v5289_v24 }
  0x36   : > { %757 = vst [vmem:[#allocation2 + $0xf4] sm:$0xf] %v4944_v28  ;;  %758 = vst [vmem:[#allocation2 + $0xf8] sm:$0xf] %v4944_v28  ;;  %4530 = vmatprep.subr.bf16.mxu0 %v4753_v42 }
  0x37   : > { %759 = vst [vmem:[#allocation2 + $0xfc] sm:$0xf] %v4944_v28  ;;  %760 = vst [vmem:[#allocation2 + $0x100] sm:$0xf] %v4944_v28 }
  0x38   : > { %761 = vst [vmem:[#allocation2 + $0x104] sm:$0xf] %v4944_v28  ;;  %762 = vst [vmem:[#allocation2 + $0x108] sm:$0xf] %v4944_v28 }
  0x39   : > { %763 = vst [vmem:[#allocation2 + $0x10c] sm:$0xf] %v4944_v28  ;;  %764 = vst [vmem:[#allocation2 + $0x110] sm:$0xf] %v4944_v28  ;;  %4531 = vmatpush3.bf16.msra.mxu0 %v4753_v42  ;;  %v4038_v42 = vunpack.c.h.bf16 %v5289_v24 }
  0x3a   : > { %765 = vst [vmem:[#allocation2 + $0x114] sm:$0xf] %v4944_v28  ;;  %766 = vst [vmem:[#allocation2 + $0x118] sm:$0xf] %v4944_v28  ;;  %4208 = vmatprep.subr.bf16.mxu0 %v4781_v44 }
  0x3b   : > { %767 = vst [vmem:[#allocation2 + $0x11c] sm:$0xf] %v4944_v28  ;;  %v5295_v28 = vrot.slane %v1116_v7, 4 }
  0x3c   : > { %4501 = vmatmul.mubr.msk.bf16.gmra.mxu0 %vm406_vm0, %v4713_v17  ;;  %v3752_v17 = vcombine.low %v5260_v53, %v5254_v50 }
  0x3d   : > { %4504 = vmatprep.mubr.msk.bf16.mxu0 %vm406_vm0, %v4714_v18  ;;  %v4030_v18 = vunpack.c.h.bf16 %v5272_v2  ;;  %v4791_v2 = vld [vmem:[%s6509_s3 + $0x68] sm:$0xff]  }
  0x40   : > { %v964_v13 = vld [vmem:[#allocation2 + $0x110] sm:$0x8] }
  0x41   : > { %v5291_v25 = vld [vmem:[#allocation2 + $0x114] sm:$0xf]  ;;  %v5310_v37 = vld [vmem:[#allocation2 + $0x118] sm:$0xf] }
  0x42   : > { %v5303_v31 = vcombine.low %v964_v13, %v5291_v25  ;;  %v5317_v44 = vcombine.low %v5310_v37, %v5310_v37 }
  0x44   : > { %4505 = vmatmul.mubr.msk.bf16.gmra.mxu0 %vm406_vm0, %v4715_v19  ;;  %v5283_v19 = vld [vmem:[%s5246_s17 + $0x20] sm:$0xff]   ;;  %s6466_s17 = scalar_lea.sflag [#allocation4], %s257_s26 }
  0x45   : > { %4508 = vmatprep.mubr.msk.bf16.mxu0 %vm406_vm0, %v4716_v20  ;;  %v4033_v35 = vunpack.c.l.bf16 %v5283_v19  ;;  %v4034_v40 = vunpack.c.h.bf16 %v5283_v19 }
  0x4c   : > { %4509 = vmatmul.mubr.msk.bf16.gmra.mxu0 %vm406_vm0, %v4717_v21 }
  0x4d   : > { %4512 = vmatprep.mubr.msk.bf16.mxu0 %vm406_vm0, %v4718_v22 }
  0x54   : > { %4513 = vmatmul.mubr.msk.bf16.gmra.mxu0 %vm406_vm0, %v4719_v23  ;;  %v5286_v23 = vrot.slane %v1121_v3, 3 }
  0xdc   : > { %v4486_v49 = vpop.f32.mrf.mxu0 }
  0xdd   : > { %v498_v51 = vadd.f32 %v4486_v49, %v5252_v46  ;;  %v4041_v49 = vunpack.c.l.bf16 %v5300_v30 }
  0xde   : > { %v489_v55 = vpop.f32.mrf.mxu0 }
  0xdf   : > { %v650_v57 = vadd.f32 %v4017_v47, %v498_v51  ;;  %v490_v58 = vadd.f32 %v5252_v46, %v489_v55  ;;  %v4042_v55 = vunpack.c.h.bf16 %v5300_v30  ;;  %v4816_v30 = vld [vmem:[%s6509_s3] sm:$0xff]  }
  0xe0   : > { %v4487_v60 = vpop.f32.mrf.mxu0 }
  0xe1   : > { %v3984_v63 = vpack.c.bf16 %v650_v57, %v650_v57  ;;  %v648_v0 = vadd.f32 %v4017_v47, %v490_v58  ;;  %v501_v1 = vadd.f32 %v4487_v60, %v5252_v46  ;;  %v934_v58 = vld [vmem:[#allocation2 + $0x70] sm:$0x8] }
  0xe2   : > { %v492_v4 = vpop.f32.mrf.mxu0 }
  0xe3   : > { %883 = vst [vmem:[#allocation2 + $0x24] sm:$0xf] %v3984_v63  ;;  %v3982_v9 = vpack.c.bf16 %v648_v0, %v648_v0  ;;  %v651_v10 = vadd.f32 %v4018_v59, %v501_v1  ;;  %v493_v11 = vadd.f32 %v5252_v46, %v492_v4  ;;  %v916_v0 = vld [vmem:[#allocation2 + $0x10] sm:$0x8] }
  0xe4   : > { %v4490_v14 = vpop.f32.mrf.mxu0 }
  0xe5   : > { %881 = vst [vmem:[#allocation2 + $0x14] sm:$0xf] %v3982_v9  ;;  %v3985_v20 = vpack.c.bf16 %v651_v10, %v651_v10  ;;  %v649_v21 = vadd.f32 %v4018_v59, %v493_v11  ;;  %v514_v22 = vadd.f32 %v4490_v14, %v5252_v46 }
  0xe6   : > { %v505_v26 = vpop.f32.mrf.mxu0 }
  0xe7   : > { %884 = vst [vmem:[#allocation2 + $0x28] sm:$0xf] %v3985_v20  ;;  %v3983_v32 = vpack.c.bf16 %v649_v21, %v649_v21  ;;  %v654_v33 = vadd.f32 %v4021_v61, %v514_v22  ;;  %v506_v34 = vadd.f32 %v5252_v46, %v505_v26 }
  0xe8   : > { %v4491_v38 = vpop.f32.mrf.mxu0 }
  0xe9   : > { %882 = vst [vmem:[#allocation2 + $0x18] sm:$0xf] %v3983_v32  ;;  %v3988_v45 = vpack.c.bf16 %v654_v33, %v654_v33  ;;  %v652_v47 = vadd.f32 %v4021_v61, %v506_v34  ;;  %v517_v48 = vadd.f32 %v4491_v38, %v5252_v46 }
  0xea   : > { %v508_v51 = vpop.f32.mrf.mxu0  ;;  %v920_v54 = vld [vmem:[#allocation2 + $0x24] sm:$0xf] }
  0xeb   : > { %887 = vst [vmem:[#allocation2 + $0x44] sm:$0xf] %v3988_v45  ;;  %v3986_v59 = vpack.c.bf16 %v652_v47, %v652_v47  ;;  %v655_v60 = vadd.f32 %v4022_v5, %v517_v48  ;;  %v509_v61 = vadd.f32 %v5252_v46, %v508_v51  ;;  %v3720_v63 = vcombine.low %v919_v39, %v920_v54 }
  0xec   : > { %v4494_v1 = vpop.f32.mrf.mxu0  ;;  %v917_v3 = vld [vmem:[#allocation2 + $0x14] sm:$0xf] }
  0xed   : > { %885 = vst [vmem:[#allocation2 + $0x34] sm:$0xf] %v3986_v59  ;;  %v3989_v9 = vpack.c.bf16 %v655_v60, %v655_v60  ;;  %v653_v10 = vadd.f32 %v4022_v5, %v509_v61  ;;  %v530_v11 = vadd.f32 %v4494_v1, %v5252_v46  ;;  %v1147_v13 = vshrl.u32 %v3720_v63, 16 }
  0xee   : > { %v521_v14 = vpop.f32.mrf.mxu0  ;;  %v921_v20 = vld [vmem:[#allocation2 + $0x28] sm:$0xf]  ;;  %v1150_v21 = vshll.u32 %v3720_v63, 16  ;;  %v3718_v22 = vcombine.low %v916_v0, %v917_v3  ;;  %v925_v0 = vld [vmem:[#allocation2 + $0x40] sm:$0x8] }
  0xef   : > { %888 = vst [vmem:[#allocation2 + $0x48] sm:$0xf] %v3989_v9  ;;  %v3987_v33 = vpack.c.bf16 %v653_v10, %v653_v10  ;;  %v658_v34 = vadd.f32 %v4025_v12, %v530_v11  ;;  %v522_v52 = vadd.f32 %v5252_v46, %v521_v14  ;;  %v5343_v5 = vcombine.low %v921_v20, %v921_v20 }
  0xf0   : > { %v4495_v38 = vpop.f32.mrf.mxu0  ;;  %v5345_v39 = vcombine.low %v920_v54, %v921_v20  ;;  %v918_v45 = vld [vmem:[#allocation2 + $0x18] sm:$0xf]  ;;  %v1130_v47 = vshrl.u32 %v3718_v22, 16  ;;  %v1133_v48 = vshll.u32 %v3718_v22, 16  ;;  %v5347_v51 = vrot.slane %v1147_v13, 3 }
  0xf1   : > { %886 = vst [vmem:[#allocation2 + $0x38] sm:$0xf] %v3987_v33  ;;  %v3992_v59 = vpack.c.bf16 %v658_v34, %v658_v34  ;;  %v656_v60 = vadd.f32 %v4025_v12, %v522_v52  ;;  %v533_v61 = vadd.f32 %v4495_v38, %v5252_v46  ;;  %v1155_v63 = vshrl.u32 %v5343_v5, 16  ;;  %v4761_v38 = vld [vmem:[%s6509_s3 + $0xb0] sm:$0xff]  }
  0xf2   : > { %v1158_v1 = vshll.u32 %v5343_v5, 16  ;;  %4532 = vmatprep.mubr.bf16.mxu0 %v5345_v39  ;;  %v524_v54 = vpop.f32.mrf.mxu0  ;;  %v3719_v9 = vcombine.low %v918_v45, %v918_v45  ;;  %v1132_v10 = vrot.slane %v1130_v47, 3  ;;  %v1135_v11 = vrot.slane %v1133_v48, 4  ;;  %v926_v13 = vld [vmem:[#allocation2 + $0x44] sm:$0xf] }
  0xf3   : > { %891 = vst [vmem:[#allocation2 + $0x64] sm:$0xf] %v3992_v59  ;;  %v3990_v14 = vpack.c.bf16 %v656_v60, %v656_v60  ;;  %v659_v12 = vadd.f32 %v4026_v15, %v533_v61  ;;  %v525_v20 = vadd.f32 %v5252_v46, %v524_v54  ;;  %v5358_v22 = vcombine.low %v917_v3, %v918_v45 }
  0xf4   : > { %v1138_v33 = vshrl.u32 %v3719_v9, 16  ;;  %v1141_v34 = vshll.u32 %v3719_v9, 16  ;;  %v4498_v52 = vpop.f32.mrf.mxu0  ;;  %v5360_v5 = vcombine.low %v925_v0, %v926_v13  ;;  %v1136_v47 = vor.u32 %v1135_v11, %v1132_v10  ;;  %v923_v45 = vld [vmem:[#allocation2 + $0x34] sm:$0xf] }
  0xf5   : > { %889 = vst [vmem:[#allocation2 + $0x54] sm:$0xf] %v3990_v14  ;;  %v3993_v48 = vpack.c.bf16 %v659_v12, %v659_v12  ;;  %v657_v59 = vadd.f32 %v4026_v15, %v525_v20  ;;  %1745 = vmatprep.mubr.bf16.mxu1 %v5358_v22  ;;  %v546_v3 = vadd.f32 %v4498_v52, %v5252_v46  ;;  %v5369_v60 = vrot.slane %v1150_v21, 4  ;;  %v4774_v20 = vld [vmem:[%s6509_s3 + $0xa8] sm:$0xff]  }
  0xf6   : > { %v1140_v61 = vrot.slane %v1138_v33, 3  ;;  %v1143_v0 = vrot.slane %v1141_v34, 4  ;;  %1746 = vmatmul.mubr.bf16.vlgmr.msra.gmra.mxu1 %v3752_v17  ;;  %v537_v54 = vpop.f32.mrf.mxu0  ;;  %v927_v9 = vld [vmem:[#allocation2 + $0x48] sm:$0xf]  ;;  %v1181_v10 = vshrl.u32 %v5360_v5, 16  ;;  %v1184_v62 = vshll.u32 %v5360_v5, 16 }
  0xf7   : > { %892 = vst [vmem:[#allocation2 + $0x68] sm:$0xf] %v3993_v48  ;;  %v3991_v15 = vpack.c.bf16 %v657_v59, %v657_v59  ;;  %v662_v11 = vadd.f32 %v4029_v16, %v546_v3  ;;  %4565 = vmatpush3.bf16.msra.mxu1 %v5236_v43  ;;  %1753 = vmatprep.mubr.bf16.mxu1 %v5345_v39  ;;  %v1157_v14 = vrot.slane %v1155_v63, 3  ;;  %v4782_v48 = vld [vmem:[%s6509_s3 + $0x38] sm:$0xff]   ;;  %v922_v59 = vld [vmem:[#allocation2 + $0x30] sm:$0x8] }
  0xf8   : > { %v538_v21 = vadd.f32 %v5252_v46, %v537_v54  ;;  %v4499_v50 = vpop.f32.mrf.mxu0  ;;  %v924_v53 = vld [vmem:[#allocation2 + $0x38] sm:$0xf]  ;;  %v5381_v17 = vcombine.low %v927_v9, %v927_v9  ;;  %v5383_v12 = vcombine.low %v926_v13, %v927_v9  ;;  %4566 = vmatprep.subr.bf16.mxu1 %v4761_v38  ;;  %v1144_v33 = vor.u32 %v1143_v0, %v1140_v61  ;;  %v931_v13 = vld [vmem:[#allocation2 + $0x60] sm:$0x8] }
  0xf9   : > { %v1153_v43 = vor.u32 %v5369_v60, %v5347_v51  ;;  %890 = vst [vmem:[#allocation2 + $0x58] sm:$0xf] %v3991_v15  ;;  %v3996_v34 = vpack.c.bf16 %v662_v11, %v662_v11  ;;  %v549_v52 = vadd.f32 %v4499_v50, %v5252_v46  ;;  %v5393_v5 = vcombine.low %v923_v45, %v924_v53  ;;  %v928_v60 = vld [vmem:[#allocation2 + $0x50] sm:$0x8] }
  0xfa   : > { %v660_v63 = vadd.f32 %v4029_v16, %v538_v21  ;;  %v540_v3 = vpop.f32.mrf.mxu0  ;;  %v1189_v61 = vshrl.u32 %v5381_v17, 16  ;;  %v1192_v51 = vshll.u32 %v5381_v17, 16  ;;  %v4783_v16 = vld [vmem:[%s6509_s3 + $0x70] sm:$0xff]   ;;  %v5404_v0 = vsel %vm1111_vm1, %v1136_v47, %v1144_v33  ;;  %v932_v21 = vld [vmem:[#allocation2 + $0x64] sm:$0xf] }
  0xfb   : > { %v1160_v54 = vrot.slane %v1158_v1, 4  ;;  %895 = vst [vmem:[#allocation2 + $0x84] sm:$0xf] %v3996_v34  ;;  %v663_v15 = vadd.f32 %v4030_v18, %v549_v52  ;;  %v541_v11 = vadd.f32 %v5252_v46, %v540_v3  ;;  %4533 = vmatmul.mubr.bf16.vlgmr.msra.gmra.mxu0 %v5393_v5  ;;  %4567 = vmatpush3.bf16.msra.mxu1 %v4761_v38  ;;  %v5410_v50 = vrot.slane %v1181_v10, 3  ;;  %v4792_v1 = vld [vmem:[%s6509_s3 + $0xa0] sm:$0xff]  }
  0xfc   : > { %v3994_v9 = vpack.c.bf16 %v660_v63, %v660_v63  ;;  %v4502_v26 = vpop.f32.mrf.mxu0  ;;  %4536 = vmatprep.mubr.bf16.mxu0 %v5383_v12  ;;  %v929_v32 = vld [vmem:[#allocation2 + $0x54] sm:$0xf]  ;;  %v5413_v47 = vcombine.low %v931_v13, %v932_v21  ;;  %4568 = vmatprep.subr.bf16.mxu1 %v4774_v20  ;;  %v5418_v34 = vcombine.low %v922_v59, %v923_v45  ;;  %v5420_v63 = vrot.slane %v1184_v62, 4  ;;  %v943_v62 = vld [vmem:[#allocation2 + $0xa0] sm:$0x8] }
  0xfd   : > { %v1161_v33 = vor.u32 %v1160_v54, %v1157_v14  ;;  %v3997_v38 = vpack.c.bf16 %v663_v15, %v663_v15  ;;  %v661_v10 = vadd.f32 %v4030_v18, %v541_v11  ;;  %v562_v52 = vadd.f32 %v4502_v26, %v5252_v46  ;;  %4209 = vmatpush3.bf16.msra.mxu0 %v4782_v48  ;;  %v4784_v13 = vld [vmem:[%s6509_s3 + $0x30] sm:$0xff]   ;;  %v5449_v54 = vld [vmem:[%s6509_s3 + $0x98] sm:$0xff]  }
  0xfe   : > { %893 = vst [vmem:[#allocation2 + $0x74] sm:$0xf] %v3994_v9  ;;  %v5425_v3 = vcombine.low %v928_v60, %v929_v32  ;;  %1754 = vmatmul.mubr.bf16.gmra.mxu1 %v5358_v22  ;;  %v553_v45 = vpop.f32.mrf.mxu0  ;;  %v933_v14 = vld [vmem:[#allocation2 + $0x68] sm:$0xf]  ;;  %4210 = vmatprep.subr.bf16.mxu0 %v4783_v16  ;;  %v5439_v26 = vcombine.low %v924_v53, %v924_v53 }
  0xff   : > { %v5437_v18 = vsel %vm1111_vm1, %v1153_v43, %v1161_v33  ;;  %896 = vst [vmem:[#allocation2 + $0x88] sm:$0xf] %v3997_v38  ;;  %v3995_v48 = vpack.c.bf16 %v661_v10, %v661_v10  ;;  %v666_v22 = vadd.f32 %v4033_v35, %v562_v52  ;;  %1761 = vmatprep.mubr.bf16.mxu1 %v5393_v5  ;;  %v1164_v33 = vshrl.u32 %v5418_v34, 16 }
 0x100   : > { %v554_v60 = vadd.f32 %v5252_v46, %v553_v45  ;;  %v1198_v16 = vshrl.u32 %v5425_v3, 16  ;;  %4569 = vmatpush3.bf16.msra.mxu1 %v4774_v20  ;;  %v4503_v43 = vpop.f32.mrf.mxu0  ;;  %v930_v53 = vld [vmem:[#allocation2 + $0x58] sm:$0xf]  ;;  %v1201_v9 = vshll.u32 %v5425_v3, 16  ;;  %v5452_v15 = vcombine.low %v933_v14, %v933_v14  ;;  %v937_v45 = vld [vmem:[#allocation2 + $0x80] sm:$0x8] }
 0x101   : > { %v5454_v11 = vcombine.low %v932_v21, %v933_v14  ;;  %4570 = vmatprep.subr.bf16.mxu1 %v4792_v1  ;;  %894 = vst [vmem:[#allocation2 + $0x78] sm:$0xf] %v3995_v48  ;;  %v4000_v38 = vpack.c.bf16 %v666_v22, %v666_v22  ;;  %v565_v10 = vadd.f32 %v4503_v43, %v5252_v46  ;;  %v4793_v48 = vld [vmem:[%s6509_s3 + $0x28] sm:$0xff]  }
 0x102   : > { %v664_v20 = vadd.f32 %v4033_v35, %v554_v60  ;;  %v5460_v52 = vcombine.low %v930_v53, %v930_v53  ;;  %4211 = vmatpush3.bf16.msra.mxu0 %v4784_v13  ;;  %v556_v7 = vpop.f32.mrf.mxu0  ;;  %v5462_v6 = vcombine.low %v929_v32, %v930_v53  ;;  %v5469_v35 = vrot.slane %v1164_v33, 3  ;;  %v938_v43 = vld [vmem:[#allocation2 + $0x84] sm:$0xf] }
 0x103   : > { %4212 = vmatprep.subr.bf16.mxu0 %v4791_v2  ;;  %899 = vst [vmem:[#allocation2 + $0xa4] sm:$0xf] %v4000_v38  ;;  %v667_v13 = vadd.f32 %v4034_v40, %v565_v10  ;;  %v557_v32 = vadd.f32 %v5252_v46, %v556_v7  ;;  %v4794_v2 = vld [vmem:[%s6509_s3 + $0x60] sm:$0xff]   ;;  %v1167_v7 = vshll.u32 %v5418_v34, 16  ;;  %v1172_v10 = vshrl.u32 %v5439_v26, 16  ;;  %v4817_v34 = vld [vmem:[%s6509_s3 + $0x90] sm:$0xff]  }
 0x104   : > { %v3998_v22 = vpack.c.bf16 %v664_v20, %v664_v20  ;;  %v1206_v60 = vshrl.u32 %v5460_v52, 16  ;;  %4571 = vmatpush3.bf16.msra.mxu1 %v4792_v1  ;;  %4537 = vmatmul.mubr.bf16.gmra.mxu0 %v5462_v6  ;;  %v4506_v33 = vpop.f32.mrf.mxu0  ;;  %v5480_v20 = vcombine.low %v937_v45, %v938_v43  ;;  %v4795_v45 = vld [vmem:[%s6509_s3 + $0x20] sm:$0xff]  }
 0x105   : > { %v935_v38 = vld [vmem:[#allocation2 + $0x74] sm:$0xf]  ;;  %4572 = vmatprep.subr.bf16.mxu1 %v5449_v54  ;;  %v4001_v1 = vpack.c.bf16 %v667_v13, %v667_v13  ;;  %v665_v57 = vadd.f32 %v4034_v40, %v557_v32  ;;  %v578_v8 = vadd.f32 %v4506_v33, %v5252_v46  ;;  %4540 = vmatprep.mubr.bf16.mxu0 %v5454_v11  ;;  %v5500_v32 = vrot.slane %v1167_v7, 4 }
 0x106   : > { %897 = vst [vmem:[#allocation2 + $0x94] sm:$0xf] %v3998_v22  ;;  %v5489_v14 = vcombine.low %v934_v58, %v935_v38  ;;  %1762 = vmatmul.mubr.bf16.gmra.mxu1 %v5345_v39  ;;  %v569_v22 = vpop.f32.mrf.mxu0  ;;  %v939_v13 = vld [vmem:[#allocation2 + $0x88] sm:$0xf]  ;;  %4213 = vmatpush3.bf16.msra.mxu0 %v4793_v48  ;;  %v5502_v58 = vrot.slane %v1172_v10, 3  ;;  %v4802_v48 = vld [vmem:[%s6509_s3 + $0x58] sm:$0xff]  }
 0x107   : > { %900 = vst [vmem:[#allocation2 + $0xa8] sm:$0xf] %v4001_v1  ;;  %v3999_v33 = vpack.c.bf16 %v665_v57, %v665_v57  ;;  %v670_v21 = vadd.f32 %v4037_v41, %v578_v8  ;;  %1769 = vmatprep.mubr.bf16.mxu1 %v5383_v12  ;;  %v570_v39 = vadd.f32 %v5252_v46, %v569_v22 }
 0x108   : > { %4214 = vmatprep.subr.bf16.mxu0 %v4794_v2  ;;  %v4507_v7 = vpop.f32.mrf.mxu0  ;;  %v936_v40 = vld [vmem:[#allocation2 + $0x78] sm:$0xf]  ;;  %v5513_v1 = vcombine.low %v939_v13, %v939_v13  ;;  %v5515_v57 = vcombine.low %v938_v43, %v939_v13  ;;  %4573 = vmatpush3.bf16.msra.mxu1 %v5449_v54  ;;  %v1170_v8 = vor.u32 %v5500_v32, %v5469_v35  ;;  %v940_v13 = vld [vmem:[#allocation2 + $0x90] sm:$0x8] }
 0x109   : > { %898 = vst [vmem:[#allocation2 + $0x98] sm:$0xf] %v3999_v33  ;;  %v4004_v22 = vpack.c.bf16 %v670_v21, %v670_v21  ;;  %v668_v2 = vadd.f32 %v4037_v41, %v570_v39  ;;  %v581_v19 = vadd.f32 %v4507_v7, %v5252_v46  ;;  %v5523_v59 = vcombine.low %v936_v40, %v936_v40  ;;  %v4803_v21 = vld [vmem:[%s6509_s3 + $0x18] sm:$0xff]  }
 0x10a   : > { %4574 = vmatprep.subr.bf16.mxu1 %v4817_v34  ;;  %v572_v10 = vpop.f32.mrf.mxu0  ;;  %v5525_v53 = vcombine.low %v935_v38, %v936_v40  ;;  %4215 = vmatpush3.bf16.msra.mxu0 %v4795_v45  ;;  %v1175_v41 = vshll.u32 %v5439_v26, 16  ;;  %v944_v7 = vld [vmem:[#allocation2 + $0xa4] sm:$0xf]  ;;  %v4804_v45 = vld [vmem:[%s6509_s3 + $0x50] sm:$0xff]  }
 0x10b   : > { %903 = vst [vmem:[#allocation2 + $0xc4] sm:$0xf] %v4004_v22  ;;  %v4002_v33 = vpack.c.bf16 %v668_v2, %v668_v2  ;;  %v671_v39 = vadd.f32 %v4038_v42, %v581_v19  ;;  %v573_v38 = vadd.f32 %v5252_v46, %v572_v10  ;;  %4216 = vmatprep.subr.bf16.mxu0 %v4802_v48  ;;  %v4820_v48 = vld [vmem:[%s6509_s3 + $0x88] sm:$0xff]  }
 0x10c   : > { %4541 = vmatmul.mubr.bf16.gmra.mxu0 %v5525_v53  ;;  %v4510_v26 = vpop.f32.mrf.mxu0  ;;  %v5542_v2 = vcombine.low %v943_v62, %v944_v7  ;;  %v1177_v43 = vrot.slane %v1175_v41, 4  ;;  %4575 = vmatpush3.bf16.msra.mxu1 %v4817_v34  ;;  %v1187_v19 = vor.u32 %v5420_v63, %v5410_v50  ;;  %v4805_v34 = vld [vmem:[%s6509_s3 + $0x10] sm:$0xff]   ;;  %v5654_v50 = vld [vmem:[%s6509_s3 + $0x238] sm:$0xff]  }
 0x10d   : > { %v941_v22 = vld [vmem:[#allocation2 + $0x94] sm:$0xf]  ;;  %901 = vst [vmem:[#allocation2 + $0xb4] sm:$0xf] %v4002_v33  ;;  %v4005_v10 = vpack.c.bf16 %v671_v39, %v671_v39  ;;  %v669_v54 = vadd.f32 %v4038_v42, %v573_v38  ;;  %v594_v40 = vadd.f32 %v4510_v26, %v5252_v46  ;;  %4544 = vmatprep.mubr.bf16.mxu0 %v5515_v57  ;;  %v5564_v42 = vrot.slane %v1189_v61, 3  ;;  %v4812_v61 = vld [vmem:[%s6509_s3 + $0x48] sm:$0xff]  }
 0x10e   : > { %v5553_v62 = vcombine.low %v940_v13, %v941_v22  ;;  %1770 = vmatmul.mubr.bf16.gmra.mxu1 %v5393_v5  ;;  %v585_v41 = vpop.f32.mrf.mxu0  ;;  %v945_v4 = vld [vmem:[#allocation2 + $0xa8] sm:$0xf]  ;;  %4217 = vmatpush3.bf16.msra.mxu0 %v4803_v21  ;;  %v1178_v24 = vor.u32 %v1177_v43, %v5502_v58  ;;  %v5569_v13 = vld [vmem:[%s6509_s3 + $0x80] sm:$0xff]  }
 0x10f   : > { %904 = vst [vmem:[#allocation2 + $0xc8] sm:$0xf] %v4005_v10  ;;  %v4003_v5 = vpack.c.bf16 %v669_v54, %v669_v54  ;;  %v674_v38 = vadd.f32 %v4041_v49, %v594_v40  ;;  %1777 = vmatprep.mubr.bf16.mxu1 %v5462_v6  ;;  %v586_v21 = vadd.f32 %v5252_v46, %v585_v41  ;;  %v949_v39 = vld [vmem:[#allocation2 + $0xc0] sm:$0x8] }
 0x110   : > { %4218 = vmatprep.subr.bf16.mxu0 %v4804_v45  ;;  %v4511_v43 = vpop.f32.mrf.mxu0  ;;  %v942_v26 = vld [vmem:[#allocation2 + $0x98] sm:$0xf]  ;;  %v5580_v10 = vcombine.low %v945_v4, %v945_v4  ;;  %v5582_v54 = vcombine.low %v944_v7, %v945_v4  ;;  %v5588_v40 = vsel %vm1111_vm1, %v1170_v8, %v1178_v24  ;;  %4576 = vmatprep.subr.bf16.mxu1 %v4820_v48  ;;  %v946_v8 = vld [vmem:[#allocation2 + $0xb0] sm:$0x8]  ;;  %v4814_v24 = vld [vmem:[%s6509_s3 + $0x8] sm:$0xff]  }
 0x111   : > { %902 = vst [vmem:[#allocation2 + $0xb8] sm:$0xf] %v4003_v5  ;;  %v4008_v45 = vpack.c.bf16 %v674_v38, %v674_v38  ;;  %v672_v41 = vadd.f32 %v4041_v49, %v586_v21  ;;  %v597_v33 = vadd.f32 %v4511_v43, %v5252_v46  ;;  %v5593_v58 = vcombine.low %v942_v26, %v942_v26 }
 0x112   : > { %4577 = vmatpush3.bf16.msra.mxu1 %v4820_v48  ;;  %v588_v4 = vpop.f32.mrf.mxu0  ;;  %v5595_v7 = vcombine.low %v941_v22, %v942_v26  ;;  %v1291_v35 = vshrl.u32 %v5580_v10, 16  ;;  %4219 = vmatpush3.bf16.msra.mxu0 %v4805_v34  ;;  %v1194_v49 = vrot.slane %v1192_v51, 4  ;;  %v950_v21 = vld [vmem:[#allocation2 + $0xc4] sm:$0xf] }
 0x113   : > { %4578 = vmatprep.subr.bf16.mxu1 %v5569_v13  ;;  %907 = vst [vmem:[#allocation2 + $0xe4] sm:$0xf] %v4008_v45  ;;  %v4006_v48 = vpack.c.bf16 %v672_v41, %v672_v41  ;;  %v675_v22 = vadd.f32 %v4042_v55, %v597_v33  ;;  %v589_v5 = vadd.f32 %v5252_v46, %v588_v4  ;;  %v1274_v38 = vshrl.u32 %v5593_v58, 16  ;;  %v4815_v34 = vld [vmem:[%s6509_s3 + $0x40] sm:$0xff]  }
 0x114   : > { %4220 = vmatprep.subr.bf16.mxu0 %v4812_v61  ;;  %v1277_v17 = vshll.u32 %v5593_v58, 16  ;;  %4545 = vmatmul.mubr.bf16.gmra.mxu0 %v5595_v7  ;;  %v4514_v51 = vpop.f32.mrf.mxu0  ;;  %v947_v43 = vld [vmem:[#allocation2 + $0xb4] sm:$0xf]  ;;  %v5614_v26 = vcombine.low %v949_v39, %v950_v21  ;;  %v1195_v33 = vor.u32 %v1194_v49, %v5564_v42  ;;  %v5619_v45 = vrot.slane %v1198_v16, 3  ;;  %v4822_v39 = vld [vmem:[%s6509_s3 + $0x1f8] sm:$0xff]  }
 0x115   : > { %905 = vst [vmem:[#allocation2 + $0xd4] sm:$0xf] %v4006_v48  ;;  %v4009_v61 = vpack.c.bf16 %v675_v22, %v675_v22  ;;  %v673_v41 = vadd.f32 %v4042_v55, %v589_v5  ;;  %v610_v4 = vadd.f32 %v4514_v51, %v5252_v46  ;;  %4548 = vmatprep.mubr.bf16.mxu0 %v5582_v54 }
 0x116   : > { %v5625_v32 = vcombine.low %v946_v8, %v947_v43  ;;  %1778 = vmatmul.mubr.bf16.gmra.mxu1 %v5383_v12  ;;  %v601_v42 = vpop.f32.mrf.mxu0  ;;  %v951_v16 = vld [vmem:[#allocation2 + $0xc8] sm:$0xf]  ;;  %4221 = vmatpush3.bf16.msra.mxu0 %v4814_v24  ;;  %v5640_v55 = vsel %vm1111_vm1, %v1187_v19, %v1195_v33  ;;  %v5644_v12 = vrot.slane %v1201_v9, 4 }
 0x117   : > { %908 = vst [vmem:[#allocation2 + $0xe8] sm:$0xf] %v4009_v61  ;;  %v4007_v8 = vpack.c.bf16 %v673_v41, %v673_v41  ;;  %v678_v22 = vadd.f32 %v4045_v56, %v610_v4  ;;  %1785 = vmatprep.mubr.bf16.mxu1 %v5454_v11  ;;  %v602_v24 = vadd.f32 %v5252_v46, %v601_v42  ;;  %v955_v42 = vld [vmem:[#allocation2 + $0xe0] sm:$0x8] }
 0x118   : > { %v1300_v5 = vshrl.u32 %v5625_v32, 16  ;;  %4222 = vmatprep.subr.bf16.mxu0 %v4815_v34  ;;  %v4515_v63 = vpop.f32.mrf.mxu0  ;;  %v948_v3 = vld [vmem:[#allocation2 + $0xb8] sm:$0xf]  ;;  %v1303_v9 = vshll.u32 %v5625_v32, 16  ;;  %v5657_v19 = vcombine.low %v951_v16, %v951_v16  ;;  %v5659_v51 = vcombine.low %v950_v21, %v951_v16  ;;  %4579 = vmatpush3.bf16.msra.mxu1 %v5569_v13  ;;  %v952_v16 = vld [vmem:[#allocation2 + $0xd0] sm:$0x8] }
 0x119   : > { %v1204_v33 = vor.u32 %v5644_v12, %v5619_v45  ;;  %906 = vst [vmem:[#allocation2 + $0xd8] sm:$0xf] %v4007_v8  ;;  %v4012_v34 = vpack.c.bf16 %v678_v22, %v678_v22  ;;  %v676_v61 = vadd.f32 %v4045_v56, %v602_v24  ;;  %v613_v41 = vadd.f32 %v4515_v63, %v5252_v46 }
 0x11a   : > { %v5667_v4 = vcombine.low %v948_v3, %v948_v3  ;;  %4344 = vmatprep.subr.bf16.mxu1 %v4822_v39  ;;  %v604_v48 = vpop.f32.mrf.mxu0  ;;  %v5669_v49 = vcombine.low %v947_v43, %v948_v3  ;;  %4223 = vmatpush3.bf16.msra.mxu0 %v4816_v30  ;;  %v1208_v13 = vrot.slane %v1206_v60, 3  ;;  %v6515_v12 = vunpack.c.h.bf16 %v5308_v36  ;;  %v956_v43 = vld [vmem:[#allocation2 + $0xe4] sm:$0xf] }
 0x11b   : > { %911 = vst [vmem:[#allocation2 + $0x104] sm:$0xf] %v4012_v34  ;;  %v4010_v56 = vpack.c.bf16 %v676_v61, %v676_v61  ;;  %v605_v22 = vadd.f32 %v5252_v46, %v604_v48  ;;  %4612 = vmatprep.subr.bf16.mxu0 %v5654_v50  ;;  %v5682_v63 = vcombine.low %v955_v42, %v956_v43  ;;  %v6516_v60 = vshll.u32 %v5460_v52, 16 }
 0x11c   : > { %v679_v8 = vadd.f32 %v6515_v12, %v613_v41  ;;  %4549 = vmatmul.mubr.bf16.gmra.mxu0 %v5669_v49  ;;  %v953_v30 = vld [vmem:[#allocation2 + $0xd4] sm:$0xf]  ;;  %v6517_v34 = vshrl.u32 %v5413_v47, 16  ;;  %v6518_v48 = vmov %v6515_v12  ;;  %v6519_v45 = vshll.u32 %v5413_v47, 16 }
 0x11d   : > { %v1211_v3 = vrot.slane %v6516_v60, 4  ;;  %909 = vst [vmem:[#allocation2 + $0xf4] sm:$0xf] %v4010_v56  ;;  %v677_v41 = vadd.f32 %v6518_v48, %v605_v22  ;;  %4552 = vmatprep.mubr.bf16.mxu0 %v5659_v51  ;;  %v5691_v12 = vcombine.low %v952_v16, %v953_v30  ;;  %v6520_v56 = vshrl.u32 %v5452_v15, 16  ;;  %v958_v16 = vld [vmem:[#allocation2 + $0xf0] sm:$0x8] }
 0x11e   : > { %v1217_v61 = vrot.slane %v6517_v34, 3  ;;  %v4013_v46 = vpack.c.bf16 %v679_v8, %v679_v8  ;;  %v1220_v21 = vrot.slane %v6519_v45, 4  ;;  %1786 = vmatmul.mubr.bf16.gmra.mxu1 %v5462_v6  ;;  %v957_v42 = vld [vmem:[#allocation2 + $0xe8] sm:$0xf]  ;;  %v961_v6 = vld [vmem:[#allocation2 + $0x100] sm:$0x8] }
 0x11f   : > { %v1212_v34 = vor.u32 %v1211_v3, %v1208_v13  ;;  %v1225_v8 = vrot.slane %v6520_v56, 3  ;;  %v4011_v36 = vpack.c.bf16 %v677_v41, %v677_v41  ;;  %1793 = vmatprep.mubr.bf16.mxu1 %v5525_v53  ;;  %v5703_v45 = vcombine.low %v957_v42, %v957_v42 }
 0x120   : > { %912 = vst [vmem:[#allocation2 + $0x108] sm:$0xf] %v4013_v46  ;;  %v954_v22 = vld [vmem:[#allocation2 + $0xd8] sm:$0xf]  ;;  %v5705_v48 = vcombine.low %v956_v43, %v957_v42  ;;  %v1221_v13 = vor.u32 %v1220_v21, %v1217_v61  ;;  %v6521_v3 = vshll.u32 %v5452_v15, 16  ;;  %v6522_v42 = vshrl.u32 %v5489_v14, 16 }
 0x121   : > { %v5708_v60 = vsel %vm1111_vm1, %v1204_v33, %v1212_v34  ;;  %910 = vst [vmem:[#allocation2 + $0xf8] sm:$0xf] %v4011_v36  ;;  %v5712_v41 = vcombine.low %v954_v22, %v954_v22  ;;  %v5714_v56 = vcombine.low %v953_v30, %v954_v22  ;;  %v6523_v21 = vshll.u32 %v5489_v14, 16 }
 0x122   : > { %v1228_v46 = vrot.slane %v6521_v3, 4  ;;  %v962_v24 = vld [vmem:[#allocation2 + $0x104] sm:$0xf]  ;;  %v1234_v33 = vrot.slane %v6522_v42, 3  ;;  %v6524_v15 = vshrl.u32 %v5523_v59, 16  ;;  %v6525_v3 = vshll.u32 %v5523_v59, 16 }
 0x123   : > { %v1237_v61 = vrot.slane %v6523_v21, 4  ;;  %v5726_v22 = vcombine.low %v961_v6, %v962_v24  ;;  %v6526_v42 = vshrl.u32 %v5480_v20, 16  ;;  %v1302_v58 = vrot.slane %v1300_v5, 3 }
 0x124   : > { %v1229_v43 = vor.u32 %v1228_v46, %v1225_v8  ;;  %v1242_v34 = vrot.slane %v6524_v15, 3  ;;  %v1245_v47 = vrot.slane %v6525_v3, 4  ;;  %4553 = vmatmul.mubr.bf16.gmra.mxu0 %v5714_v56  ;;  %v959_v8 = vld [vmem:[#allocation2 + $0xf4] sm:$0xf]  ;;  %v6527_v15 = vshll.u32 %v5480_v20, 16 }
 0x125   : > { %v1238_v14 = vor.u32 %v1237_v61, %v1234_v33  ;;  %v1251_v21 = vrot.slane %v6526_v42, 3  ;;  %4556 = vmatprep.mubr.bf16.mxu0 %v5705_v48  ;;  %v5739_v6 = vcombine.low %v958_v16, %v959_v8  ;;  %v6528_v33 = vshrl.u32 %v5513_v1, 16 }
 0x126   : > { %v5732_v46 = vsel %vm1111_vm1, %v1221_v13, %v1229_v43  ;;  %v1254_v52 = vrot.slane %v6527_v15, 4  ;;  %v1246_v30 = vor.u32 %v1245_v47, %v1242_v34  ;;  %1794 = vmatmul.mubr.bf16.gmra.mxu1 %v5454_v11  ;;  %v6529_v42 = vshll.u32 %v5513_v1, 16 }
 0x127   : > { %v963_v13 = vld [vmem:[#allocation2 + $0x108] sm:$0xf]  ;;  %v1259_v61 = vrot.slane %v6528_v33, 3  ;;  %v6530_v15 = vshrl.u32 %v5553_v62, 16  ;;  %1801 = vmatprep.mubr.bf16.mxu1 %v5515_v57  ;;  %v1368_v16 = vshrl.u32 %v5739_v6, 16  ;;  %v1371_v3 = vshll.u32 %v5739_v6, 16 }
 0x128   : > { %v1255_v43 = vor.u32 %v1254_v52, %v1251_v21  ;;  %v1262_v20 = vrot.slane %v6529_v42, 4  ;;  %v5753_v47 = vcombine.low %v963_v13, %v963_v13  ;;  %v5755_v11 = vcombine.low %v962_v24, %v963_v13  ;;  %v960_v52 = vld [vmem:[#allocation2 + $0xf8] sm:$0xf] }
 0x129   : > { %v1268_v36 = vrot.slane %v6530_v15, 3  ;;  %v5758_v34 = vsel %vm1111_vm1, %v1238_v14, %v1246_v30  ;;  %v6531_v1 = vshll.u32 %v5553_v62, 16  ;;  %v1276_v42 = vrot.slane %v1274_v38, 3 }
 0x12a   : > { %v1263_v21 = vor.u32 %v1262_v20, %v1259_v61  ;;  %v3747_v15 = vcombine.low %v960_v52, %v960_v52  ;;  %v5764_v59 = vcombine.low %v959_v8, %v960_v52  ;;  %v1393_v6 = vshrl.u32 %v5753_v47, 16 }
 0x12b   : > { %v1271_v33 = vrot.slane %v6531_v1, 4  ;;  %v1396_v39 = vshll.u32 %v5753_v47, 16  ;;  %v1279_v30 = vrot.slane %v1277_v17, 4  ;;  %v6532_v62 = vshrl.u32 %v5542_v2, 16 }
 0x12c   : > { %v5769_v24 = vsel %vm1111_vm1, %v1255_v43, %v1263_v21  ;;  %v1376_v61 = vshrl.u32 %v3747_v15, 16  ;;  %v1379_v20 = vshll.u32 %v3747_v15, 16  ;;  %v6533_v38 = vshll.u32 %v5542_v2, 16  ;;  %4557 = vmatmul.mubr.bf16.gmra.mxu0 %v5764_v59 }
 0x12d   : > { %v1272_v13 = vor.u32 %v1271_v33, %v1268_v36  ;;  %v1285_v14 = vrot.slane %v6532_v62, 3  ;;  %v1293_v52 = vrot.slane %v1291_v35, 3  ;;  %v1280_v47 = vor.u32 %v1279_v30, %v1276_v42  ;;  %4560 = vmatprep.mubr.bf16.mxu0 %v5755_v11 }
 0x12e   : > { %v1288_v8 = vrot.slane %v6533_v38, 4  ;;  %v6534_v43 = vshll.u32 %v5580_v10, 16  ;;  %v1305_v17 = vrot.slane %v1303_v9, 4  ;;  %v6535_v2 = vshrl.u32 %v5667_v4, 16  ;;  %1802 = vmatmul.mubr.bf16.gmra.mxu1 %v5525_v53 }
 0x12f   : > { %v6536_v35 = vshll.u32 %v5667_v4, 16  ;;  %v6537_v42 = vshrl.u32 %v5614_v26, 16  ;;  %v5795_v10 = vsel %vm1111_vm1, %v1272_v13, %v1280_v47  ;;  %v6538_v9 = vshll.u32 %v5614_v26, 16  ;;  %1809 = vmatprep.mubr.bf16.mxu1 %v5595_v7 }
 0x130   : > { %v1296_v36 = vrot.slane %v6534_v43, 4  ;;  %v1289_v21 = vor.u32 %v1288_v8, %v1285_v14  ;;  %v1310_v1 = vrot.slane %v6535_v2, 3  ;;  %v1306_v32 = vor.u32 %v1305_v17, %v1302_v58 }
 0x131   : > { %v1313_v33 = vrot.slane %v6536_v35, 4  ;;  %v1319_v15 = vrot.slane %v6537_v42, 3  ;;  %v1322_v30 = vrot.slane %v6538_v9, 4  ;;  %v6539_v14 = vshrl.u32 %v5657_v19, 16 }
 0x132   : > { %v1297_v5 = vor.u32 %v1296_v36, %v1293_v52  ;;  %v6540_v38 = vshll.u32 %v5657_v19, 16  ;;  %v6541_v43 = vshrl.u32 %v5691_v12, 16  ;;  %v6542_v47 = vshll.u32 %v5691_v12, 16 }
 0x133   : > { %v1314_v62 = vor.u32 %v1313_v33, %v1310_v1  ;;  %v1327_v4 = vrot.slane %v6539_v14, 3  ;;  %v1323_v52 = vor.u32 %v1322_v30, %v1319_v15  ;;  %v6543_v36 = vshrl.u32 %v5712_v41, 16 }
 0x134   : > { %v1330_v8 = vrot.slane %v6540_v38, 4  ;;  %v1336_v53 = vrot.slane %v6541_v43, 3  ;;  %v5807_v13 = vsel %vm1111_vm1, %v1289_v21, %v1297_v5  ;;  %v1339_v26 = vrot.slane %v6542_v47, 4 }
 0x135   : > { %v1344_v58 = vrot.slane %v6543_v36, 3  ;;  %v5814_v17 = vsel %vm1111_vm1, %v1306_v32, %v1314_v62  ;;  %v6544_v19 = vshll.u32 %v5712_v41, 16  ;;  %v6545_v35 = vshrl.u32 %v5682_v63, 16 }
 0x136   : > { %v1331_v2 = vor.u32 %v1330_v8, %v1327_v4  ;;  %v1340_v42 = vor.u32 %v1339_v26, %v1336_v53  ;;  %v6546_v21 = vshll.u32 %v5682_v63, 16  ;;  %v6547_v12 = vshrl.u32 %v5703_v45, 16  ;;  %1810 = vmatmul.mubr.bf16.gmra.mxu1 %v5515_v57 }
 0x137   : > { %v1347_v1 = vrot.slane %v6544_v19, 4  ;;  %v1353_v33 = vrot.slane %v6545_v35, 3  ;;  %v6548_v9 = vshll.u32 %v5703_v45, 16  ;;  %v1370_v14 = vrot.slane %v1368_v16, 3  ;;  %1817 = vmatprep.mubr.bf16.mxu1 %v5582_v54 }
 0x138   : > { %v1356_v15 = vrot.slane %v6546_v21, 4  ;;  %v1361_v5 = vrot.slane %v6547_v12, 3  ;;  %v5827_v32 = vsel %vm1111_vm1, %v1323_v52, %v1331_v2  ;;  %v1373_v41 = vrot.slane %v1371_v3, 4 }
 0x139   : > { %v1364_v30 = vrot.slane %v6548_v9, 4  ;;  %v1348_v62 = vor.u32 %v1347_v1, %v1344_v58  ;;  %v6549_v4 = vcombine.low %v5291_v25, %v5310_v37  ;;  %v1378_v63 = vrot.slane %v1376_v61, 3 }
 0x13a   : > { %v1357_v38 = vor.u32 %v1356_v15, %v1353_v33  ;;  %v1381_v43 = vrot.slane %v1379_v20, 4  ;;  %v1374_v45 = vor.u32 %v1373_v41, %v1370_v14  ;;  %v6550_v52 = vshrl.u32 %v5726_v22, 16  ;;  %v4829_v15 = vld [vmem:[%s6509_s3 + $0x230] sm:$0xff]  }
 0x13b   : > { %4561 = vmatmul.mubr.bf16.gmra.mxu0 %v6549_v4  ;;  %v1365_v8 = vor.u32 %v1364_v30, %v1361_v5  ;;  %v5834_v53 = vsel %vm1111_vm1, %v1340_v42, %v1348_v62  ;;  %v6551_v16 = vshll.u32 %v5726_v22, 16  ;;  %v1395_v61 = vrot.slane %v1393_v6, 3  ;;  %v4847_v30 = vld [vmem:[#allocation2 + $0x4] sm:$0xff]  }
 0x13c   : > { %2211 = vmatprep.mubr.bf16.mxu0 %v5404_v0  ;;  %v1387_v47 = vrot.slane %v6550_v52, 3  ;;  %v1382_v37 = vor.u32 %v1381_v43, %v1378_v63  ;;  %v1398_v20 = vrot.slane %v1396_v39, 4  ;;  %v6552_v36 = vshrl.u32 %v5303_v31, 16  ;;  %v4849_v62 = vld [vmem:[#allocation2 + $0x24] sm:$0xff]  }
 0x13d   : > { %v1390_v3 = vrot.slane %v6551_v16, 4  ;;  %v5842_v25 = vsel %vm1111_vm1, %v1357_v38, %v1365_v8  ;;  %v6553_v2 = vshll.u32 %v5303_v31, 16  ;;  %v6554_v22 = vshrl.u32 %v5317_v44, 16  ;;  %v4850_v38 = vld [vmem:[#allocation2 + $0x2c] ss:$0 sps:$4 sm:$0x11]  }
 0x13e   : > { %v1404_v58 = vrot.slane %v6552_v36, 3  ;;  %v5852_v57 = vsel %vm1111_vm1, %v1374_v45, %v1382_v37  ;;  %v1399_v35 = vor.u32 %v1398_v20, %v1395_v61  ;;  %v6555_v33 = vshll.u32 %v5317_v44, 16  ;;  %1818 = vmatmul.mubr.bf16.gmra.mxu1 %v5595_v7  ;;  %v4823_v7 = vld [vmem:[%s6509_s3 + $0x1b8] sm:$0xff]   ;;  %v4854_v37 = vld [vmem:[#allocation2 + $0x44] sm:$0xff]  }
 0x13f   : > { %v1391_v26 = vor.u32 %v1390_v3, %v1387_v47  ;;  %v1407_v19 = vrot.slane %v6553_v2, 4  ;;  %v1412_v1 = vrot.slane %v6554_v22, 3  ;;  %v6556_v39 = vor.u32 %v5297_v29, %v5286_v23  ;;  %v4834_v23 = vld [vmem:[%s6509_s3 + $0x228] sm:$0xff]   ;;  %1825 = vmatprep.mubr.bf16.mxu1 %v5669_v49  ;;  %v4845_v29 = vld [vmem:[%s6509_s3 + $0x210] sm:$0xff]  }
 0x140   : > { %v1415_v6 = vrot.slane %v6555_v33, 4  ;;  %v6557_v42 = vor.u32 %v5295_v28, %v5293_v27  ;;  %v4839_v27 = vld [vmem:[%s6509_s3 + $0x220] sm:$0xff]   ;;  %v4841_v28 = vld [vmem:[%s6509_s3 + $0x218] sm:$0xff]   ;;  %v2703_v41 = vshll.u32 %v4847_v30, 16  ;;  %v2727_v8 = vshll.u32 %v4849_v62, 16 }
 0x141   : > { %v1408_v31 = vor.u32 %v1407_v19, %v1404_v58  ;;  %v5867_v12 = vsel %vm1111_vm1, %v1391_v26, %v1399_v35  ;;  %v2701_v45 = vshrl.u32 %v4847_v30, 16  ;;  %v2732_v3 = vshll.u32 %v4850_v38, 16  ;;  %v4853_v58 = vld [vmem:[#allocation2 + $0x3c] ss:$0 sps:$4 sm:$0x11]  }
 0x142   : > { %v1128_v21 = vsel %vm1111_vm1, %v6557_v42, %v6556_v39  ;;  %v1416_v5 = vor.u32 %v1415_v6, %v1412_v1  ;;  %v2705_v52 = vrot.slane %v2703_v41, 1  ;;  %v2729_v16 = vrot.slane %v2727_v8, 1  ;;  %v4855_v1 = vld [vmem:[#allocation2 + $0x4c] ss:$0 sps:$4 sm:$0x11]   ;;  %v4856_v42 = vld [vmem:[#allocation2 + $0x54] sm:$0xff]  }
 0x143   : > { %2212 = vmatmul.mubr.bf16.vlgmr.msra.gmra.mxu0 %v1128_v21  ;;  %v2725_v20 = vshrl.u32 %v4849_v62, 16  ;;  %v2734_v22 = vrot.slane %v2732_v3, 1  ;;  %v2744_v39 = vshll.u32 %v4853_v58, 16 }
 0x144   : > { %v5870_v44 = vsel %vm1111_vm1, %v1408_v31, %v1416_v5  ;;  %2219 = vmatprep.mubr.bf16.mxu0 %v5437_v18  ;;  %4613 = vmatpush3.bf16.msra.mxu0 %v5654_v50  ;;  %v4827_v50 = vld [vmem:[%s6509_s3 + $0x1e8] sm:$0xff]   ;;  %v2706_v26 = vor.u32 %v2705_v52, %v2701_v45  ;;  %v2749_v31 = vshrl.u32 %v4854_v37, 16 }
 0x145   : > { %4614 = vmatprep.subr.bf16.mxu0 %v4829_v15  ;;  %v2730_v19 = vor.u32 %v2729_v16, %v2725_v20  ;;  %v4858_v5 = vld [vmem:[#allocation2 + $0x64] sm:$0xff]  }
 0x146   : > { %1826 = vmatmul.mubr.bf16.gmra.mxu1 %v5582_v54  ;;  %v4851_v54 = vld [vmem:[%s6509_s3 + $0x200] sm:$0xff]  }
 0x147   : > { %1833 = vmatprep.mubr.bf16.mxu1 %v5659_v51  ;;  %v5998_v21 = vsel %vm2699_vm2, %v2730_v19, %v2734_v22 }
 0x148   : > { %4615 = vmatpush3.bf16.msra.mxu0 %v4829_v15 }
 0x149   : > { %4616 = vmatprep.subr.bf16.mxu0 %v4834_v23 }
 0x14b   : > { %2220 = vmatmul.mubr.bf16.gmra.mxu0 %v5404_v0  ;;  %v4846_v0 = vld [vmem:[%s6509_s3 + $0x208] sm:$0xff]  }
 0x14c   : > { %2227 = vmatprep.mubr.bf16.mxu0 %v5588_v40  ;;  %4617 = vmatpush3.bf16.msra.mxu0 %v4834_v23 }
 0x14d   : > { %4618 = vmatprep.subr.bf16.mxu0 %v4839_v27 }
 0x14e   : > { %1834 = vmatmul.mubr.bf16.gmra.mxu1 %v5669_v49  ;;  %v4825_v49 = vld [vmem:[%s6509_s3 + $0x1f0] sm:$0xff]  }
 0x14f   : > { %1841 = vmatprep.mubr.bf16.mxu1 %v5714_v56 }
 0x150   : > { %4619 = vmatpush3.bf16.msra.mxu0 %v4839_v27  ;;  %v2746_v27 = vrot.slane %v2744_v39, 1 }
 0x151   : > { %4620 = vmatprep.subr.bf16.mxu0 %v4841_v28 }
 0x153   : > { %2228 = vmatmul.mubr.bf16.gmra.mxu0 %v5437_v18 }
 0x154   : > { %2235 = vmatprep.mubr.bf16.mxu0 %v5640_v55  ;;  %4621 = vmatpush3.bf16.msra.mxu0 %v4841_v28  ;;  %v4857_v28 = vld [vmem:[#allocation2 + $0x5c] ss:$0 sps:$4 sm:$0x11]  }
 0x155   : > { %4622 = vmatprep.subr.bf16.mxu0 %v4845_v29 }
 0x156   : > { %1842 = vmatmul.mubr.bf16.gmra.mxu1 %v5659_v51  ;;  %v4828_v51 = vld [vmem:[%s6509_s3 + $0x1a8] sm:$0xff]  }
 0x157   : > { %1849 = vmatprep.mubr.bf16.mxu1 %v5705_v48 }
 0x158   : > { %4623 = vmatpush3.bf16.msra.mxu0 %v4845_v29  ;;  %v2763_v29 = vshll.u32 %v4856_v42, 16 }
 0x159   : > { %4624 = vmatprep.subr.bf16.mxu0 %v4846_v0 }
 0x15b   : > { %2236 = vmatmul.mubr.bf16.gmra.mxu0 %v5588_v40 }
 0x15c   : > { %2243 = vmatprep.mubr.bf16.mxu0 %v5708_v60  ;;  %4625 = vmatpush3.bf16.msra.mxu0 %v4846_v0 }
 0x15d   : > { %4626 = vmatprep.subr.bf16.mxu0 %v4851_v54 }
 0x15e   : > { %1850 = vmatmul.mubr.bf16.gmra.mxu1 %v5714_v56  ;;  %v4833_v56 = vld [vmem:[%s6509_s3 + $0x198] sm:$0xff]  }
 0x15f   : > { %1857 = vmatprep.mubr.bf16.mxu1 %v5764_v59 }
 0x160   : > { %4627 = vmatpush3.bf16.msra.mxu0 %v4851_v54 }
 0x163   : > { %2244 = vmatmul.mubr.bf16.gmra.mxu0 %v5640_v55 }
 0x164   : > { %2251 = vmatprep.mubr.bf16.mxu0 %v5732_v46 }
 0x166   : > { %1858 = vmatmul.mubr.bf16.gmra.mxu1 %v5705_v48  ;;  %v4832_v48 = vld [vmem:[%s6509_s3 + $0x1d8] sm:$0xff]  }
 0x167   : > { %1865 = vmatprep.mubr.bf16.mxu1 %v5755_v11  ;;  %v4838_v11 = vld [vmem:[%s6509_s3 + $0x188] sm:$0xff]  }
 0x16b   : > { %2252 = vmatmul.mubr.bf16.gmra.mxu0 %v5708_v60 }
 0x16c   : > { %2259 = vmatprep.mubr.bf16.mxu0 %v5758_v34 }
 0x16e   : > { %1866 = vmatmul.mubr.bf16.gmra.mxu1 %v5764_v59  ;;  %v4837_v59 = vld [vmem:[%s6509_s3 + $0x1c8] sm:$0xff]  }
 0x16f   : > { %4580 = vmatprep.mubr.bf16.mxu1 %v5437_v18  ;;  %v4826_v18 = vld [vmem:[%s6509_s3 + $0x1b0] sm:$0xff]  }
 0x173   : > { %2260 = vmatmul.mubr.bf16.gmra.mxu0 %v5732_v46 }
 0x174   : > { %2267 = vmatprep.mubr.bf16.mxu0 %v5769_v24 }
 0x176   : > { %4581 = vmatmul.mubr.bf16.vlgmr.msra.gmra.mxu1 %v5588_v40  ;;  %v4830_v40 = vld [vmem:[%s6509_s3 + $0x1e0] sm:$0xff]  }
 0x177   : > { %4345 = vmatpush3.bf16.msra.mxu1 %v4823_v7  ;;  %4584 = vmatprep.mubr.bf16.mxu1 %v5640_v55  ;;  %v4831_v55 = vld [vmem:[%s6509_s3 + $0x1a0] sm:$0xff]   ;;  %v4859_v7 = vld [vmem:[#allocation2 + $0x6c] ss:$0 sps:$4 sm:$0x11]  }
 0x178   : > { %4346 = vmatprep.subr.bf16.mxu1 %v4825_v49  ;;  %v2775_v49 = vshll.u32 %v4858_v5, 16 }
 0x17b   : > { %2268 = vmatmul.mubr.bf16.gmra.mxu0 %v5758_v34  ;;  %4347 = vmatpush3.bf16.msra.mxu1 %v4826_v18 }
 0x17c   : > { %2275 = vmatprep.mubr.bf16.mxu0 %v5795_v10  ;;  %4348 = vmatprep.subr.bf16.mxu1 %v4827_v50 }
 0x17e   : > { %4585 = vmatmul.mubr.bf16.gmra.mxu1 %v5708_v60  ;;  %v4835_v60 = vld [vmem:[%s6509_s3 + $0x1d0] sm:$0xff]  }
 0x17f   : > { %4588 = vmatprep.mubr.bf16.mxu1 %v5732_v46  ;;  %4349 = vmatpush3.bf16.msra.mxu1 %v4828_v51  ;;  %v4836_v46 = vld [vmem:[%s6509_s3 + $0x190] sm:$0xff]  }
 0x180   : > { %4350 = vmatprep.subr.bf16.mxu1 %v4830_v40 }
 0x183   : > { %2276 = vmatmul.mubr.bf16.gmra.mxu0 %v5769_v24  ;;  %4351 = vmatpush3.bf16.msra.mxu1 %v4831_v55  ;;  %v2761_v55 = vshrl.u32 %v4856_v42, 16 }
 0x184   : > { %2283 = vmatprep.mubr.bf16.mxu0 %v5807_v13  ;;  %4352 = vmatprep.subr.bf16.mxu1 %v4832_v48  ;;  %v2765_v48 = vrot.slane %v2763_v29, 1  ;;  %v4867_v29 = vld [vmem:[#allocation2 + $0xac] ss:$0 sps:$4 sm:$0x11]  }
 0x186   : > { %4589 = vmatmul.mubr.bf16.gmra.mxu1 %v5758_v34  ;;  %v4840_v34 = vld [vmem:[%s6509_s3 + $0x1c0] sm:$0xff]  }
 0x187   : > { %4592 = vmatprep.mubr.bf16.mxu1 %v5769_v24  ;;  %4353 = vmatpush3.bf16.msra.mxu1 %v4833_v56  ;;  %v4842_v24 = vld [vmem:[%s6509_s3 + $0x180] sm:$0xff]   ;;  %v2768_v56 = vshll.u32 %v4857_v28, 16 }
 0x188   : > { %4354 = vmatprep.subr.bf16.mxu1 %v4835_v60  ;;  %v4860_v60 = vld [vmem:[#allocation2 + $0x74] sm:$0xff]  }
 0x189   : > { %v2770_v41 = vrot.slane %v2768_v56, 1  ;;  %v2785_v20 = vshrl.u32 %v4860_v60, 16 }
 0x18b   : > { %2284 = vmatmul.mubr.bf16.gmra.mxu0 %v5795_v10  ;;  %4355 = vmatpush3.bf16.msra.mxu1 %v4836_v46 }
 0x18c   : > { %2291 = vmatprep.mubr.bf16.mxu0 %v5814_v17  ;;  %4356 = vmatprep.subr.bf16.mxu1 %v4837_v59 }
 0x18e   : > { %4593 = vmatmul.mubr.bf16.gmra.mxu1 %v5795_v10  ;;  %v4843_v10 = vld [vmem:[#allocation2 + $0x14] sm:$0xff]  }
 0x18f   : > { %4596 = vmatprep.mubr.bf16.mxu1 %v5807_v13  ;;  %4357 = vmatpush3.bf16.msra.mxu1 %v4838_v11  ;;  %v2715_v9 = vshll.u32 %v4843_v10, 16  ;;  %v2713_v4 = vshrl.u32 %v4843_v10, 16  ;;  %v2773_v11 = vshrl.u32 %v4858_v5, 16  ;;  %v4862_v10 = vld [vmem:[#allocation2 + $0x84] sm:$0xff]  }
 0x190   : > { %4358 = vmatprep.subr.bf16.mxu1 %v4840_v34  ;;  %v2777_v34 = vrot.slane %v2775_v49, 1  ;;  %v2799_v45 = vshll.u32 %v4862_v10, 16  ;;  %v2797_v22 = vshrl.u32 %v4862_v10, 16 }
 0x192   : > { %v2778_v8 = vor.u32 %v2777_v34, %v2773_v11  ;;  %v2828_v34 = vshll.u32 %v4867_v29, 16 }
 0x193   : > { %2292 = vmatmul.mubr.bf16.gmra.mxu0 %v5807_v13  ;;  %4359 = vmatpush3.bf16.msra.mxu1 %v4842_v24  ;;  %v4844_v13 = vld [vmem:[#allocation2 + $0x1c] ss:$0 sps:$4 sm:$0x11]   ;;  %v2780_v24 = vshll.u32 %v4859_v7, 16 }
 0x194   : > { %2299 = vmatprep.mubr.bf16.mxu0 %v5827_v32  ;;  %v2720_v14 = vshll.u32 %v4844_v13, 16 }
 0x196   : > { %4597 = vmatmul.mubr.bf16.gmra.mxu1 %v5814_v17  ;;  %v2722_v43 = vrot.slane %v2720_v14, 1 }
 0x197   : > { %4600 = vmatprep.mubr.bf16.mxu1 %v5827_v32 }
 0x19b   : > { %2300 = vmatmul.mubr.bf16.gmra.mxu0 %v5814_v17  ;;  %v2717_v17 = vrot.slane %v2715_v9, 1 }
 0x19c   : > { %2307 = vmatprep.mubr.bf16.mxu0 %v5834_v53 }
 0x19d   : > { %v2718_v63 = vor.u32 %v2717_v17, %v2713_v4  ;;  %v4861_v17 = vld [vmem:[#allocation2 + $0x7c] ss:$0 sps:$4 sm:$0x11]   ;;  %v2787_v4 = vshll.u32 %v4860_v60, 16 }
 0x19e   : > { %4601 = vmatmul.mubr.bf16.gmra.mxu1 %v5834_v53  ;;  %v2792_v3 = vshll.u32 %v4861_v17, 16 }
 0x19f   : > { %4604 = vmatprep.mubr.bf16.mxu1 %v5842_v25  ;;  %v2723_v61 = vsel %vm2699_vm2, %v2718_v63, %v2722_v43  ;;  %v2782_v63 = vrot.slane %v2780_v24, 1  ;;  %v4863_v43 = vld [vmem:[#allocation2 + $0x8c] ss:$0 sps:$4 sm:$0x11]   ;;  %v4870_v24 = vld [vmem:[#allocation2 + $0xc4] sm:$0xff]  }
 0x1a1   : > { %v6022_v19 = vsel %vm2699_vm2, %v2778_v8, %v2782_v63  ;;  %v2830_v63 = vrot.slane %v2828_v34, 1  ;;  %v4876_v34 = vld [vmem:[#allocation2 + $0xf4] sm:$0xff]  }
 0x1a3   : > { %2308 = vmatmul.mubr.bf16.gmra.mxu0 %v5827_v32  ;;  %v4848_v32 = vld [vmem:[#allocation2 + $0xc] ss:$0 sps:$4 sm:$0x11]  }
 0x1a4   : > { %2315 = vmatprep.mubr.bf16.mxu0 %v5842_v25  ;;  %v2708_v47 = vshll.u32 %v4848_v32, 16  ;;  %v2766_v32 = vor.u32 %v2765_v48, %v2761_v55  ;;  %v4868_v55 = vld [vmem:[#allocation2 + $0xb4] sm:$0xff]  }
 0x1a6   : > { %4605 = vmatmul.mubr.bf16.gmra.mxu1 %v5852_v57  ;;  %v2710_v36 = vrot.slane %v2708_v47, 1 }
 0x1a7   : > { %4608 = vmatprep.mubr.bf16.mxu1 %v5867_v12 }
 0x1a8   : > { %v2711_v35 = vsel %vm2699_vm2, %v2706_v26, %v2710_v36  ;;  %v2789_v26 = vrot.slane %v2787_v4, 1  ;;  %v4864_v36 = vld [vmem:[#allocation2 + $0x94] sm:$0xff]  }
 0x1a9   : > { %v2811_v5 = vshll.u32 %v4864_v36, 16  ;;  %v2809_v49 = vshrl.u32 %v4864_v36, 16 }
 0x1ab   : > { %2316 = vmatmul.mubr.bf16.gmra.mxu0 %v5834_v53  ;;  %v4852_v53 = vld [vmem:[#allocation2 + $0x34] sm:$0xff]  }
 0x1ac   : > { %2323 = vmatprep.mubr.bf16.mxu0 %v5852_v57  ;;  %v2739_v2 = vshll.u32 %v4852_v53, 16  ;;  %v2737_v33 = vshrl.u32 %v4852_v53, 16 }
 0x1ae   : > { %4609 = vmatmul.mubr.bf16.gmra.mxu1 %v5870_v44  ;;  %v2741_v6 = vrot.slane %v2739_v2, 1 }
 0x1af   : > { %3159 = vmatprep.mubr.bf16.mxu1 %v2723_v61 }
 0x1b0   : > { %v2742_v23 = vor.u32 %v2741_v6, %v2737_v33 }
 0x1b2   : > { %v6003_v40 = vsel %vm2699_vm2, %v2742_v23, %v2746_v27 }
 0x1b3   : > { %2324 = vmatmul.mubr.bf16.gmra.mxu0 %v5842_v25  ;;  %v2751_v25 = vshll.u32 %v4854_v37, 16 }
 0x1b4   : > { %2331 = vmatprep.mubr.bf16.mxu0 %v5867_v12  ;;  %v2756_v12 = vshll.u32 %v4855_v1, 16  ;;  %v2801_v1 = vrot.slane %v2799_v45, 1  ;;  %v2847_v45 = vshll.u32 %v4870_v24, 16 }
 0x1b5   : > { %v2753_v15 = vrot.slane %v2751_v25, 1  ;;  %v2804_v25 = vshll.u32 %v4863_v43, 16  ;;  %v4871_v43 = vld [vmem:[#allocation2 + $0xcc] ss:$0 sps:$4 sm:$0x11]  }
 0x1b6   : > { %v4088_v44 = vpop.f32.mrf.mxu1  ;;  %3160 = vmatmul.mubr.bf16.vlgmr.msra.gmra.mxu1 %v2711_v35  ;;  %v4866_v35 = vld [vmem:[#allocation2 + $0xa4] sm:$0xff]   ;;  %v2802_v27 = vor.u32 %v2801_v1, %v2797_v22 }
 0x1b7   : > { %3167 = vmatprep.mubr.bf16.mxu1 %v5998_v21  ;;  %v2754_v54 = vor.u32 %v2753_v15, %v2749_v31  ;;  %v2790_v31 = vor.u32 %v2789_v26, %v2785_v20  ;;  %v2794_v15 = vrot.slane %v2792_v3, 1  ;;  %v2806_v28 = vrot.slane %v2804_v25, 1 }
 0x1b8   : > { %v4089_v0 = vpop.f32.mrf.mxu1 }
 0x1b9   : > { %v4090_v18 = vadd.f32 %v4089_v0, %v4088_v44  ;;  %v2823_v0 = vshll.u32 %v4866_v35, 16  ;;  %v6038_v60 = vsel %vm2699_vm2, %v2802_v27, %v2806_v28  ;;  %v4873_v27 = vld [vmem:[#allocation2 + $0xdc] ss:$0 sps:$4 sm:$0x11]  }
 0x1ba   : > { %v4091_v50 = vpop.f32.mrf.mxu1 }
 0x1bb   : > { %2332 = vmatmul.mubr.bf16.gmra.mxu0 %v5852_v57  ;;  %v2758_v57 = vrot.slane %v2756_v12, 1  ;;  %v4534_v51 = vpop.f32.mrf.mxu0  ;;  %v4865_v12 = vld [vmem:[#allocation2 + $0x9c] ss:$0 sps:$4 sm:$0x11]   ;;  %v2825_v11 = vrot.slane %v2823_v0, 1 }
 0x1bc   : > { %4628 = vmatprep.mubr.bf16.mxu0 %v5998_v21  ;;  %v4092_v46 = vpop.f32.mrf.mxu1 }
 0x1bd   : > { %v6007_v59 = vsel %vm2699_vm2, %v2754_v54, %v2758_v57  ;;  %v4093_v13 = vadd.f32 %v4092_v46, %v4091_v50  ;;  %v1908_v9 = vpop.f32.mrf.mxu0  ;;  %v2813_v50 = vrot.slane %v2811_v5, 1  ;;  %v2821_v46 = vshrl.u32 %v4866_v35, 16 }
 0x1be   : > { %v4094_v30 = vpop.f32.mrf.mxu1  ;;  %3168 = vmatmul.mubr.bf16.gmra.mxu1 %v2723_v61  ;;  %v6010_v62 = vadd.f32 %v4090_v18, %v1908_v9  ;;  %v6018_v61 = vsel %vm2699_vm2, %v2766_v32, %v2770_v41  ;;  %v6032_v18 = vsel %vm2699_vm2, %v2790_v31, %v2794_v15  ;;  %v4869_v32 = vld [vmem:[#allocation2 + $0xbc] ss:$0 sps:$4 sm:$0x11]   ;;  %v2835_v41 = vshll.u32 %v4868_v55, 16 }
 0x1bf   : > { %3175 = vmatprep.mubr.bf16.mxu1 %v6003_v40  ;;  %v4535_v14 = vpop.f32.mrf.mxu0  ;;  %v2814_v17 = vor.u32 %v2813_v50, %v2809_v49  ;;  %v2826_v8 = vor.u32 %v2825_v11, %v2821_v46  ;;  %v2840_v36 = vshll.u32 %v4869_v32, 16  ;;  %v2845_v35 = vshrl.u32 %v4870_v24, 16 }
 0x1c0   : > { %v4095_v38 = vpop.f32.mrf.mxu1  ;;  %v2837_v26 = vrot.slane %v2835_v41, 1  ;;  %v2864_v11 = vshll.u32 %v4873_v27, 16  ;;  %v4878_v41 = vld [vmem:[#allocation2 + $0x104] sm:$0xff]  }
 0x1c1   : > { %v4096_v52 = vadd.f32 %v4095_v38, %v4094_v30  ;;  %v1911_v47 = vpop.f32.mrf.mxu0  ;;  %v6056_v25 = vsel %vm2699_vm2, %v2826_v8, %v2830_v63 }
 0x1c2   : > { %v4097_v53 = vpop.f32.mrf.mxu1  ;;  %v6013_v16 = vadd.f32 %v4093_v13, %v1911_v47 }
 0x1c3   : > { %4629 = vmatmul.mubr.bf16.vlgmr.msra.gmra.mxu0 %v6003_v40  ;;  %v6015_v37 = vadd.f32 %v4534_v51, %v4096_v52  ;;  %v2816_v51 = vshll.u32 %v4865_v12, 16 }
 0x1c4   : > { %4632 = vmatprep.mubr.bf16.mxu0 %v6007_v59  ;;  %v4098_v58 = vpop.f32.mrf.mxu1  ;;  %v4538_v2 = vpop.f32.mrf.mxu0 }
 0x1c5   : > { %v4099_v33 = vadd.f32 %v4098_v58, %v4097_v53  ;;  %v4872_v58 = vld [vmem:[#allocation2 + $0xd4] sm:$0xff]  }
 0x1c6   : > { %v4100_v6 = vpop.f32.mrf.mxu1  ;;  %3176 = vmatmul.mubr.bf16.gmra.mxu1 %v5998_v21  ;;  %v1924_v39 = vpop.f32.mrf.mxu0  ;;  %v2859_v28 = vshll.u32 %v4872_v58, 16 }
 0x1c7   : > { %v6026_v42 = vadd.f32 %v4535_v14, %v4099_v33  ;;  %3183 = vmatprep.mubr.bf16.mxu1 %v6007_v59  ;;  %v2818_v14 = vrot.slane %v2816_v51, 1  ;;  %v2849_v33 = vrot.slane %v2847_v45, 1  ;;  %v2866_v45 = vrot.slane %v2864_v11, 1 }
 0x1c8   : > { %v4101_v44 = vpop.f32.mrf.mxu1  ;;  %v4539_v23 = vpop.f32.mrf.mxu0  ;;  %v2861_v46 = vrot.slane %v2859_v28, 1 }
 0x1c9   : > { %v4102_v54 = vadd.f32 %v4101_v44, %v4100_v6  ;;  %v6050_v20 = vsel %vm2699_vm2, %v2814_v17, %v2818_v14  ;;  %v2852_v6 = vshll.u32 %v4871_v43, 16  ;;  %v2842_v44 = vrot.slane %v2840_v36, 1 }
 0x1ca   : > { %v4103_v57 = vpop.f32.mrf.mxu1  ;;  %v1927_v7 = vpop.f32.mrf.mxu0 }
 0x1cb   : > { %4633 = vmatmul.mubr.bf16.gmra.mxu0 %v6018_v61  ;;  %v6029_v21 = vadd.f32 %v4102_v54, %v1924_v39  ;;  %v4874_v39 = vld [vmem:[#allocation2 + $0xe4] sm:$0xff]   ;;  %v2850_v54 = vor.u32 %v2849_v33, %v2845_v35  ;;  %v2895_v35 = vshll.u32 %v4878_v41, 16 }
 0x1cc   : > { %4636 = vmatprep.mubr.bf16.mxu0 %v6022_v19  ;;  %v4104_v48 = vpop.f32.mrf.mxu1  ;;  %v6034_v56 = vpop.f32.mrf.mxu0  ;;  %v2871_v49 = vshll.u32 %v4874_v39, 16  ;;  %v2869_v17 = vshrl.u32 %v4874_v39, 16 }
 0x1cd   : > { %v4105_v10 = vadd.f32 %v4104_v48, %v4103_v57  ;;  %v2854_v57 = vrot.slane %v2852_v6, 1  ;;  %v4880_v6 = vld [vmem:[#allocation2 + $0x114] sm:$0xff]  }
 0x1ce   : > { %v4106_v13 = vpop.f32.mrf.mxu1  ;;  %3184 = vmatmul.mubr.bf16.gmra.mxu1 %v6003_v40  ;;  %v1940_v9 = vpop.f32.mrf.mxu0  ;;  %v2833_v40 = vshrl.u32 %v4868_v55, 16  ;;  %v2857_v55 = vshrl.u32 %v4872_v58, 16  ;;  %v2873_v14 = vrot.slane %v2871_v49, 1 }
 0x1cf   : > { %v6042_v30 = vadd.f32 %v4105_v10, %v1927_v7  ;;  %3191 = vmatprep.mubr.bf16.mxu1 %v6018_v61  ;;  %v4875_v7 = vld [vmem:[#allocation2 + $0xec] ss:$0 sps:$4 sm:$0x11]  }
 0x1d0   : > { %v4107_v4 = vpop.f32.mrf.mxu1  ;;  %v6045_v38 = vpop.f32.mrf.mxu0  ;;  %v2838_v5 = vor.u32 %v2837_v26, %v2833_v40  ;;  %v2876_v32 = vshll.u32 %v4875_v7, 16  ;;  %v2862_v43 = vor.u32 %v2861_v46, %v2857_v55  ;;  %v2874_v36 = vor.u32 %v2873_v14, %v2869_v17 }
 0x1d1   : > { %v4108_v52 = vadd.f32 %v4107_v4, %v4106_v13  ;;  %v6078_v13 = vsel %vm2699_vm2, %v2850_v54, %v2854_v57  ;;  %v2893_v54 = vshrl.u32 %v4878_v41, 16  ;;  %v2897_v57 = vrot.slane %v2895_v35, 1 }
 0x1d2   : > { %v4109_v47 = vpop.f32.mrf.mxu1  ;;  %v1943_v53 = vpop.f32.mrf.mxu0  ;;  %v6072_v48 = vsel %vm2699_vm2, %v2838_v5, %v2842_v44  ;;  %v2878_v58 = vrot.slane %v2876_v32, 1 }
 0x1d3   : > { %4637 = vmatmul.mubr.bf16.gmra.mxu0 %v6032_v18  ;;  %v6047_v3 = vadd.f32 %v4538_v2, %v4108_v52  ;;  %v4877_v52 = vld [vmem:[#allocation2 + $0xfc] ss:$0 sps:$4 sm:$0x11]   ;;  %v2898_v14 = vor.u32 %v2897_v57, %v2893_v54 }
 0x1d4   : > { %4640 = vmatprep.mubr.bf16.mxu0 %v6038_v60  ;;  %v4110_v22 = vpop.f32.mrf.mxu1  ;;  %v6052_v1 = vpop.f32.mrf.mxu0  ;;  %v2888_v44 = vshll.u32 %v4877_v52, 16 }
 0x1d5   : > { %v4111_v2 = vadd.f32 %v4110_v22, %v4109_v47  ;;  %v2883_v47 = vshll.u32 %v4876_v34, 16  ;;  %v4879_v22 = vld [vmem:[#allocation2 + $0x10c] ss:$0 sps:$4 sm:$0x11]  }
 0x1d6   : > { %v4112_v31 = vpop.f32.mrf.mxu1  ;;  %3192 = vmatmul.mubr.bf16.gmra.mxu1 %v6007_v59  ;;  %v6060_v15 = vpop.f32.mrf.mxu0  ;;  %v2900_v7 = vshll.u32 %v4879_v22, 16 }
 0x1d7   : > { %v6062_v12 = vadd.f32 %v4539_v23, %v4111_v2  ;;  %3199 = vmatprep.mubr.bf16.mxu1 %v6022_v19  ;;  %v2885_v5 = vrot.slane %v2883_v47, 1 }
 0x1d8   : > { %v4113_v29 = vpop.f32.mrf.mxu1  ;;  %v6065_v0 = vpop.f32.mrf.mxu0  ;;  %v2902_v32 = vrot.slane %v2900_v7, 1 }
 0x1d9   : > { %v4114_v50 = vadd.f32 %v4113_v29, %v4112_v31  ;;  %v6095_v31 = vsel %vm2699_vm2, %v2862_v43, %v2866_v45  ;;  %v6101_v29 = vsel %vm2699_vm2, %v2874_v36, %v2878_v58 }
 0x1da   : > { %v4115_v51 = vpop.f32.mrf.mxu1  ;;  %v6067_v59 = vpop.f32.mrf.mxu0  ;;  %v6125_v36 = vsel %vm2699_vm2, %v2898_v14, %v2902_v32 }
 0x1db   : > { %4641 = vmatmul.mubr.bf16.gmra.mxu0 %v6050_v20  ;;  %v6069_v23 = vadd.f32 %v4114_v50, %v1940_v9  ;;  %v2907_v50 = vshll.u32 %v4880_v6, 16 }
 0x1dc   : > { %4644 = vmatprep.mubr.bf16.mxu0 %v6056_v25  ;;  %v4116_v24 = vpop.f32.mrf.mxu1  ;;  %v6074_v10 = vpop.f32.mrf.mxu0 }
 0x1dd   : > { %v4117_v9 = vadd.f32 %v4116_v24, %v4115_v51 }
 0x1de   : > { %v4118_v4 = vpop.f32.mrf.mxu1  ;;  %3200 = vmatmul.mubr.bf16.gmra.mxu1 %v6018_v61  ;;  %v6082_v8 = vpop.f32.mrf.mxu0 }
 0x1df   : > { %v6084_v63 = vadd.f32 %v4117_v9, %v1943_v53  ;;  %3207 = vmatprep.mubr.bf16.mxu1 %v6032_v18  ;;  %v2881_v53 = vshrl.u32 %v4876_v34, 16  ;;  %v2890_v34 = vrot.slane %v2888_v44, 1  ;;  %v2905_v9 = vshrl.u32 %v4880_v6, 16 }
 0x1e0   : > { %v4119_v40 = vpop.f32.mrf.mxu1  ;;  %v6087_v26 = vpop.f32.mrf.mxu0 }
 0x1e1   : > { %v4120_v33 = vadd.f32 %v4119_v40, %v4118_v4  ;;  %v2886_v11 = vor.u32 %v2885_v5, %v2881_v53  ;;  %v2909_v4 = vrot.slane %v2907_v50, 1 }
 0x1e2   : > { %v4121_v61 = vpop.f32.mrf.mxu1  ;;  %v6089_v39 = vpop.f32.mrf.mxu0 }
 0x1e3   : > { %4645 = vmatmul.mubr.bf16.gmra.mxu0 %v6072_v48  ;;  %v6092_v2 = vadd.f32 %v6034_v56, %v4120_v33  ;;  %v4881_v56 = vld [vmem:[#allocation2 + $0x11c] ss:$0 sps:$4 sm:$0x11]   ;;  %v2910_v22 = vor.u32 %v2909_v4, %v2905_v9 }
 0x1e4   : > { %4648 = vmatprep.mubr.bf16.mxu0 %v6078_v13  ;;  %v4122_v27 = vpop.f32.mrf.mxu1  ;;  %v6097_v28 = vpop.f32.mrf.mxu0  ;;  %v2912_v43 = vshll.u32 %v4881_v56, 16 }
 0x1e5   : > { %v4123_v49 = vadd.f32 %v4122_v27, %v4121_v61 }
 0x1e6   : > { %v4124_v51 = vpop.f32.mrf.mxu1  ;;  %3208 = vmatmul.mubr.bf16.gmra.mxu1 %v6022_v19  ;;  %v6105_v55 = vpop.f32.mrf.mxu0  ;;  %v2914_v35 = vrot.slane %v2912_v43, 1 }
 0x1e7   : > { %v6108_v46 = vadd.f32 %v6045_v38, %v4123_v49  ;;  %3215 = vmatprep.mubr.bf16.mxu1 %v6038_v60  ;;  %v6119_v38 = vsel %vm2699_vm2, %v2886_v11, %v2890_v34 }
 0x1e8   : > { %v4125_v24 = vpop.f32.mrf.mxu1  ;;  %v6111_v17 = vpop.f32.mrf.mxu0  ;;  %v2915_v44 = vsel %vm2699_vm2, %v2910_v22, %v2914_v35 }
 0x1e9   : > { %v4126_v41 = vadd.f32 %v4125_v24, %v4124_v51 }
 0x1ea   : > { %v4127_v45 = vpop.f32.mrf.mxu1  ;;  %v6113_v19 = vpop.f32.mrf.mxu0 }
 0x1eb   : > { %4649 = vmatmul.mubr.bf16.gmra.mxu0 %v6095_v31  ;;  %v6116_v52 = vadd.f32 %v4126_v41, %v6060_v15 }
 0x1ec   : > { %4652 = vmatprep.mubr.bf16.mxu0 %v6101_v29  ;;  %v4128_v47 = vpop.f32.mrf.mxu1  ;;  %v6121_v40 = vpop.f32.mrf.mxu0 }
 0x1ed   : > { %v4129_v58 = vadd.f32 %v4128_v47, %v4127_v45 }
 0x1ee   : > { %v4130_v33 = vpop.f32.mrf.mxu1  ;;  %3216 = vmatmul.mubr.bf16.gmra.mxu1 %v6032_v18  ;;  %v6129_v15 = vpop.f32.mrf.mxu0 }
 0x1ef   : > { %v6132_v6 = vadd.f32 %v4129_v58, %v6067_v59  ;;  %3223 = vmatprep.mubr.bf16.mxu1 %v6050_v20 }
 0x1f0   : > { %v4131_v61 = vpop.f32.mrf.mxu1  ;;  %v6135_v53 = vpop.f32.mrf.mxu0 }
 0x1f1   : > { %v4132_v5 = vadd.f32 %v4131_v61, %v4130_v33 }
 0x1f2   : > { %v4133_v27 = vpop.f32.mrf.mxu1  ;;  %v6138_v54 = vpop.f32.mrf.mxu0 }
 0x1f3   : > { %4653 = vmatmul.mubr.bf16.gmra.mxu0 %v6119_v38  ;;  %v6141_v57 = vadd.f32 %v6052_v1, %v4132_v5 }
 0x1f4   : > { %4656 = vmatprep.mubr.bf16.mxu0 %v6125_v36  ;;  %v4134_v18 = vpop.f32.mrf.mxu1 }
 0x1f5   : > { %v4135_v59 = vadd.f32 %v4134_v18, %v4133_v27 }
 0x1f6   : > { %v4136_v49 = vpop.f32.mrf.mxu1  ;;  %3224 = vmatmul.mubr.bf16.gmra.mxu1 %v6038_v60 }
 0x1f7   : > { %v6149_v50 = vadd.f32 %v6065_v0, %v4135_v59  ;;  %3231 = vmatprep.mubr.bf16.mxu1 %v6056_v25 }
 0x1f8   : > { %v4137_v51 = vpop.f32.mrf.mxu1 }
 0x1f9   : > { %v4138_v1 = vadd.f32 %v4137_v51, %v4136_v49 }
 0x1fa   : > { %v4139_v34 = vpop.f32.mrf.mxu1 }
 0x1fb   : > { %v6143_v7 = vpop.f32.mrf.mxu0  ;;  %4657 = vmatmul.mubr.bf16.gmra.mxu0 %v2915_v44  ;;  %v6157_v14 = vadd.f32 %v4138_v1, %v6082_v8 }
 0x1fc   : > { %v4140_v32 = vpop.f32.mrf.mxu1 }
 0x1fd   : > { %v6146_v56 = vpop.f32.mrf.mxu0  ;;  %v4141_v60 = vadd.f32 %v4140_v32, %v4139_v34 }
 0x1fe   : > { %v4142_v9 = vpop.f32.mrf.mxu1  ;;  %3232 = vmatmul.mubr.bf16.gmra.mxu1 %v6050_v20 }
 0x1ff   : > { %v6152_v11 = vpop.f32.mrf.mxu0  ;;  %v6161_v4 = vadd.f32 %v4141_v60, %v6089_v39  ;;  %3239 = vmatprep.mubr.bf16.mxu1 %v6072_v48 }
 0x200   : > { %v4143_v45 = vpop.f32.mrf.mxu1 }
 0x201   : > { %v6154_v24 = vpop.f32.mrf.mxu0  ;;  %v4144_v58 = vadd.f32 %v4143_v45, %v4142_v9 }
 0x202   : > { %v4145_v8 = vpop.f32.mrf.mxu1 }
 0x203   : > { %v4224_v41 = vpop.f32.mrf.mxu0  ;;  %v6168_v33 = vadd.f32 %v6074_v10, %v4144_v58 }
 0x204   : > { %v4146_v20 = vpop.f32.mrf.mxu1 }
 0x205   : > { %v4225_v0 = vpop.f32.mrf.mxu0  ;;  %v4147_v44 = vadd.f32 %v4146_v20, %v4145_v8 }
 0x206   : > { %v4226_v43 = vadd.f32 %v4225_v0, %v4224_v41  ;;  %v4148_v27 = vpop.f32.mrf.mxu1  ;;  %3240 = vmatmul.mubr.bf16.gmra.mxu1 %v6056_v25 }
 0x207   : > { %v4227_v47 = vpop.f32.mrf.mxu0  ;;  %v6175_v59 = vadd.f32 %v6087_v26, %v4147_v44  ;;  %3247 = vmatprep.mubr.bf16.mxu1 %v6078_v13 }
 0x208   : > { %v6165_v22 = vadd.f32 %v4226_v43, %v6010_v62  ;;  %v4149_v49 = vpop.f32.mrf.mxu1 }
 0x209   : > { %v4228_v35 = vpop.f32.mrf.mxu0  ;;  %v4150_v51 = vadd.f32 %v4149_v49, %v4148_v27 }
 0x20a   : > { %v4229_v61 = vadd.f32 %v4228_v35, %v4227_v47  ;;  %v4151_v34 = vpop.f32.mrf.mxu1 }
 0x20b   : > { %v4230_v5 = vpop.f32.mrf.mxu0 }
 0x20c   : > { %v6171_v39 = vadd.f32 %v4229_v61, %v6013_v16  ;;  %v6182_v16 = vadd.f32 %v4150_v51, %v6105_v55  ;;  %v4152_v25 = vpop.f32.mrf.mxu1 }
 0x20d   : > { %v4231_v18 = vpop.f32.mrf.mxu0  ;;  %v4153_v9 = vadd.f32 %v4152_v25, %v4151_v34 }
 0x20e   : > { %v4232_v62 = vadd.f32 %v4231_v18, %v4230_v5  ;;  %v4154_v0 = vpop.f32.mrf.mxu1  ;;  %3248 = vmatmul.mubr.bf16.gmra.mxu1 %v6072_v48 }
 0x20f   : > { %v4233_v10 = vpop.f32.mrf.mxu0  ;;  %v6189_v45 = vadd.f32 %v4153_v9, %v6113_v19  ;;  %3255 = vmatprep.mubr.bf16.mxu1 %v6095_v31 }
 0x210   : > { %v6179_v1 = vadd.f32 %v4232_v62, %v6015_v37  ;;  %v4155_v47 = vpop.f32.mrf.mxu1 }
 0x211   : > { %v4234_v32 = vpop.f32.mrf.mxu0  ;;  %v4156_v58 = vadd.f32 %v4155_v47, %v4154_v0 }
 0x212   : > { %v4235_v41 = vadd.f32 %v4234_v32, %v4233_v10  ;;  %v4157_v35 = vpop.f32.mrf.mxu1 }
 0x213   : > { %v4236_v60 = vpop.f32.mrf.mxu0 }
 0x214   : > { %v6185_v26 = vadd.f32 %v4235_v41, %v6026_v42  ;;  %v6196_v42 = vadd.f32 %v6097_v28, %v4156_v58  ;;  %v4158_v48 = vpop.f32.mrf.mxu1 }
 0x215   : > { %v4237_v43 = vpop.f32.mrf.mxu0  ;;  %v4159_v44 = vadd.f32 %v4158_v48, %v4157_v35 }
 0x216   : > { %v4238_v37 = vadd.f32 %v4237_v43, %v4236_v60  ;;  %v4160_v27 = vpop.f32.mrf.mxu1  ;;  %3256 = vmatmul.mubr.bf16.gmra.mxu1 %v6078_v13 }
 0x217   : > { %v4239_v55 = vpop.f32.mrf.mxu0  ;;  %v6203_v62 = vadd.f32 %v6111_v17, %v4159_v44  ;;  %3263 = vmatprep.mubr.bf16.mxu1 %v6101_v29 }
 0x218   : > { %v6193_v8 = vadd.f32 %v4238_v37, %v6029_v21  ;;  %v4161_v49 = vpop.f32.mrf.mxu1 }
 0x219   : > { %v4240_v61 = vpop.f32.mrf.mxu0  ;;  %v4162_v10 = vadd.f32 %v4161_v49, %v4160_v27 }
 0x21a   : > { %v4241_v20 = vadd.f32 %v4240_v61, %v4239_v55  ;;  %v4163_v34 = vpop.f32.mrf.mxu1 }
 0x21b   : > { %v4242_v5 = vpop.f32.mrf.mxu0 }
 0x21c   : > { %v6199_v19 = vadd.f32 %v4241_v20, %v6042_v30  ;;  %v6210_v30 = vadd.f32 %v4162_v10, %v6129_v15  ;;  %v4164_v13 = vpop.f32.mrf.mxu1 }
 0x21d   : > { %v4243_v18 = vpop.f32.mrf.mxu0  ;;  %v4165_v60 = vadd.f32 %v4164_v13, %v4163_v34 }
 0x21e   : > { %v4244_v21 = vadd.f32 %v4243_v18, %v4242_v5  ;;  %v4166_v9 = vpop.f32.mrf.mxu1  ;;  %3264 = vmatmul.mubr.bf16.gmra.mxu1 %v6095_v31 }
 0x21f   : > { %v4245_v28 = vpop.f32.mrf.mxu0  ;;  %v6217_v43 = vadd.f32 %v4165_v60, %v6138_v54  ;;  %3271 = vmatprep.mubr.bf16.mxu1 %v6119_v38 }
 0x220   : > { %v6207_v51 = vadd.f32 %v4244_v21, %v6047_v3  ;;  %v4167_v37 = vpop.f32.mrf.mxu1 }
 0x221   : > { %v4246_v32 = vpop.f32.mrf.mxu0  ;;  %v4168_v47 = vadd.f32 %v4167_v37, %v4166_v9 }
 0x222   : > { %v4247_v41 = vadd.f32 %v4246_v32, %v4245_v28  ;;  %v4169_v58 = vpop.f32.mrf.mxu1 }
 0x223   : > { %v4248_v25 = vpop.f32.mrf.mxu0 }
 0x224   : > { %v6213_v17 = vadd.f32 %v4247_v41, %v6062_v12  ;;  %v6224_v12 = vadd.f32 %v6121_v40, %v4168_v47  ;;  %v4170_v31 = vpop.f32.mrf.mxu1 }
 0x225   : > { %v4249_v0 = vpop.f32.mrf.mxu0  ;;  %v4171_v48 = vadd.f32 %v4170_v31, %v4169_v58 }
 0x226   : > { %v4250_v3 = vadd.f32 %v4249_v0, %v4248_v25  ;;  %v4172_v5 = vpop.f32.mrf.mxu1  ;;  %3272 = vmatmul.mubr.bf16.gmra.mxu1 %v6101_v29 }
 0x227   : > { %v4251_v15 = vpop.f32.mrf.mxu0  ;;  %v6231_v27 = vadd.f32 %v6135_v53, %v4171_v48  ;;  %3279 = vmatprep.mubr.bf16.mxu1 %v6125_v36 }
 0x228   : > { %v6221_v55 = vadd.f32 %v4250_v3, %v6069_v23  ;;  %v4173_v18 = vpop.f32.mrf.mxu1 }
 0x229   : > { %v4252_v35 = vpop.f32.mrf.mxu0  ;;  %v4174_v21 = vadd.f32 %v4173_v18, %v4172_v5 }
 0x22a   : > { %v4253_v61 = vadd.f32 %v4252_v35, %v4251_v15  ;;  %v4175_v28 = vpop.f32.mrf.mxu1 }
 0x22b   : > { %v4254_v20 = vpop.f32.mrf.mxu0 }
 0x22c   : > { %v6227_v54 = vadd.f32 %v4253_v61, %v6084_v63  ;;  %v6236_v63 = vadd.f32 %v4174_v21, %v6146_v56  ;;  %v4176_v32 = vpop.f32.mrf.mxu1 }
 0x22d   : > { %v4255_v44 = vpop.f32.mrf.mxu0  ;;  %v4177_v41 = vadd.f32 %v4176_v32, %v4175_v28 }
 0x22e   : > { %v4256_v23 = vadd.f32 %v4255_v44, %v4254_v20  ;;  %v4178_v13 = vpop.f32.mrf.mxu1  ;;  %3280 = vmatmul.mubr.bf16.gmra.mxu1 %v6119_v38 }
 0x22f   : > { %v4257_v40 = vpop.f32.mrf.mxu0  ;;  %v6241_v25 = vadd.f32 %v4177_v41, %v6154_v24 }
 0x230   : > { %v2254_v49 = vadd.f32 %v4256_v23, %v6092_v2  ;;  %v4179_v2 = vpop.f32.mrf.mxu1 }
 0x231   : > { %v4258_v10 = vpop.f32.mrf.mxu0  ;;  %v4180_v0 = vadd.f32 %v4179_v2, %v4178_v13 }
 0x232   : > { %v4259_v34 = vadd.f32 %v4258_v10, %v4257_v40  ;;  %v4181_v3 = vpop.f32.mrf.mxu1 }
 0x233   : > { %v4260_v29 = vpop.f32.mrf.mxu0  ;;  %v6247_v15 = vadd.f32 %v6143_v7, %v4180_v0 }
 0x234   : > { %v2257_v53 = vadd.f32 %v4259_v34, %v6108_v46  ;;  %v4182_v47 = vpop.f32.mrf.mxu1 }
 0x235   : > { %v4261_v36 = vpop.f32.mrf.mxu0  ;;  %v4183_v38 = vadd.f32 %v4182_v47, %v4181_v3 }
 0x236   : > { %v4262_v60 = vadd.f32 %v4261_v36, %v4260_v29  ;;  %v4582_v24 = vpop.f32.mrf.mxu1 }
 0x237   : > { %v4263_v9 = vpop.f32.mrf.mxu0  ;;  %v6253_v31 = vadd.f32 %v6152_v11, %v4183_v38 }
 0x238   : > { %v6244_v56 = vadd.f32 %v4262_v60, %v6116_v52  ;;  %v6256_v52 = vadd.f32 %v4582_v24, %v6179_v1  ;;  %v2374_v48 = vpop.f32.mrf.mxu1 }
 0x239   : > { %v4264_v37 = vpop.f32.mrf.mxu0  ;;  %v6259_v7 = vadd.f32 %v2374_v48, %v6165_v22 }
 0x23a   : > { %v4265_v46 = vadd.f32 %v4264_v37, %v4263_v9  ;;  %v4583_v23 = vpop.f32.mrf.mxu1 }
 0x23b   : > { %v4266_v58 = vpop.f32.mrf.mxu0 }
 0x23c   : > { %v6250_v35 = vadd.f32 %v4265_v46, %v6132_v6  ;;  %v6263_v6 = vadd.f32 %v4583_v23, %v6185_v26  ;;  %v2377_v21 = vpop.f32.mrf.mxu1 }
 0x23d   : > { %v4267_v61 = vpop.f32.mrf.mxu0  ;;  %v6266_v28 = vadd.f32 %v2377_v21, %v6171_v39 }
 0x23e   : > { %v4268_v20 = vadd.f32 %v4267_v61, %v4266_v58  ;;  %v4586_v10 = vpop.f32.mrf.mxu1 }
 0x23f   : > { %v4269_v5 = vpop.f32.mrf.mxu0  ;;  %v6270_v22 = vadd.f32 %v4586_v10, %v6207_v51 }
 0x240   : > { %v2270_v44 = vadd.f32 %v4268_v20, %v6141_v57  ;;  %v2390_v57 = vpop.f32.mrf.mxu1 }
 0x241   : > { %v4270_v18 = vpop.f32.mrf.mxu0  ;;  %v6273_v41 = vadd.f32 %v2390_v57, %v6193_v8 }
 0x242   : > { %v4271_v40 = vadd.f32 %v4270_v18, %v4269_v5  ;;  %v4587_v13 = vpop.f32.mrf.mxu1 }
 0x243   : > { %v4272_v11 = vpop.f32.mrf.mxu0  ;;  %v6277_v39 = vadd.f32 %v4587_v13, %v6213_v17 }
 0x244   : > { %v2273_v1 = vadd.f32 %v4271_v40, %v6149_v50  ;;  %v2393_v50 = vpop.f32.mrf.mxu1 }
 0x245   : > { %v4273_v34 = vpop.f32.mrf.mxu0  ;;  %v6280_v9 = vadd.f32 %v2393_v50, %v6199_v19 }
 0x246   : > { %v4274_v32 = vadd.f32 %v4273_v34, %v4272_v11  ;;  %v4590_v0 = vpop.f32.mrf.mxu1 }
 0x247   : > { %v4275_v29 = vpop.f32.mrf.mxu0  ;;  %v6283_v37 = vadd.f32 %v4590_v0, %v2254_v49 }
 0x248   : > { %v2278_v26 = vadd.f32 %v4274_v32, %v6157_v14  ;;  %v2406_v46 = vpop.f32.mrf.mxu1 }
 0x249   : > { %v4276_v36 = vpop.f32.mrf.mxu0  ;;  %v6286_v47 = vadd.f32 %v2406_v46, %v6221_v55 }
 0x24a   : > { %v4277_v60 = vadd.f32 %v4276_v36, %v4275_v29  ;;  %v4591_v58 = vpop.f32.mrf.mxu1 }
 0x24b   : > { %v4278_v2 = vpop.f32.mrf.mxu0  ;;  %v6289_v24 = vadd.f32 %v4591_v58, %v2257_v53 }
 0x24c   : > { %v2281_v51 = vadd.f32 %v4277_v60, %v6161_v4  ;;  %v2409_v61 = vpop.f32.mrf.mxu1 }
 0x24d   : > { %v4279_v3 = vpop.f32.mrf.mxu0  ;;  %v6292_v4 = vadd.f32 %v2409_v61, %v6227_v54 }
 0x24e   : > { %v4280_v8 = vadd.f32 %v4279_v3, %v4278_v2  ;;  %v4594_v48 = vpop.f32.mrf.mxu1 }
 0x24f   : > { %v4281_v14 = vpop.f32.mrf.mxu0  ;;  %v6295_v23 = vadd.f32 %v4594_v48, %v2270_v44 }
 0x250   : > { %v2286_v17 = vadd.f32 %v4280_v8, %v6168_v33  ;;  %v2422_v18 = vpop.f32.mrf.mxu1 }
 0x251   : > { %v4282_v38 = vpop.f32.mrf.mxu0  ;;  %v6298_v33 = vadd.f32 %v2422_v18, %v6244_v56 }
 0x252   : > { %v4283_v19 = vadd.f32 %v4282_v38, %v4281_v14  ;;  %v4595_v21 = vpop.f32.mrf.mxu1 }
 0x253   : > { %v4284_v20 = vpop.f32.mrf.mxu0  ;;  %v6301_v10 = vadd.f32 %v4595_v21, %v2273_v1 }
 0x254   : > { %v2289_v49 = vadd.f32 %v4283_v19, %v6175_v59  ;;  %v2425_v34 = vpop.f32.mrf.mxu1 }
 0x255   : > { %v4285_v5 = vpop.f32.mrf.mxu0  ;;  %v6304_v59 = vadd.f32 %v2425_v34, %v6250_v35 }
 0x256   : > { %v4286_v55 = vadd.f32 %v4285_v5, %v4284_v20  ;;  %v4598_v57 = vpop.f32.mrf.mxu1 }
 0x257   : > { %v4287_v40 = vpop.f32.mrf.mxu0  ;;  %v6307_v13 = vadd.f32 %v4598_v57, %v2286_v17 }
 0x258   : > { %v2294_v53 = vadd.f32 %v4286_v55, %v6182_v16  ;;  %v2438_v36 = vpop.f32.mrf.mxu1 }
 0x259   : > { %v4288_v11 = vpop.f32.mrf.mxu0  ;;  %v6309_v16 = vadd.f32 %v2438_v36, %v2278_v26 }
 0x25a   : > { %v4289_v54 = vadd.f32 %v4288_v11, %v4287_v40  ;;  %v4599_v50 = vpop.f32.mrf.mxu1 }
 0x25b   : > { %v4290_v32 = vpop.f32.mrf.mxu0  ;;  %v6312_v0 = vadd.f32 %v4599_v50, %v2289_v49 }
 0x25c   : > { %v2297_v44 = vadd.f32 %v4289_v54, %v6189_v45  ;;  %v2441_v35 = vpop.f32.mrf.mxu1 }
 0x25d   : > { %v4291_v29 = vpop.f32.mrf.mxu0  ;;  %v6314_v46 = vadd.f32 %v2441_v35, %v2281_v51 }
 0x25e   : > { %v4292_v56 = vadd.f32 %v4291_v29, %v4290_v32  ;;  %v4602_v14 = vpop.f32.mrf.mxu1 }
 0x25f   : > { %v4293_v60 = vpop.f32.mrf.mxu0 }
 0x260   : > { %v2302_v1 = vadd.f32 %v4292_v56, %v6196_v42  ;;  %v2454_v26 = vpop.f32.mrf.mxu1 }
 0x261   : > { %v4294_v2 = vpop.f32.mrf.mxu0  ;;  %v6319_v61 = vadd.f32 %v2454_v26, %v2294_v53 }
 0x262   : > { %v4295_v3 = vadd.f32 %v4294_v2, %v4293_v60  ;;  %v6317_v58 = vadd.f32 %v4602_v14, %v2302_v1  ;;  %v4603_v20 = vpop.f32.mrf.mxu1 }
 0x263   : > { %v4296_v8 = vpop.f32.mrf.mxu0 }
 0x264   : > { %v2305_v45 = vadd.f32 %v4295_v3, %v6203_v62  ;;  %v2457_v51 = vpop.f32.mrf.mxu1 }
 0x265   : > { %v4297_v17 = vpop.f32.mrf.mxu0  ;;  %v6324_v18 = vadd.f32 %v2457_v51, %v2297_v44 }
 0x266   : > { %v4298_v38 = vadd.f32 %v4297_v17, %v4296_v8  ;;  %v6322_v48 = vadd.f32 %v4603_v20, %v2305_v45  ;;  %v4606_v40 = vpop.f32.mrf.mxu1 }
 0x267   : > { %v4299_v19 = vpop.f32.mrf.mxu0 }
 0x268   : > { %v2310_v42 = vadd.f32 %v4298_v38, %v6210_v30  ;;  %v2470_v54 = vpop.f32.mrf.mxu1 }
 0x269   : > { %v4300_v49 = vpop.f32.mrf.mxu0 }
 0x26a   : > { %v4301_v5 = vadd.f32 %v4300_v49, %v4299_v19  ;;  %v6328_v32 = vadd.f32 %v2470_v54, %v2310_v42  ;;  %v4607_v30 = vpop.f32.mrf.mxu1 }
 0x26b   : > { %v4302_v55 = vpop.f32.mrf.mxu0 }
 0x26c   : > { %v2313_v62 = vadd.f32 %v4301_v5, %v6217_v43  ;;  %v2473_v36 = vpop.f32.mrf.mxu1 }
 0x26d   : > { %v4303_v21 = vpop.f32.mrf.mxu0 }
 0x26e   : > { %v4304_v11 = vadd.f32 %v4303_v21, %v4302_v55  ;;  %v6333_v1 = vadd.f32 %v2473_v36, %v2313_v62  ;;  %v4610_v43 = vpop.f32.mrf.mxu1 }
 0x26f   : > { %v4305_v34 = vpop.f32.mrf.mxu0 }
 0x270   : > { %v2318_v53 = vadd.f32 %v4304_v11, %v6224_v12  ;;  %v2486_v35 = vpop.f32.mrf.mxu1 }
 0x271   : > { %v4306_v57 = vpop.f32.mrf.mxu0 }
 0x272   : > { %v6330_v29 = vadd.f32 %v4606_v40, %v2318_v53  ;;  %v4307_v56 = vadd.f32 %v4306_v57, %v4305_v34  ;;  %v4611_v45 = vpop.f32.mrf.mxu1 }
 0x273   : > { %v4308_v60 = vpop.f32.mrf.mxu0 }
 0x274   : > { %v2321_v44 = vadd.f32 %v4307_v56, %v6231_v27  ;;  %v2489_v26 = vpop.f32.mrf.mxu1 }
 0x275   : > { %v4309_v50 = vpop.f32.mrf.mxu0 }
 0x276   : > { %v6335_v2 = vadd.f32 %v4607_v30, %v2321_v44  ;;  %v4310_v3 = vadd.f32 %v4309_v50, %v4308_v60  ;;  %v4360_v42 = vpop.f32.mrf.mxu1 }
 0x277   : > { %v4311_v12 = vpop.f32.mrf.mxu0 }
 0x278   : > { %v2326_v8 = vadd.f32 %v4310_v3, %v6236_v63  ;;  %v4361_v51 = vpop.f32.mrf.mxu1 }
 0x279   : > { %v4312_v14 = vpop.f32.mrf.mxu0  ;;  %v4362_v53 = vadd.f32 %v4361_v51, %v4360_v42 }
 0x27a   : > { %v6338_v17 = vadd.f32 %v2486_v35, %v2326_v8  ;;  %v4313_v38 = vadd.f32 %v4312_v14, %v4311_v12  ;;  %v4363_v62 = vpop.f32.mrf.mxu1 }
 0x27b   : > { %v4314_v19 = vpop.f32.mrf.mxu0 }
 0x27c   : > { %v2329_v27 = vadd.f32 %v4313_v38, %v6241_v25  ;;  %v4364_v54 = vpop.f32.mrf.mxu1 }
 0x27d   : > { %v4315_v20 = vpop.f32.mrf.mxu0 }
 0x27e   : > { %v6341_v49 = vadd.f32 %v2489_v26, %v2329_v27  ;;  %v4316_v5 = vadd.f32 %v4315_v20, %v4314_v19  ;;  %v4366_v30 = vpop.f32.mrf.mxu1 }
 0x27f   : > { %v4317_v55 = vpop.f32.mrf.mxu0 }
 0x280   : > { %v2334_v63 = vadd.f32 %v4316_v5, %v6247_v15  ;;  %v6355_v15 = vld [vmem:[%s6510_s4] ss:$0 sm:$0xff]  ;;  %v4367_v60 = vpop.f32.mrf.mxu1 }
 0x281   : > { %v4318_v40 = vpop.f32.mrf.mxu0  ;;  %v4368_v3 = vadd.f32 %v4367_v60, %v4366_v30 }
 0x282   : > { %v6344_v21 = vadd.f32 %v4610_v43, %v2334_v63  ;;  %v4319_v11 = vadd.f32 %v4318_v40, %v4317_v55  ;;  %v4365_v43 = vadd.f32 %v4364_v54, %v4363_v62  ;;  %v4369_v35 = vpop.f32.mrf.mxu1 }
 0x283   : > { %v4630_v34 = vpop.f32.mrf.mxu0 }
 0x284   : > { %v2337_v25 = vadd.f32 %v4319_v11, %v6253_v31  ;;  %v3331_v8 = vadd.f32 %v4630_v34, %v4368_v3  ;;  %v4370_v14 = vpop.f32.mrf.mxu1 }
 0x285   : > { %v3322_v57 = vpop.f32.mrf.mxu0 }
 0x286   : > { %v6348_v56 = vadd.f32 %v4611_v45, %v2337_v25  ;;  %v3323_v36 = vadd.f32 %v4362_v53, %v3322_v57  ;;  %v3451_v26 = vadd.f32 %v3331_v8, %v6256_v52  ;;  %v4372_v27 = vpop.f32.mrf.mxu1 }
 0x287   : > { %v4631_v44 = vpop.f32.mrf.mxu0 }
 0x288   : > { %v3449_v50 = vadd.f32 %v3323_v36, %v6259_v7  ;;  %v4371_v7 = vadd.f32 %v4370_v14, %v4369_v35  ;;  %v3490_v20 = vadd.f32 %v6355_v15, %v3451_v26  ;;  %v4373_v55 = vpop.f32.mrf.mxu1 }
 0x289   : > { %v3325_v31 = vpop.f32.mrf.mxu0  ;;  %v4374_v62 = vadd.f32 %v4373_v55, %v4372_v27 }
 0x28a   : > { %v3488_v12 = vadd.f32 %v6355_v15, %v3449_v50  ;;  %v3326_v45 = vadd.f32 %v4365_v43, %v3325_v31  ;;  %v3334_v51 = vadd.f32 %v4631_v44, %v4371_v7  ;;  %3522 = vst [vmem:[%s6359_s10 + $0x10] sm:$0xff] %v3490_v20  ;;  %v4375_v52 = vpop.f32.mrf.mxu1 }
 0x28b   : > { %v4634_v38 = vpop.f32.mrf.mxu0 }
 0x28c   : > { %3520 = vst [vmem:[%s6359_s10] sm:$0xff] %v3488_v12  ;;  %v3450_v19 = vadd.f32 %v3326_v45, %v6266_v28  ;;  %v3452_v63 = vadd.f32 %v3334_v51, %v6263_v6  ;;  %v4376_v54 = vpop.f32.mrf.mxu1 }
 0x28d   : > { %v3338_v42 = vpop.f32.mrf.mxu0  ;;  %v4377_v53 = vadd.f32 %v4376_v54, %v4375_v52 }
 0x28e   : > { %v3489_v5 = vadd.f32 %v6355_v15, %v3450_v19  ;;  %v3491_v28 = vadd.f32 %v6355_v15, %v3452_v63  ;;  %v3339_v11 = vadd.f32 %v4374_v62, %v3338_v42  ;;  %v4378_v30 = vpop.f32.mrf.mxu1 }
 0x28f   : > { %v4635_v40 = vpop.f32.mrf.mxu0 }
 0x290   : > { %3521 = vst [vmem:[%s6359_s10 + $0x8] sm:$0xff] %v3489_v5  ;;  %3523 = vst [vmem:[%s6359_s10 + $0x18] sm:$0xff] %v3491_v28  ;;  %v3453_v34 = vadd.f32 %v3339_v11, %v6273_v41  ;;  %v4379_v60 = vpop.f32.mrf.mxu1 }
 0x291   : > { %v3341_v25 = vpop.f32.mrf.mxu0  ;;  %v4380_v44 = vadd.f32 %v4379_v60, %v4378_v30 }
 0x292   : > { %v3492_v57 = vadd.f32 %v6355_v15, %v3453_v34  ;;  %v3342_v36 = vadd.f32 %v4377_v53, %v3341_v25  ;;  %v4381_v50 = vpop.f32.mrf.mxu1 }
 0x293   : > { %v4638_v43 = vpop.f32.mrf.mxu0  ;;  %v3347_v35 = vadd.f32 %v4634_v38, %v4380_v44 }
 0x294   : > { %3524 = vst [vmem:[%s6359_s10 + $0x20] sm:$0xff] %v3492_v57  ;;  %v3454_v6 = vadd.f32 %v3342_v36, %v6280_v9  ;;  %v4382_v31 = vpop.f32.mrf.mxu1 }
 0x295   : > { %v3455_v41 = vadd.f32 %v3347_v35, %v6270_v22  ;;  %v4383_v12 = vadd.f32 %v4382_v31, %v4381_v50  ;;  %v3354_v8 = vpop.f32.mrf.mxu0 }
 0x296   : > { %v3493_v3 = vadd.f32 %v6355_v15, %v3454_v6  ;;  %v4384_v45 = vpop.f32.mrf.mxu1 }
 0x297   : > { %v3494_v14 = vadd.f32 %v6355_v15, %v3455_v41  ;;  %v3350_v26 = vadd.f32 %v4635_v40, %v4383_v12  ;;  %v4639_v27 = vpop.f32.mrf.mxu0 }
 0x298   : > { %3525 = vst [vmem:[%s6359_s10 + $0x28] sm:$0xff] %v3493_v3  ;;  %v4385_v19 = vpop.f32.mrf.mxu1 }
 0x299   : > { %3526 = vst [vmem:[%s6359_s10 + $0x30] sm:$0xff] %v3494_v14  ;;  %v3456_v9 = vadd.f32 %v3350_v26, %v6277_v39  ;;  %v4386_v7 = vadd.f32 %v4385_v19, %v4384_v45  ;;  %v3357_v55 = vpop.f32.mrf.mxu0 }
 0x29a   : > { %v4387_v42 = vpop.f32.mrf.mxu1 }
 0x29b   : > { %v3495_v38 = vadd.f32 %v6355_v15, %v3456_v9  ;;  %v3355_v20 = vadd.f32 %v4386_v7, %v3354_v8  ;;  %v4642_v11 = vpop.f32.mrf.mxu0 }
 0x29c   : > { %v4388_v5 = vpop.f32.mrf.mxu1 }
 0x29d   : > { %3527 = vst [vmem:[%s6359_s10 + $0x38] sm:$0xff] %v3495_v38  ;;  %v3457_v22 = vadd.f32 %v3355_v20, %v6286_v47  ;;  %v4389_v51 = vadd.f32 %v4388_v5, %v4387_v42  ;;  %v3370_v57 = vpop.f32.mrf.mxu0 }
 0x29e   : > { %v4390_v63 = vpop.f32.mrf.mxu1 }
 0x29f   : > { %v3496_v62 = vadd.f32 %v6355_v15, %v3457_v22  ;;  %v3358_v40 = vadd.f32 %v4389_v51, %v3357_v55  ;;  %v4643_v3 = vpop.f32.mrf.mxu0 }
 0x2a0   : > { %v4391_v52 = vpop.f32.mrf.mxu1 }
 0x2a1   : > { %3528 = vst [vmem:[%s6359_s10 + $0x40] sm:$0xff] %v3496_v62  ;;  %v3458_v39 = vadd.f32 %v3358_v40, %v6292_v4  ;;  %v4392_v28 = vadd.f32 %v4391_v52, %v4390_v63  ;;  %v3373_v8 = vpop.f32.mrf.mxu0 }
 0x2a2   : > { %v4393_v54 = vpop.f32.mrf.mxu1 }
 0x2a3   : > { %v3497_v34 = vadd.f32 %v6355_v15, %v3458_v39  ;;  %v3363_v53 = vadd.f32 %v4638_v43, %v4392_v28  ;;  %v4646_v7 = vpop.f32.mrf.mxu0 }
 0x2a4   : > { %v4394_v25 = vpop.f32.mrf.mxu1 }
 0x2a5   : > { %3529 = vst [vmem:[%s6359_s10 + $0x48] sm:$0xff] %v3497_v34  ;;  %v3459_v47 = vadd.f32 %v3363_v53, %v6283_v37  ;;  %v4395_v30 = vadd.f32 %v4394_v25, %v4393_v54  ;;  %v3386_v22 = vpop.f32.mrf.mxu0 }
 0x2a6   : > { %v4396_v36 = vpop.f32.mrf.mxu1 }
 0x2a7   : > { %v3498_v60 = vadd.f32 %v6355_v15, %v3459_v47  ;;  %v3366_v6 = vadd.f32 %v4639_v27, %v4395_v30  ;;  %v4647_v52 = vpop.f32.mrf.mxu0 }
 0x2a8   : > { %v4397_v44 = vpop.f32.mrf.mxu1 }
 0x2a9   : > { %3530 = vst [vmem:[%s6359_s10 + $0x50] sm:$0xff] %v3498_v60  ;;  %v3460_v4 = vadd.f32 %v3366_v6, %v6289_v24  ;;  %v4398_v50 = vadd.f32 %v4397_v44, %v4396_v36  ;;  %v3389_v53 = vpop.f32.mrf.mxu0 }
 0x2aa   : > { %v4399_v35 = vpop.f32.mrf.mxu1 }
 0x2ab   : > { %v3499_v43 = vadd.f32 %v6355_v15, %v3460_v4  ;;  %v3371_v31 = vadd.f32 %v4398_v50, %v3370_v57  ;;  %v4650_v60 = vpop.f32.mrf.mxu0 }
 0x2ac   : > { %v4400_v41 = vpop.f32.mrf.mxu1 }
 0x2ad   : > { %3531 = vst [vmem:[%s6359_s10 + $0x58] sm:$0xff] %v3499_v43  ;;  %v3461_v37 = vadd.f32 %v3371_v31, %v6298_v33  ;;  %v4401_v12 = vadd.f32 %v4400_v41, %v4399_v35  ;;  %v3402_v35 = vpop.f32.mrf.mxu0 }
 0x2ae   : > { %v4402_v45 = vpop.f32.mrf.mxu1 }
 0x2af   : > { %v3500_v14 = vadd.f32 %v6355_v15, %v3461_v37  ;;  %v3374_v26 = vadd.f32 %v4401_v12, %v3373_v8  ;;  %v4651_v8 = vpop.f32.mrf.mxu0 }
 0x2b0   : > { %v4403_v19 = vpop.f32.mrf.mxu1 }
 0x2b1   : > { %3532 = vst [vmem:[%s6359_s10 + $0x60] sm:$0xff] %v3500_v14  ;;  %v3462_v24 = vadd.f32 %v3374_v26, %v6304_v59  ;;  %v4404_v9 = vadd.f32 %v4403_v19, %v4402_v45 }
 0x2b2   : > { %v4405_v27 = vpop.f32.mrf.mxu1 }
 0x2b3   : > { %v3501_v42 = vadd.f32 %v6355_v15, %v3462_v24  ;;  %v3379_v38 = vadd.f32 %v4642_v11, %v4404_v9  ;;  %v3405_v9 = vpop.f32.mrf.mxu0 }
 0x2b4   : > { %v4406_v20 = vpop.f32.mrf.mxu1 }
 0x2b5   : > { %3533 = vst [vmem:[%s6359_s10 + $0x68] sm:$0xff] %v3501_v42  ;;  %v3463_v33 = vadd.f32 %v3379_v38, %v6295_v23  ;;  %v4407_v5 = vadd.f32 %v4406_v20, %v4405_v27 }
 0x2b6   : > { %v4408_v51 = vpop.f32.mrf.mxu1 }
 0x2b7   : > { %v3502_v55 = vadd.f32 %v6355_v15, %v3463_v33  ;;  %v3382_v63 = vadd.f32 %v4643_v3, %v4407_v5  ;;  %v4654_v33 = vpop.f32.mrf.mxu0 }
 0x2b8   : > { %v4409_v62 = vpop.f32.mrf.mxu1 }
 0x2b9   : > { %3534 = vst [vmem:[%s6359_s10 + $0x70] sm:$0xff] %v3502_v55  ;;  %v3464_v59 = vadd.f32 %v3382_v63, %v6301_v10  ;;  %v4410_v40 = vadd.f32 %v4409_v62, %v4408_v51  ;;  %v3418_v62 = vpop.f32.mrf.mxu0 }
 0x2ba   : > { %v4411_v39 = vpop.f32.mrf.mxu1 }
 0x2bb   : > { %v3503_v28 = vadd.f32 %v6355_v15, %v3464_v59  ;;  %v3387_v11 = vadd.f32 %v4410_v40, %v3386_v22 }
 0x2bc   : > { %v4412_v54 = vpop.f32.mrf.mxu1 }
 0x2bd   : > { %3535 = vst [vmem:[%s6359_s10 + $0x78] sm:$0xff] %v3503_v28  ;;  %v3465_v23 = vadd.f32 %v3387_v11, %v6309_v16  ;;  %v4413_v34 = vadd.f32 %v4412_v54, %v4411_v39  ;;  %v4655_v11 = vpop.f32.mrf.mxu0 }
 0x2be   : > { %v4414_v25 = vpop.f32.mrf.mxu1 }
 0x2bf   : > { %v3504_v47 = vadd.f32 %v6355_v15, %v3465_v23  ;;  %v3390_v30 = vadd.f32 %v4413_v34, %v3389_v53 }
 0x2c0   : > { %v4415_v57 = vpop.f32.mrf.mxu1 }
 0x2c1   : > { %3536 = vst [vmem:[%s6359_s10 + $0x80] sm:$0xff] %v3504_v47  ;;  %v3466_v10 = vadd.f32 %v3390_v30, %v6314_v46  ;;  %v4416_v36 = vadd.f32 %v4415_v57, %v4414_v25  ;;  %v3421_v47 = vpop.f32.mrf.mxu0 }
 0x2c2   : > { %v4417_v6 = vpop.f32.mrf.mxu1 }
 0x2c3   : > { %v3505_v44 = vadd.f32 %v6355_v15, %v3466_v10  ;;  %v3395_v4 = vadd.f32 %v4646_v7, %v4416_v36 }
 0x2c4   : > { %v4418_v50 = vpop.f32.mrf.mxu1 }
 0x2c5   : > { %3537 = vst [vmem:[%s6359_s10 + $0x88] sm:$0xff] %v3505_v44  ;;  %v3467_v16 = vadd.f32 %v3395_v4, %v6307_v13  ;;  %v4419_v3 = vadd.f32 %v4418_v50, %v4417_v6 }
 0x2c6   : > { %v4420_v43 = vpop.f32.mrf.mxu1 }
 0x2c7   : > { %v3506_v31 = vadd.f32 %v6355_v15, %v3467_v16  ;;  %v3398_v41 = vadd.f32 %v4647_v52, %v4419_v3 }
 0x2c8   : > { %v4421_v37 = vpop.f32.mrf.mxu1 }
 0x2c9   : > { %3538 = vst [vmem:[%s6359_s10 + $0x90] sm:$0xff] %v3506_v31  ;;  %v3468_v46 = vadd.f32 %v3398_v41, %v6312_v0  ;;  %v4422_v12 = vadd.f32 %v4421_v37, %v4420_v43 }
 0x2ca   : > { %v4423_v45 = vpop.f32.mrf.mxu1 }
 0x2cb   : > { %v3507_v14 = vadd.f32 %v6355_v15, %v3468_v46  ;;  %v3403_v26 = vadd.f32 %v4422_v12, %v3402_v35 }
 0x2cc   : > { %v4424_v19 = vpop.f32.mrf.mxu1 }
 0x2cd   : > { %3539 = vst [vmem:[%s6359_s10 + $0x98] sm:$0xff] %v3507_v14  ;;  %v3469_v13 = vadd.f32 %v3403_v26, %v6319_v61  ;;  %v4425_v24 = vadd.f32 %v4424_v19, %v4423_v45 }
 0x2ce   : > { %v4426_v7 = vpop.f32.mrf.mxu1 }
 0x2cf   : > { %v3508_v27 = vadd.f32 %v6355_v15, %v3469_v13  ;;  %v3406_v42 = vadd.f32 %v4425_v24, %v3405_v9 }
 0x2d0   : > { %v4427_v38 = vpop.f32.mrf.mxu1 }
 0x2d1   : > { %3540 = vst [vmem:[%s6359_s10 + $0xa0] sm:$0xff] %v3508_v27  ;;  %v3470_v0 = vadd.f32 %v3406_v42, %v6324_v18  ;;  %v4428_v20 = vadd.f32 %v4427_v38, %v4426_v7 }
 0x2d2   : > { %v4429_v5 = vpop.f32.mrf.mxu1 }
 0x2d3   : > { %v3509_v22 = vadd.f32 %v6355_v15, %v3470_v0  ;;  %v3411_v51 = vadd.f32 %v4650_v60, %v4428_v20 }
 0x2d4   : > { %v4430_v55 = vpop.f32.mrf.mxu1 }
 0x2d5   : > { %3541 = vst [vmem:[%s6359_s10 + $0xa8] sm:$0xff] %v3509_v22  ;;  %v3471_v61 = vadd.f32 %v3411_v51, %v6317_v58  ;;  %v4431_v63 = vadd.f32 %v4430_v55, %v4429_v5 }
 0x2d6   : > { %v4432_v59 = vpop.f32.mrf.mxu1 }
 0x2d7   : > { %v3510_v40 = vadd.f32 %v6355_v15, %v3471_v61  ;;  %v3414_v52 = vadd.f32 %v4651_v8, %v4431_v63 }
 0x2d8   : > { %v4433_v39 = vpop.f32.mrf.mxu1 }
 0x2d9   : > { %3542 = vst [vmem:[%s6359_s10 + $0xb0] sm:$0xff] %v3510_v40  ;;  %v3472_v18 = vadd.f32 %v3414_v52, %v6322_v48  ;;  %v4434_v28 = vadd.f32 %v4433_v39, %v4432_v59  ;;  %v4658_v48 = vpop.f32.mrf.mxu0 }
 0x2da   : > { %v4435_v54 = vpop.f32.mrf.mxu1 }
 0x2db   : > { %v3511_v23 = vadd.f32 %v6355_v15, %v3472_v18  ;;  %v3419_v34 = vadd.f32 %v4434_v28, %v3418_v62 }
 0x2dc   : > { %v4436_v53 = vpop.f32.mrf.mxu1 }
 0x2dd   : > { %3543 = vst [vmem:[%s6359_s10 + $0xb8] sm:$0xff] %v3511_v23  ;;  %v3473_v58 = vadd.f32 %v3419_v34, %v6328_v32  ;;  %v4437_v25 = vadd.f32 %v4436_v53, %v4435_v54  ;;  %v3434_v32 = vpop.f32.mrf.mxu0 }
 0x2de   : > { %v4438_v30 = vpop.f32.mrf.mxu1 }
 0x2df   : > { %v3512_v57 = vadd.f32 %v6355_v15, %v3473_v58  ;;  %v3422_v10 = vadd.f32 %v4437_v25, %v3421_v47  ;;  %v4659_v46 = vpop.f32.mrf.mxu0 }
 0x2e0   : > { %v4439_v36 = vpop.f32.mrf.mxu1 }
 0x2e1   : > { %3544 = vst [vmem:[%s6359_s10 + $0xc0] sm:$0xff] %v3512_v57  ;;  %v3474_v60 = vadd.f32 %v3422_v10, %v6333_v1  ;;  %v4440_v6 = vadd.f32 %v4439_v36, %v4438_v30  ;;  %v3437_v19 = vpop.f32.mrf.mxu0 }
 0x2e2   : > { %v4441_v44 = vpop.f32.mrf.mxu1 }
 0x2e3   : > { %v3513_v4 = vadd.f32 %v6355_v15, %v3474_v60  ;;  %v3427_v50 = vadd.f32 %v4654_v33, %v4440_v6 }
 0x2e4   : > { %v4442_v16 = vpop.f32.mrf.mxu1 }
 0x2e5   : > { %3545 = vst [vmem:[%s6359_s10 + $0xc8] sm:$0xff] %v3513_v4  ;;  %v3475_v3 = vadd.f32 %v3427_v50, %v6330_v29  ;;  %v4443_v35 = vadd.f32 %v4442_v16, %v4441_v44 }
 0x2e6   : > { %v4444_v43 = vpop.f32.mrf.mxu1 }
 0x2e7   : > { %v3514_v31 = vadd.f32 %v6355_v15, %v3475_v3  ;;  %v3430_v41 = vadd.f32 %v4655_v11, %v4443_v35 }
 0x2e8   : > { %v4445_v37 = vpop.f32.mrf.mxu1 }
 0x2e9   : > { %3546 = vst [vmem:[%s6359_s10 + $0xd0] sm:$0xff] %v3514_v31  ;;  %v3476_v1 = vadd.f32 %v3430_v41, %v6335_v2  ;;  %v4446_v12 = vadd.f32 %v4445_v37, %v4444_v43 }
 0x2ea   : > { %v4447_v8 = vpop.f32.mrf.mxu1 }
 0x2eb   : > { %v3515_v45 = vadd.f32 %v6355_v15, %v3476_v1  ;;  %v3435_v14 = vadd.f32 %v4446_v12, %v3434_v32 }
 0x2ec   : > { %v4448_v26 = vpop.f32.mrf.mxu1 }
 0x2ed   : > { %3547 = vst [vmem:[%s6359_s10 + $0xd8] sm:$0xff] %v3515_v45  ;;  %v3477_v29 = vadd.f32 %v3435_v14, %v6338_v17  ;;  %v4449_v13 = vadd.f32 %v4448_v26, %v4447_v8 }
 0x2ee   : > { %v4450_v24 = vpop.f32.mrf.mxu1 }
 0x2ef   : > { %v3516_v9 = vadd.f32 %v6355_v15, %v3477_v29  ;;  %v3438_v7 = vadd.f32 %v4449_v13, %v3437_v19 }
 0x2f0   : > { %v4451_v2 = vpop.f32.mrf.mxu1 }
 0x2f1   : > { %3548 = vst [vmem:[%s6359_s10 + $0xe0] sm:$0xff] %v3516_v9  ;;  %v3478_v27 = vadd.f32 %v3438_v7, %v6341_v49  ;;  %v4452_v42 = vadd.f32 %v4451_v2, %v4450_v24 }
 0x2f2   : > { %v4453_v38 = vpop.f32.mrf.mxu1 }
 0x2f3   : > { %v3517_v0 = vadd.f32 %v6355_v15, %v3478_v27  ;;  %v3443_v20 = vadd.f32 %v4658_v48, %v4452_v42 }
 0x2f4   : > { %v4454_v17 = vpop.f32.mrf.mxu1 }
 0x2f5   : > { %3549 = vst [vmem:[%s6359_s10 + $0xe8] sm:$0xff] %v3517_v0  ;;  %v3479_v33 = vadd.f32 %v3443_v20, %v6344_v21  ;;  %v4455_v5 = vadd.f32 %v4454_v17, %v4453_v38 }
 0x2f7   : > { %v3518_v22 = vadd.f32 %v6355_v15, %v3479_v33  ;;  %v3446_v51 = vadd.f32 %v4659_v46, %v4455_v5 }
 0x2f9   : > { %3550 = vst [vmem:[%s6359_s10 + $0xf0] sm:$0xff] %v3518_v22  ;;  %v3480_v49 = vadd.f32 %v3446_v51, %v6348_v56 }
 0x2fb   : > { %v3519_v21 = vadd.f32 %v6355_v15, %v3480_v49 }
 0x2fd   : > { %3551 = vst [vmem:[%s6359_s10 + $0xf8] sm:$0xff] %v3519_v21 }
 0x2fe   : > { %4895 = shalt.err (!%p4892_p3)
}
 0x2ff   : > { %s4896_s20 = scalar_lea.hbm %s6458_s16, 4096  ;;  %s4900_s29 = scalar_lea.hbm %s6512_s6, 8192 }
 0x300   : > { %p4897_p4 = scmp.ne.s32.totalorder %s6458_s16, %s4896_s20  ;;  %p4901_p9 = scmp.lt.s32.totalorder %s6458_s16, %s6512_s6 }
 0x301   : > { %p4902_p10 = scmp.lt.s32.totalorder %s4900_s29, %s4896_s20 }
 0x302   : > { %p4898_p7 = pnand %p4897_p4, %p5021_p5 }
 0x303   : > { %p4903_p11 = por %p4902_p10, %p4901_p9 }
 0x304   : > { %p4899_p8 = pneg %p4898_p7 }
 0x306   : > { %p4904_p12 = pnand %p4903_p11, %p4899_p8 }
 0x308   : > { %4907 = shalt.err (!%p4904_p12)
}
 0x309   : > { %s4946_s11 = smov 128   ;;  %s4947_s14 = smov 8  }
 0x30a   : > { %4660 = dma.vmem_to_hbm [thread:$0]  (%p5021_p5), %s6460_s12, 4096, %s6458_s16, %s6466_s17, %s4946_s11, %s4946_s11, %s4947_s14  }
 0x30b PF: > { %p4666_p13 = scmp.ge.s32.totalorder %s4942_s24, 2  ;;  %s3581_s15 = sand.u32 1, %s4930_s21  }
 0x30c   : > { %s3582_s25 = scalar_lea.sflag [#allocation4], %s3581_s15 }
 0x30d   : > { %p4663_p0 = pnand %p4666_p13, %p5025_p6 }
 0x30f   : > { %p4664_p1 = pneg %p4663_p0 }
 0x311   : > { %4925 = dma.done.wait (%p4664_p1), %s3582_s25, 4096  }
 0x312   : > { %4927 = vsyncadd (%p4664_p1), %s3582_s25, 4294963200  ;;  %p16_p2 = scmp.ge.s32.totalorder %s5008_s27, 4   ;;  %s6558_s21 = smov %s4934_s22 }
 0x313   : > { %s6559_s22 = smov %s4938_s23  ;;  %s6560_s23 = smov %s5019_s30 }
 0x314   : > { %s6561_s24 = smov %s5008_s27  ;;  %18 = sbr.rel (!%p16_p2) target bundleno = 3 (0x3), region = 85 }
 0x319   :  { %3587 = vsyncpa [#allocation4], 1 }
 0x31a   :  { %3589 = vsyncpa [#allocation4 + $0x1], 1 }

</bundles_post_ra>
